<compile_context>
chip_gen: v6e
topology: v6e:2x2x1
jax: 0.10.0
libtpu: 0.0.40
codegen_flags: <defaults>
</compile_context>

<pallas_src>
import functools

import jax
import jax.numpy as jnp
from jax.experimental import pallas as pl
from jax.experimental.pallas import tpu as pltpu


# ---------------------------------------------------------------------------
# Small helpers
# ---------------------------------------------------------------------------
def _pick_tile(n: int, cap: int, mult: int = 8) -> int:
    """Largest divisor of `n` that is <= cap and a multiple of `mult`; falls back to n."""
    for t in range(min(cap, n), 0, -1):
        if n % t == 0 and t % mult == 0:
            return t
    return n


_VMEM_LIMIT = 32 * 1024 * 1024  # safe on v5e/v6e (128 MiB) and v7x (64 MiB) alike


# ---------------------------------------------------------------------------
# Kernel 1: conv-as-matmul, producing the TRANSPOSED activation [B, D, Hp*Wp]
#           (exactly the layout stage 2 wants, so no wrapper transpose is needed)
# ---------------------------------------------------------------------------
def _conv_kernel(p_ref, w_ref, b_ref, o_ref):
    # p: [K1, M] im2col'd patches (transposed) for one image
    # w: [td, K1] conv weight tile (PyTorch [D, C*P*P] flatten order)
    # b: [td, 1]  conv bias tile
    # o: [td, M]  conv output tile, already in NCHW-flattened order
    y = jnp.dot(w_ref[...], p_ref[...], preferred_element_type=jnp.float32)  # [td, M]
    o_ref[...] = (y + b_ref[...]).astype(o_ref.dtype)


def conv_transposed_pallas(patches_t, w_flat, b_col, *, td):
    B, K1, M = patches_t.shape
    D = w_flat.shape[0]
    assert D % td == 0
    return pl.pallas_call(
        _conv_kernel,
        out_shape=jax.ShapeDtypeStruct((B, D, M), jnp.float32),
        grid_spec=pltpu.PrefetchScalarGridSpec(
            num_scalar_prefetch=0,
            grid=(B, D // td),
            in_specs=[
                pl.BlockSpec((None, K1, M), lambda b, i: (b, 0, 0)),  # patches_T (full K1/M)
                pl.BlockSpec((td, K1), lambda b, i: (i, 0)),          # conv weight tile
                pl.BlockSpec((td, 1), lambda b, i: (i, 0)),           # conv bias tile
            ],
            out_specs=pl.BlockSpec((None, td, M), lambda b, i: (b, i, 0)),
        ),
        compiler_params=pltpu.CompilerParams(
            dimension_semantics=("parallel", "parallel"),
            vmem_limit_bytes=_VMEM_LIMIT,
        ),
    )(patches_t, w_flat, b_col)


# ---------------------------------------------------------------------------
# Kernel 2: fused Linear + LayerNorm over rows (row-tiled, pipelined, lane-dense)
# ---------------------------------------------------------------------------
def _linear_ln_kernel(x_ref, w_ref, b_ref, g_ref, beta_ref, o_ref, *, eps):
    # x: [tm, K], w: [K, D], b/g/beta: [1, D]  ->  o: [tm, D]
    y = jnp.dot(x_ref[...], w_ref[...], preferred_element_type=jnp.float32) + b_ref[...]
    n = y.shape[-1]
    inv_n = 1.0 / n
    mean = jnp.sum(y, axis=-1, keepdims=True) * inv_n
    # one-pass statistics: var = E[y^2] - mean^2 (halves the cross-lane reductions)
    var = jnp.sum(y * y, axis=-1, keepdims=True) * inv_n - mean * mean
    inv = jax.lax.rsqrt(jnp.maximum(var, 0.0) + eps)        # EUP slot
    o_ref[...] = ((y - mean) * inv * g_ref[...] + beta_ref[...]).astype(o_ref.dtype)


def linear_layernorm_pallas(x, w, b, gamma, beta, eps, *, row_tile=1024):
    M, K = x.shape
    D = w.shape[1]
    tm = _pick_tile(M, row_tile)
    return pl.pallas_call(
        functools.partial(_linear_ln_kernel, eps=eps),
        out_shape=jax.ShapeDtypeStruct((M, D), jnp.float32),
        grid_spec=pltpu.PrefetchScalarGridSpec(
            num_scalar_prefetch=0,
            grid=(M // tm,),
            in_specs=[
                pl.BlockSpec((tm, K), lambda i: (i, 0)),
                pl.BlockSpec((K, D), lambda i: (0, 0)),
                pl.BlockSpec((1, D), lambda i: (0, 0)),
                pl.BlockSpec((1, D), lambda i: (0, 0)),
                pl.BlockSpec((1, D), lambda i: (0, 0)),
            ],
            out_specs=pl.BlockSpec((tm, D), lambda i: (i, 0)),
        ),
        compiler_params=pltpu.CompilerParams(
            dimension_semantics=("parallel",),
            vmem_limit_bytes=_VMEM_LIMIT,
        ),
    )(x, w, b, gamma, beta)


# ---------------------------------------------------------------------------
# Kernel 3: absolute positional embedding for ONE row (arange generated in-kernel)
# ---------------------------------------------------------------------------
def _pos_ln_kernel(w_ref, b_ref, g_ref, beta_ref, o_ref, *, eps):
    # w: [S, D] (posLinear weight, transposed), b/g/beta: [1, D] -> o: [1, D]
    S = w_ref.shape[0]
    pos = jax.lax.broadcasted_iota(jnp.int32, (S, 1), 0).astype(jnp.float32)
    # tiny-K "matmul" done on the VPU (multiply) + XLU (cross-sublane reduce), full f32
    y = jnp.sum(w_ref[...] * pos, axis=0, keepdims=True) + b_ref[...]      # [1, D]
    n = y.shape[-1]
    inv_n = 1.0 / n
    mean = jnp.sum(y, axis=-1, keepdims=True) * inv_n
    var = jnp.sum(y * y, axis=-1, keepdims=True) * inv_n - mean * mean
    inv = jax.lax.rsqrt(jnp.maximum(var, 0.0) + eps)
    o_ref[...] = ((y - mean) * inv * g_ref[...] + beta_ref[...]).astype(o_ref.dtype)


def pos_emb_layernorm_pallas(w, b, gamma, beta, eps):
    # Whole-array VMEM blocks: runs once, arrays are tiny ([max_seq, D]).
    D = w.shape[1]
    vmem = lambda: pl.BlockSpec(memory_space=pltpu.MemorySpace.VMEM)
    return pl.pallas_call(
        functools.partial(_pos_ln_kernel, eps=eps),
        out_shape=jax.ShapeDtypeStruct((1, D), jnp.float32),
        in_specs=[vmem(), vmem(), vmem(), vmem()],
        out_specs=vmem(),
        compiler_params=pltpu.CompilerParams(vmem_limit_bytes=_VMEM_LIMIT),
    )(w, b, gamma, beta)


# ---------------------------------------------------------------------------
# Module: parameters + forward
# ---------------------------------------------------------------------------
def init_params(key, cfg):
    C, P, D = cfg["channels"], cfg["patch_size"], cfg["dim_model"]
    max_seq = cfg["num_patches"] + 1
    ks = jax.random.split(key, 6)

    def uinit(k, shape, fan_in):
        bound = 1.0 / jnp.sqrt(jnp.float32(fan_in))
        return jax.random.uniform(k, shape, jnp.float32, -bound, bound)

    k_conv = C * P * P            # conv fan-in
    k_pe = P * P * C              # patch_emb Linear in_features
    return dict(
        conv_w=uinit(ks[0], (D, C, P, P), k_conv),   # PyTorch Conv2d weight layout
        conv_b=uinit(ks[1], (D,), k_conv),
        pe_w=uinit(ks[2], (D, k_pe), k_pe),          # PyTorch Linear [out, in]
        pe_b=uinit(ks[3], (D,), k_pe),
        pos_w=uinit(ks[4], (D, max_seq), max_seq),
        pos_b=uinit(ks[5], (D,), max_seq),
        ln1_g=jnp.ones((D,), jnp.float32),
        ln1_b=jnp.zeros((D,), jnp.float32),
        ln2_g=jnp.ones((D,), jnp.float32),
        ln2_b=jnp.zeros((D,), jnp.float32),
    )


def embedding_forward(params, x, cfg):
    # layout: x is NCHW [B, C, H, W]
    # TODO(synk): reference `assert inputs.ndim != 4` is inverted; skipped on purpose.
    B, C, H, W = x.shape
    P, D = cfg["patch_size"], cfg["dim_model"]
    eps = cfg["layer_norm_eps"]
    Hp, Wp = H // P, W // P
    K1 = C * P * P
    # The reference only runs when the patch_emb in_features equals the width-in-patches:
    assert Wp == K1, "reference forward requires W / patch_size == patch_size**2 * channels"

    # --- im2col (already transposed): patches_T[b, (c,ph,pw), (hp,wp)] = x[b, c, hp*P+ph, wp*P+pw]
    # Done once in plain JAX on the (small) raw input; both Pallas matmuls then consume
    # dense, lane-aligned blocks with no further relayout anywhere.
    # TODO(synk): folding this gather into a BlockSpec index_map is blocked by the (8,128)
    # block-shape rule for patch-sized windows; the raw input is tiny relative to activations.
    patches_t = (
        x.reshape(B, C, Hp, P, Wp, P)
        .transpose(0, 1, 3, 5, 2, 4)               # [B, C, P, P, Hp, Wp]
        .reshape(B, K1, Hp * Wp)
    )

    # --- 1) image_slicer Conv2d(C, D, P, stride=P): kernel writes [B, D, Hp*Wp] directly,
    #        i.e. the NCHW conv output flattened -- the exact layout stage 2 reads.
    td = _pick_tile(D, 256)
    conv_t = conv_transposed_pallas(
        patches_t,
        params["conv_w"].reshape(D, K1),           # [D, C*P*P] (matches (c, ph, pw) flatten)
        params["conv_b"].reshape(D, 1),
        td=td,
    )
    x2 = conv_t.reshape(B * D * Hp, Wp)            # free reshape, no transpose

    # --- 2) patch_emb Linear(P*P*C, D) over the last (width-in-patches) axis + LayerNorm1
    #        (fused, row-tiled, pipelined).  Dropout = identity (eval).
    patch_emb = linear_layernorm_pallas(
        x2,
        params["pe_w"].T,                          # [Wp, D]
        params["pe_b"].reshape(1, D),
        params["ln1_g"].reshape(1, D),
        params["ln1_b"].reshape(1, D),
        eps,
    ).reshape(B, D, Hp, D)

    # --- 3) abs_pos_emb: every batch row of arange(max_seq) is identical -> compute once,
    #        generate the arange in-kernel, broadcast to (B, D) in the wrapper.
    pos_row = pos_emb_layernorm_pallas(
        params["pos_w"].T,                         # [max_seq, D]
        params["pos_b"].reshape(1, D),
        params["ln2_g"].reshape(1, D),
        params["ln2_b"].reshape(1, D),
        eps,
    )                                              # [1, D]
    abs_pos_emb = jnp.broadcast_to(pos_row, (B, D))

    return patch_emb, abs_pos_emb


# ---------------------------------------------------------------------------
# Pure-JAX reference (sanity check against the Pallas path)
# ---------------------------------------------------------------------------
def _reference_forward(params, x, cfg):
    hi = jax.lax.Precision.HIGHEST
    B, C, H, W = x.shape
    P, D = cfg["patch_size"], cfg["dim_model"]
    eps = cfg["layer_norm_eps"]
    Hp, Wp = H // P, W // P
    K1 = C * P * P
    max_seq = cfg["num_patches"] + 1

    patches = (x.reshape(B, C, Hp, P, Wp, P)
               .transpose(0, 2, 4, 1, 3, 5)
               .reshape(B, Hp, Wp, K1))
    conv = jnp.einsum("bhwk,dk->bdhw", patches, params["conv_w"].reshape(D, K1),
                      precision=hi) + params["conv_b"][None, :, None, None]
    y = jnp.einsum("bdhw,ew->bdhe", conv, params["pe_w"], precision=hi) + params["pe_b"]
    mean = y.mean(-1, keepdims=True)
    var = ((y - mean) ** 2).mean(-1, keepdims=True)
    pe = (y - mean) / jnp.sqrt(var + eps) * params["ln1_g"] + params["ln1_b"]

    pos = jnp.arange(max_seq, dtype=jnp.float32)
    z = jnp.einsum("s,ds->d", pos, params["pos_w"], precision=hi) + params["pos_b"]
    mz = z.mean()
    vz = ((z - mz) ** 2).mean()
    ape = (z - mz) / jnp.sqrt(vz + eps) * params["ln2_g"] + params["ln2_b"]
    return pe, jnp.broadcast_to(ape[None, :], (B, D))


# ---------------------------------------------------------------------------
if __name__ == "__main__":
    # Config consistent with the reference forward: image 64x64, patch 4, 1 channel,
    # dim_model 128 (lane-dense).  num_patches = (64/4)^2 = 256, max_seq = 257, and
    # W/P = 16 == patch_size**2 * channels as the reference requires.
    cfg = dict(
        channels=1,
        patch_size=4,
        image_size=64,
        dim_model=128,
        num_patches=(64 // 4) ** 2,
        layer_norm_eps=1e-5,
        hidden_dropout_prob=0.0,
    )

    key = jax.random.PRNGKey(0)
    k_params, k_x = jax.random.split(key)
    params = init_params(k_params, cfg)

    B = 2
    x = jax.random.normal(
        k_x, (B, cfg["channels"], cfg["image_size"], cfg["image_size"]), dtype=jnp.float32)

    fwd = jax.jit(functools.partial(embedding_forward, cfg=cfg))
    patch_emb, abs_pos_emb = fwd(params, x)
    jax.block_until_ready((patch_emb, abs_pos_emb))

    Hp = cfg["image_size"] // cfg["patch_size"]
    D = cfg["dim_model"]
    assert patch_emb.shape == (B, D, Hp, D), patch_emb.shape
    assert abs_pos_emb.shape == (B, D), abs_pos_emb.shape
    assert bool(jnp.all(jnp.isfinite(patch_emb))) and bool(jnp.all(jnp.isfinite(abs_pos_emb)))

    # Sanity check vs. a pure-JAX reference.  In-kernel MXU matmuls run at default precision
    # (bf16 operand passes, f32 accumulation), so the tolerance is generous; a layout or
    # indexing bug would produce O(1) errors.
    ref_pe, ref_ape = _reference_forward(params, x, cfg)
    err_pe = float(jnp.max(jnp.abs(patch_emb - ref_pe)))
    err_ape = float(jnp.max(jnp.abs(abs_pos_emb - ref_ape)))
    assert err_pe < 5e-2 and err_ape < 5e-2, (err_pe, err_ape)

    print("KERNEL_OK")
</pallas_src>

<mosaic_0001>
module attributes {stable_mosaic.version = 11 : i64} {
  func.func @_conv_kernel(%arg0: i32, %arg1: i32, %arg2: memref<1x16x256xf32, #tpu.memory_space<vmem>>, %arg3: memref<128x16xf32, #tpu.memory_space<vmem>>, %arg4: memref<128x1xf32, #tpu.memory_space<vmem>>, %arg5: memref<1x128x256xf32, #tpu.memory_space<vmem>>) attributes {dimension_semantics = [#tpu.dimension_semantics<parallel>, #tpu.dimension_semantics<parallel>], iteration_bounds = array<i64: 2, 1>, scalar_prefetch = 0 : i64, scratch_operands = 0 : i64, tpu.core_type = #tpu.core_type<tc>, window_params = [{transform_indices = @transform_0, window_bounds = array<i64: 1, 16, 256>}, {transform_indices = @transform_1, window_bounds = array<i64: 128, 16>}, {transform_indices = @transform_2, window_bounds = array<i64: 128, 1>}, {transform_indices = @transform_3, window_bounds = array<i64: 1, 128, 256>}]} {
    %c0 = arith.constant 0 : index
    %c0_0 = arith.constant 0 : index
    %0 = vector.load %arg3[%c0, %c0_0] : memref<128x16xf32, #tpu.memory_space<vmem>>, vector<128x16xf32>
    %c0_1 = arith.constant 0 : index
    %c0_2 = arith.constant 0 : index
    %c0_3 = arith.constant 0 : index
    %1 = vector.load %arg2[%c0_1, %c0_2, %c0_3] : memref<1x16x256xf32, #tpu.memory_space<vmem>>, vector<1x16x256xf32>
    %2 = vector.shape_cast %1 : vector<1x16x256xf32> to vector<16x256xf32>
    %cst = arith.constant dense<0.000000e+00> : vector<128x256xf32>
    %3 = tpu.matmul %0, %2, %cst {dimension_numbers = #tpu.dot_dimension_numbers<[1], [0], [0], [1], [0, 0, 1, 1], [], []>} : vector<128x16xf32>, vector<16x256xf32>, vector<128x256xf32> -> vector<128x256xf32>
    %c0_4 = arith.constant 0 : index
    %c0_5 = arith.constant 0 : index
    %4 = vector.load %arg4[%c0_4, %c0_5] : memref<128x1xf32, #tpu.memory_space<vmem>>, vector<128x1xf32>
    %5 = vector.broadcast %4 : vector<128x1xf32> to vector<128x256xf32>
    %6 = arith.addf %3, %5 : vector<128x256xf32>
    %c0_6 = arith.constant 0 : index
    %c0_7 = arith.constant 0 : index
    %c0_8 = arith.constant 0 : index
    %7 = vector.load %arg5[%c0_6, %c0_7, %c0_8] : memref<1x128x256xf32, #tpu.memory_space<vmem>>, vector<1x128x256xf32>
    %8 = vector.shape_cast %7 : vector<1x128x256xf32> to vector<128x256xf32>
    %9 = vector.shape_cast %6 : vector<128x256xf32> to vector<1x128x256xf32>
    tpu.vector_store %arg5[%c0_6, %c0_7, %c0_8], %9 {strides = array<i32>} : memref<1x128x256xf32, #tpu.memory_space<vmem>>, vector<1x128x256xf32>,
    return
  }
  func.func @transform_0(%arg0: i32, %arg1: i32) -> (i32, i32, i32) {
    %c0_i32 = arith.constant 0 : i32
    %c0_i32_0 = arith.constant 0 : i32
    %c0_i32_1 = arith.constant 0 : i32
    return %arg0, %c0_i32, %c0_i32_0 : i32, i32, i32
  }
  func.func @transform_1(%arg0: i32, %arg1: i32) -> (i32, i32) {
    %c0_i32 = arith.constant 0 : i32
    %c0_i32_0 = arith.constant 0 : i32
    return %arg1, %c0_i32 : i32, i32
  }
  func.func @transform_2(%arg0: i32, %arg1: i32) -> (i32, i32) {
    %c0_i32 = arith.constant 0 : i32
    %c0_i32_0 = arith.constant 0 : i32
    return %arg1, %c0_i32 : i32, i32
  }
  func.func @transform_3(%arg0: i32, %arg1: i32) -> (i32, i32, i32) {
    %c0_i32 = arith.constant 0 : i32
    %c0_i32_0 = arith.constant 0 : i32
    return %arg0, %arg1, %c0_i32 : i32, i32, i32
  }
}

module attributes {stable_mosaic.version = 11 : i64} {
  func.func @_linear_ln_kernel(%arg0: i32, %arg1: memref<1024x16xf32, #tpu.memory_space<vmem>>, %arg2: memref<16x128xf32, #tpu.memory_space<vmem>>, %arg3: memref<1x128xf32, #tpu.memory_space<vmem>>, %arg4: memref<1x128xf32, #tpu.memory_space<vmem>>, %arg5: memref<1x128xf32, #tpu.memory_space<vmem>>, %arg6: memref<1024x128xf32, #tpu.memory_space<vmem>>) attributes {dimension_semantics = [#tpu.dimension_semantics<parallel>], iteration_bounds = array<i64: 4>, scalar_prefetch = 0 : i64, scratch_operands = 0 : i64, tpu.core_type = #tpu.core_type<tc>, window_params = [{transform_indices = @transform_0, window_bounds = array<i64: 1024, 16>}, {pipeline_mode = #tpu.pipeline_mode<synchronous>, transform_indices = @transform_1, window_bounds = array<i64: 16, 128>}, {pipeline_mode = #tpu.pipeline_mode<synchronous>, transform_indices = @transform_2, window_bounds = array<i64: 1, 128>}, {pipeline_mode = #tpu.pipeline_mode<synchronous>, transform_indices = @transform_3, window_bounds = array<i64: 1, 128>}, {pipeline_mode = #tpu.pipeline_mode<synchronous>, transform_indices = @transform_4, window_bounds = array<i64: 1, 128>}, {transform_indices = @transform_5, window_bounds = array<i64: 1024, 128>}]} {
    %c0 = arith.constant 0 : index
    %c0_0 = arith.constant 0 : index
    %0 = vector.load %arg1[%c0, %c0_0] : memref<1024x16xf32, #tpu.memory_space<vmem>>, vector<1024x16xf32>
    %c0_1 = arith.constant 0 : index
    %c0_2 = arith.constant 0 : index
    %1 = vector.load %arg2[%c0_1, %c0_2] : memref<16x128xf32, #tpu.memory_space<vmem>>, vector<16x128xf32>
    %cst = arith.constant dense<0.000000e+00> : vector<1024x128xf32>
    %2 = tpu.matmul %0, %1, %cst {dimension_numbers = #tpu.dot_dimension_numbers<[1], [0], [0], [1], [0, 0, 1, 1], [], []>} : vector<1024x16xf32>, vector<16x128xf32>, vector<1024x128xf32> -> vector<1024x128xf32>
    %c0_3 = arith.constant 0 : index
    %c0_4 = arith.constant 0 : index
    %3 = vector.load %arg3[%c0_3, %c0_4] : memref<1x128xf32, #tpu.memory_space<vmem>>, vector<1x128xf32>
    %4 = vector.broadcast %3 : vector<1x128xf32> to vector<1024x128xf32>
    %5 = arith.addf %2, %4 : vector<1024x128xf32>
    %cst_5 = arith.constant dense<0.000000e+00> : vector<1024xf32>
    %6 = vector.multi_reduction <add>, %5, %cst_5 [1] : vector<1024x128xf32> to vector<1024xf32>
    %7 = vector.shape_cast %6 : vector<1024xf32> to vector<1024x1xf32>
    %cst_6 = arith.constant 7.812500e-03 : f32
    %8 = vector.broadcast %cst_6 : f32 to vector<1024x1xf32>
    %9 = arith.mulf %7, %8 : vector<1024x1xf32>
    %10 = arith.mulf %5, %5 : vector<1024x128xf32>
    %cst_7 = arith.constant dense<0.000000e+00> : vector<1024xf32>
    %11 = vector.multi_reduction <add>, %10, %cst_7 [1] : vector<1024x128xf32> to vector<1024xf32>
    %12 = vector.shape_cast %11 : vector<1024xf32> to vector<1024x1xf32>
    %cst_8 = arith.constant 7.812500e-03 : f32
    %13 = vector.broadcast %cst_8 : f32 to vector<1024x1xf32>
    %14 = arith.mulf %12, %13 : vector<1024x1xf32>
    %15 = arith.mulf %9, %9 : vector<1024x1xf32>
    %16 = arith.subf %14, %15 : vector<1024x1xf32>
    %cst_9 = arith.constant 0.000000e+00 : f32
    %17 = vector.broadcast %cst_9 : f32 to vector<1024x1xf32>
    %18 = arith.maximumf %16, %17 : vector<1024x1xf32>
    %cst_10 = arith.constant 9.99999974E-6 : f32
    %19 = vector.broadcast %cst_10 : f32 to vector<1024x1xf32>
    %20 = arith.addf %18, %19 : vector<1024x1xf32>
    %21 = math.rsqrt %20 : vector<1024x1xf32>
    %22 = vector.broadcast %9 : vector<1024x1xf32> to vector<1024x128xf32>
    %23 = arith.subf %5, %22 : vector<1024x128xf32>
    %24 = vector.broadcast %21 : vector<1024x1xf32> to vector<1024x128xf32>
    %25 = arith.mulf %23, %24 : vector<1024x128xf32>
    %c0_11 = arith.constant 0 : index
    %c0_12 = arith.constant 0 : index
    %26 = vector.load %arg4[%c0_11, %c0_12] : memref<1x128xf32, #tpu.memory_space<vmem>>, vector<1x128xf32>
    %27 = vector.broadcast %26 : vector<1x128xf32> to vector<1024x128xf32>
    %28 = arith.mulf %25, %27 : vector<1024x128xf32>
    %c0_13 = arith.constant 0 : index
    %c0_14 = arith.constant 0 : index
    %29 = vector.load %arg5[%c0_13, %c0_14] : memref<1x128xf32, #tpu.memory_space<vmem>>, vector<1x128xf32>
    %30 = vector.broadcast %29 : vector<1x128xf32> to vector<1024x128xf32>
    %31 = arith.addf %28, %30 : vector<1024x128xf32>
    %c0_15 = arith.constant 0 : index
    %c0_16 = arith.constant 0 : index
    %32 = vector.load %arg6[%c0_15, %c0_16] : memref<1024x128xf32, #tpu.memory_space<vmem>>, vector<1024x128xf32>
    tpu.vector_store %arg6[%c0_15, %c0_16], %31 {strides = array<i32>} : memref<1024x128xf32, #tpu.memory_space<vmem>>, vector<1024x128xf32>,
    return
  }
  func.func @transform_0(%arg0: i32) -> (i32, i32) {
    %c0_i32 = arith.constant 0 : i32
    %c0_i32_0 = arith.constant 0 : i32
    return %arg0, %c0_i32 : i32, i32
  }
  func.func @transform_1(%arg0: i32) -> (i32, i32) {
    %c0_i32 = arith.constant 0 : i32
    %c0_i32_0 = arith.constant 0 : i32
    %c0_i32_1 = arith.constant 0 : i32
    return %c0_i32, %c0_i32_0 : i32, i32
  }
  func.func @transform_2(%arg0: i32) -> (i32, i32) {
    %c0_i32 = arith.constant 0 : i32
    %c0_i32_0 = arith.constant 0 : i32
    %c0_i32_1 = arith.constant 0 : i32
    return %c0_i32, %c0_i32_0 : i32, i32
  }
  func.func @transform_3(%arg0: i32) -> (i32, i32) {
    %c0_i32 = arith.constant 0 : i32
    %c0_i32_0 = arith.constant 0 : i32
    %c0_i32_1 = arith.constant 0 : i32
    return %c0_i32, %c0_i32_0 : i32, i32
  }
  func.func @transform_4(%arg0: i32) -> (i32, i32) {
    %c0_i32 = arith.constant 0 : i32
    %c0_i32_0 = arith.constant 0 : i32
    %c0_i32_1 = arith.constant 0 : i32
    return %c0_i32, %c0_i32_0 : i32, i32
  }
  func.func @transform_5(%arg0: i32) -> (i32, i32) {
    %c0_i32 = arith.constant 0 : i32
    %c0_i32_0 = arith.constant 0 : i32
    return %arg0, %c0_i32 : i32, i32
  }
}

module attributes {stable_mosaic.version = 11 : i64} {
  func.func @_pos_ln_kernel(%arg0: memref<257x128xf32, #tpu.memory_space<vmem>>, %arg1: memref<1x128xf32, #tpu.memory_space<vmem>>, %arg2: memref<1x128xf32, #tpu.memory_space<vmem>>, %arg3: memref<1x128xf32, #tpu.memory_space<vmem>>, %arg4: memref<1x128xf32, #tpu.memory_space<vmem>>) attributes {dimension_semantics = [], scalar_prefetch = 0 : i64, scratch_operands = 0 : i64, tpu.core_type = #tpu.core_type<tc>} {
    %0 = tpu.iota {dimensions = array<i32: 0>} : vector<257x1xi32>
    %1 = arith.sitofp %0 : vector<257x1xi32> to vector<257x1xf32>
    %c0 = arith.constant 0 : index
    %c0_0 = arith.constant 0 : index
    %2 = vector.load %arg0[%c0, %c0_0] : memref<257x128xf32, #tpu.memory_space<vmem>>, vector<257x128xf32>
    %3 = vector.broadcast %1 : vector<257x1xf32> to vector<257x128xf32>
    %4 = arith.mulf %2, %3 : vector<257x128xf32>
    %cst = arith.constant dense<0.000000e+00> : vector<128xf32>
    %5 = vector.multi_reduction <add>, %4, %cst [0] : vector<257x128xf32> to vector<128xf32>
    %6 = vector.shape_cast %5 : vector<128xf32> to vector<1x128xf32>
    %c0_1 = arith.constant 0 : index
    %c0_2 = arith.constant 0 : index
    %7 = vector.load %arg1[%c0_1, %c0_2] : memref<1x128xf32, #tpu.memory_space<vmem>>, vector<1x128xf32>
    %8 = arith.addf %6, %7 : vector<1x128xf32>
    %cst_3 = arith.constant dense<0.000000e+00> : vector<1xf32>
    %9 = vector.multi_reduction <add>, %8, %cst_3 [1] : vector<1x128xf32> to vector<1xf32>
    %10 = vector.shape_cast %9 : vector<1xf32> to vector<1x1xf32>
    %cst_4 = arith.constant 7.812500e-03 : f32
    %11 = vector.broadcast %cst_4 : f32 to vector<1x1xf32>
    %12 = arith.mulf %10, %11 : vector<1x1xf32>
    %13 = arith.mulf %8, %8 : vector<1x128xf32>
    %cst_5 = arith.constant dense<0.000000e+00> : vector<1xf32>
    %14 = vector.multi_reduction <add>, %13, %cst_5 [1] : vector<1x128xf32> to vector<1xf32>
    %15 = vector.shape_cast %14 : vector<1xf32> to vector<1x1xf32>
    %cst_6 = arith.constant 7.812500e-03 : f32
    %16 = vector.broadcast %cst_6 : f32 to vector<1x1xf32>
    %17 = arith.mulf %15, %16 : vector<1x1xf32>
    %18 = arith.mulf %12, %12 : vector<1x1xf32>
    %19 = arith.subf %17, %18 : vector<1x1xf32>
    %cst_7 = arith.constant 0.000000e+00 : f32
    %20 = vector.broadcast %cst_7 : f32 to vector<1x1xf32>
    %21 = arith.maximumf %19, %20 : vector<1x1xf32>
    %cst_8 = arith.constant 9.99999974E-6 : f32
    %22 = vector.broadcast %cst_8 : f32 to vector<1x1xf32>
    %23 = arith.addf %21, %22 : vector<1x1xf32>
    %24 = math.rsqrt %23 : vector<1x1xf32>
    %25 = vector.broadcast %12 : vector<1x1xf32> to vector<1x128xf32>
    %26 = arith.subf %8, %25 : vector<1x128xf32>
    %27 = vector.broadcast %24 : vector<1x1xf32> to vector<1x128xf32>
    %28 = arith.mulf %26, %27 : vector<1x128xf32>
    %c0_9 = arith.constant 0 : index
    %c0_10 = arith.constant 0 : index
    %29 = vector.load %arg2[%c0_9, %c0_10] : memref<1x128xf32, #tpu.memory_space<vmem>>, vector<1x128xf32>
    %30 = arith.mulf %28, %29 : vector<1x128xf32>
    %c0_11 = arith.constant 0 : index
    %c0_12 = arith.constant 0 : index
    %31 = vector.load %arg3[%c0_11, %c0_12] : memref<1x128xf32, #tpu.memory_space<vmem>>, vector<1x128xf32>
    %32 = arith.addf %30, %31 : vector<1x128xf32>
    %c0_13 = arith.constant 0 : index
    %c0_14 = arith.constant 0 : index
    %33 = vector.load %arg4[%c0_13, %c0_14] : memref<1x128xf32, #tpu.memory_space<vmem>>, vector<1x128xf32>
    tpu.vector_store %arg4[%c0_13, %c0_14], %32 {strides = array<i32>} : memref<1x128xf32, #tpu.memory_space<vmem>>, vector<1x128xf32>,
    return
  }
}

</mosaic_0001>

<bundles_post_ra>
// kernel: embedding_forward.3
= control target key start
LH: loop header
LB: loop body
LE: loop exit
PB: predicated region body
PF: predicated region fallthrough
CT: control target
= control target key end

     0   :  { %s824_s12 = smov 0   ;;  %s826_s13 = smov 0   ;;  %s1039_s0 = inlined_call_operand.vmem [shape: f32[2,16,256], index: 0, kind: input, shape index: {}]   ;;  %s1040_s1 = inlined_call_operand.vmem [shape: f32[128,16], index: 1, kind: input, shape index: {}]   ;;  %s1041_s2 = inlined_call_operand.vmem [shape: f32[128,1], index: 2, kind: input, shape index: {}]   ;;  %s1042_s3 = inlined_call_operand.vmem [shape: f32[2,128,256], index: 3, kind: output, shape index: {}]  }
   0x1   :  { %s828_s14 = smov 0  }
   0x2 LB: > { %s25_s15 = sadd.s32 1, %s796_s13  ;;  %p721_p0 = scmp.ge.s32.totalorder %s800_s14, 1  ;;  %s800_s14 = sphi %s828_s14, %s13_s14   ;;  %s796_s13 = sphi %s826_s13, %s1044_s13   ;;  %s792_s12 = sphi %s824_s12, %s1043_s12  }
   0x3   : > { %p27_p1 = scmp.ge.s32.totalorder %s25_s15, 2  ;;  %p173_p2 = scmp.lt.s32.totalorder %s800_s14, 3 }
   0x5   : > { %s1046_s15 = smov (%p27_p1, %s25_s15), 0  ;;  %p174_p3 = pnand %p721_p0, %p173_p2 }
   0x6   : > { %p212_p4 = scmp.lt.s32.totalorder (!%p174_p3), %s792_s12, 1 }
   0x7   : > { %177 = sbr.rel (%p174_p3) target bundleno = 246 (0xf6), region = 32 }
   0xc   : > { %v802_v0 = vmov 0.0   ;;  %s1048_s12 = smov (!%p212_p4, %s792_s12), 1  ;;  %v803_v1 = vmov 0   ;;  %v262_v2 = vld [vmem:[%s1041_s2 + $0x10] sm:$0xff]  ;;  %v260_v3 = vld [vmem:[%s1041_s2] sm:$0xff]  ;;  %vm356_vm0 = vcmask 130048  }
   0xd   : > { %469 = vmatprep.mubr.f32.mxu0 %v802_v0  ;;  %517 = vmatprep.mubr.f32.mxu1 %v802_v0  ;;  %s744_s16 = sshll.u32 %s1048_s12, 5  ;;  %v240_v8 = vld [vmem:[%s1040_s1] sm:$0xff]  ;;  %v263_v10 = vld [vmem:[%s1041_s2 + $0x18] sm:$0xff]  ;;  %v261_v11 = vld [vmem:[%s1041_s2 + $0x8] sm:$0xff]  ;;  %s745_s11 = sshll.u32 %s1048_s12, 8 }
   0xe   : > { %777 = vset.pattern.permute.xlu1 %v803_v1  ;;  %776 = vset.pattern.permute.xlu0 %v803_v1  ;;  %s216_s19 = scalar_lea.vmem %s1039_s0, %s744_s16  ;;  %v248_v9 = vld [vmem:[%s1040_s1 + $0x40] sm:$0xff]  ;;  %v241_v12 = vld [vmem:[%s1040_s1 + $0x8] sm:$0xff]  ;;  %v242_v16 = vld [vmem:[%s1040_s1 + $0x10] sm:$0xff]  ;;  %s988_s18 = scalar_lea.vmem %s1042_s3, %s745_s11 }
   0xf   : > { %v259_v4 = vld [vmem:[%s216_s19 + $0x18] sm:$0xff]  ;;  %v258_v5 = vld [vmem:[%s216_s19 + $0x10] sm:$0xff]  ;;  %v257_v6 = vld [vmem:[%s216_s19 + $0x8] sm:$0xff]  ;;  %288 = vperm.xlu1 %777, %v262_v2   ;;  %278 = vperm.xlu0 %776, %v260_v3  }
  0x10   : > { %433 = vmatprep.subr.mxu0 %v259_v4  ;;  %746 = vmatprep.subr.mxu1 %v259_v4  ;;  %v256_v7 = vld [vmem:[%s216_s19] sm:$0xff]  ;;  %v249_v13 = vld [vmem:[%s1040_s1 + $0x48] sm:$0xff]  ;;  %v250_v17 = vld [vmem:[%s1040_s1 + $0x50] sm:$0xff] }
  0x11   : > { %434 = vmatpush1.msra.mxu0 %v258_v5  ;;  %748 = vmatpush1.msra.mxu1 %v258_v5  ;;  %v265_v14 = vld [vmem:[%s1041_s2 + $0x28] sm:$0xff]  ;;  %v264_v15 = vld [vmem:[%s1041_s2 + $0x20] sm:$0xff]  ;;  %v267_v18 = vld [vmem:[%s1041_s2 + $0x38] sm:$0xff] }
  0x12   : > { %435 = vmatprep.subr.mxu0 %v257_v6  ;;  %747 = vmatprep.subr.mxu1 %v257_v6  ;;  %v266_v19 = vld [vmem:[%s1041_s2 + $0x30] sm:$0xff]  ;;  %v243_v20 = vld [vmem:[%s1040_s1 + $0x18] sm:$0xff]  ;;  %v269_v22 = vld [vmem:[%s1041_s2 + $0x48] sm:$0xff] }
  0x13   : > { %436 = vmatpush1.msra.mxu0 %v256_v7  ;;  %749 = vmatpush1.msra.mxu1 %v256_v7  ;;  %v251_v21 = vld [vmem:[%s1040_s1 + $0x58] sm:$0xff]  ;;  %v268_v23 = vld [vmem:[%s1041_s2 + $0x40] sm:$0xff]  ;;  %v270_v27 = vld [vmem:[%s1041_s2 + $0x50] sm:$0xff] }
  0x14   : > { %726 = vmatmul.mubr.msk.f32.vlgmr.msra.gmra.mxu0 %vm356_vm0, %v240_v8  ;;  %734 = vmatmul.mubr.msk.f32.vlgmr.msra.gmra.mxu1 %vm356_vm0, %v248_v9  ;;  %v244_v24 = vld [vmem:[%s1040_s1 + $0x20] sm:$0xff]  ;;  %v271_v26 = vld [vmem:[%s1041_s2 + $0x58] sm:$0xff]  ;;  %v245_v28 = vld [vmem:[%s1040_s1 + $0x28] sm:$0xff] }
  0x15   : > { %475 = vmatprep.mubr.f32.mxu0 %v802_v0  ;;  %523 = vmatprep.mubr.f32.mxu1 %v802_v0  ;;  %v252_v25 = vld [vmem:[%s1040_s1 + $0x60] sm:$0xff]  ;;  %v253_v29 = vld [vmem:[%s1040_s1 + $0x68] sm:$0xff]  ;;  %v246_v32 = vld [vmem:[%s1040_s1 + $0x30] sm:$0xff] }
  0x16   : > { %293 = vperm.xlu1 %777, %v263_v10   ;;  %283 = vperm.xlu0 %776, %v261_v11   ;;  %v273_v30 = vld [vmem:[%s1041_s2 + $0x68] sm:$0xff]  ;;  %v272_v31 = vld [vmem:[%s1041_s2 + $0x60] sm:$0xff]  ;;  %v254_v33 = vld [vmem:[%s1040_s1 + $0x70] sm:$0xff] }
  0x17   : > { %v275_v34 = vld [vmem:[%s1041_s2 + $0x78] sm:$0xff]  ;;  %v274_v35 = vld [vmem:[%s1041_s2 + $0x70] sm:$0xff] }
  0x18   : > { %727 = vmatmul.mubr.msk.f32.gmra.mxu0 %vm356_vm0, %v241_v12  ;;  %735 = vmatmul.mubr.msk.f32.gmra.mxu1 %vm356_vm0, %v249_v13  ;;  %v247_v36 = vld [vmem:[%s1040_s1 + $0x38] sm:$0xff] }
  0x19   : > { %481 = vmatprep.mubr.f32.mxu0 %v802_v0  ;;  %529 = vmatprep.mubr.f32.mxu1 %v802_v0  ;;  %v255_v37 = vld [vmem:[%s1040_s1 + $0x78] sm:$0xff] }
  0x1a   : > { %303 = vperm.xlu1 %777, %v265_v14   ;;  %298 = vperm.xlu0 %776, %v264_v15  }
  0x1c   : > { %728 = vmatmul.mubr.msk.f32.gmra.mxu0 %vm356_vm0, %v242_v16  ;;  %736 = vmatmul.mubr.msk.f32.gmra.mxu1 %vm356_vm0, %v250_v17 }
  0x1d   : > { %487 = vmatprep.mubr.f32.mxu0 %v802_v0  ;;  %535 = vmatprep.mubr.f32.mxu1 %v802_v0 }
  0x1e   : > { %313 = vperm.xlu1 %777, %v267_v18   ;;  %308 = vperm.xlu0 %776, %v266_v19  }
  0x20   : > { %729 = vmatmul.mubr.msk.f32.gmra.mxu0 %vm356_vm0, %v243_v20  ;;  %737 = vmatmul.mubr.msk.f32.gmra.mxu1 %vm356_vm0, %v251_v21 }
  0x21   : > { %493 = vmatprep.mubr.f32.mxu0 %v802_v0  ;;  %541 = vmatprep.mubr.f32.mxu1 %v802_v0 }
  0x22   : > { %323 = vperm.xlu1 %777, %v269_v22   ;;  %318 = vperm.xlu0 %776, %v268_v23  }
  0x24   : > { %730 = vmatmul.mubr.msk.f32.gmra.mxu0 %vm356_vm0, %v244_v24  ;;  %738 = vmatmul.mubr.msk.f32.gmra.mxu1 %vm356_vm0, %v252_v25 }
  0x25   : > { %499 = vmatprep.mubr.f32.mxu0 %v802_v0  ;;  %547 = vmatprep.mubr.f32.mxu1 %v802_v0 }
  0x26   : > { %333 = vperm.xlu1 %777, %v271_v26   ;;  %328 = vperm.xlu0 %776, %v270_v27  }
  0x28   : > { %731 = vmatmul.mubr.msk.f32.gmra.mxu0 %vm356_vm0, %v245_v28  ;;  %739 = vmatmul.mubr.msk.f32.gmra.mxu1 %vm356_vm0, %v253_v29 }
  0x29   : > { %505 = vmatprep.mubr.f32.mxu0 %v802_v0  ;;  %553 = vmatprep.mubr.f32.mxu1 %v802_v0 }
  0x2a   : > { %343 = vperm.xlu1 %777, %v273_v30   ;;  %338 = vperm.xlu0 %776, %v272_v31  }
  0x2c   : > { %732 = vmatmul.mubr.msk.f32.gmra.mxu0 %vm356_vm0, %v246_v32  ;;  %740 = vmatmul.mubr.msk.f32.gmra.mxu1 %vm356_vm0, %v254_v33 }
  0x2d   : > { %511 = vmatprep.mubr.f32.mxu0 %v802_v0  ;;  %559 = vmatprep.mubr.f32.mxu1 %v802_v0 }
  0x2e   : > { %353 = vperm.xlu1 %777, %v275_v34   ;;  %348 = vperm.xlu0 %776, %v274_v35  }
  0x30   : > { %733 = vmatmul.mubr.msk.f32.gmra.mxu0 %vm356_vm0, %v247_v36  ;;  %741 = vmatmul.mubr.msk.f32.gmra.mxu1 %vm356_vm0, %v255_v37 }
  0x8a   : > { %v279_v38 = vpop.permute.xlu0 %278  ;;  %v289_v39 = vpop.permute.xlu1 %288 }
  0x91   : > { %v284_v40 = vpop.permute.xlu0 %283  ;;  %v294_v41 = vpop.permute.xlu1 %293 }
  0x95   : > { %v976_v42 = vpop.permute.xlu0 %298  ;;  %v978_v43 = vpop.permute.xlu1 %303 }
  0x99   : > { %v980_v44 = vpop.permute.xlu0 %308  ;;  %v983_v45 = vpop.permute.xlu1 %313 }
  0x9d   : > { %v319_v46 = vpop.permute.xlu0 %318  ;;  %v324_v53 = vpop.permute.xlu1 %323 }
  0xa1   : > { %v329_v62 = vpop.permute.xlu0 %328  ;;  %v334_v7 = vpop.permute.xlu1 %333 }
  0xa5   : > { %v339_v16 = vpop.permute.xlu0 %338  ;;  %v344_v25 = vpop.permute.xlu1 %343 }
  0xa9   : > { %v349_v34 = vpop.permute.xlu0 %348 }
  0xd4   : > { %v471_v47 = vpop.f32.mrf.mxu0  ;;  %v519_v48 = vpop.f32.mrf.mxu1 }
  0xd5   : > { %v472_v49 = vadd.f32 %v471_v47, %v279_v38  ;;  %v520_v50 = vadd.f32 %v519_v48, %v319_v46 }
  0xd6   : > { %v473_v51 = vpop.f32.mrf.mxu0  ;;  %v521_v52 = vpop.f32.mrf.mxu1 }
  0xd7   : > { %566 = vst [vmem:[%s988_s18] sm:$0xff] %v472_v49  ;;  %582 = vst [vmem:[%s988_s18 + $0x80] sm:$0xff] %v520_v50  ;;  %v474_v54 = vadd.f32 %v473_v51, %v279_v38  ;;  %v522_v55 = vadd.f32 %v521_v52, %v319_v46  ;;  %v354_v46 = vpop.permute.xlu1 %353 }
  0xd8   : > { %v477_v56 = vpop.f32.mrf.mxu0  ;;  %v525_v57 = vpop.f32.mrf.mxu1 }
  0xd9   : > { %567 = vst [vmem:[%s988_s18 + $0x8] sm:$0xff] %v474_v54  ;;  %583 = vst [vmem:[%s988_s18 + $0x88] sm:$0xff] %v522_v55  ;;  %v478_v58 = vadd.f32 %v477_v56, %v284_v40  ;;  %v526_v59 = vadd.f32 %v525_v57, %v324_v53 }
  0xda   : > { %v479_v60 = vpop.f32.mrf.mxu0  ;;  %v527_v61 = vpop.f32.mrf.mxu1 }
  0xdb   : > { %568 = vst [vmem:[%s988_s18 + $0x10] sm:$0xff] %v478_v58  ;;  %584 = vst [vmem:[%s988_s18 + $0x90] sm:$0xff] %v526_v59  ;;  %v480_v63 = vadd.f32 %v479_v60, %v284_v40  ;;  %v528_v0 = vadd.f32 %v527_v61, %v324_v53 }
  0xdc   : > { %v483_v1 = vpop.f32.mrf.mxu0  ;;  %v531_v2 = vpop.f32.mrf.mxu1 }
  0xdd   : > { %569 = vst [vmem:[%s988_s18 + $0x18] sm:$0xff] %v480_v63  ;;  %585 = vst [vmem:[%s988_s18 + $0x98] sm:$0xff] %v528_v0  ;;  %v484_v3 = vadd.f32 %v483_v1, %v289_v39  ;;  %v532_v4 = vadd.f32 %v531_v2, %v329_v62 }
  0xde   : > { %v485_v5 = vpop.f32.mrf.mxu0  ;;  %v533_v6 = vpop.f32.mrf.mxu1 }
  0xdf   : > { %570 = vst [vmem:[%s988_s18 + $0x20] sm:$0xff] %v484_v3  ;;  %586 = vst [vmem:[%s988_s18 + $0xa0] sm:$0xff] %v532_v4  ;;  %v486_v8 = vadd.f32 %v485_v5, %v289_v39  ;;  %v534_v9 = vadd.f32 %v533_v6, %v329_v62 }
  0xe0   : > { %v489_v10 = vpop.f32.mrf.mxu0  ;;  %v537_v11 = vpop.f32.mrf.mxu1 }
  0xe1   : > { %571 = vst [vmem:[%s988_s18 + $0x28] sm:$0xff] %v486_v8  ;;  %587 = vst [vmem:[%s988_s18 + $0xa8] sm:$0xff] %v534_v9  ;;  %v490_v12 = vadd.f32 %v489_v10, %v294_v41  ;;  %v538_v13 = vadd.f32 %v537_v11, %v334_v7 }
  0xe2   : > { %v491_v14 = vpop.f32.mrf.mxu0  ;;  %v539_v15 = vpop.f32.mrf.mxu1 }
  0xe3   : > { %572 = vst [vmem:[%s988_s18 + $0x30] sm:$0xff] %v490_v12  ;;  %588 = vst [vmem:[%s988_s18 + $0xb0] sm:$0xff] %v538_v13  ;;  %v492_v17 = vadd.f32 %v491_v14, %v294_v41  ;;  %v540_v18 = vadd.f32 %v539_v15, %v334_v7 }
  0xe4   : > { %v495_v19 = vpop.f32.mrf.mxu0  ;;  %v543_v20 = vpop.f32.mrf.mxu1 }
  0xe5   : > { %573 = vst [vmem:[%s988_s18 + $0x38] sm:$0xff] %v492_v17  ;;  %589 = vst [vmem:[%s988_s18 + $0xb8] sm:$0xff] %v540_v18  ;;  %v496_v21 = vadd.f32 %v495_v19, %v976_v42  ;;  %v544_v22 = vadd.f32 %v543_v20, %v339_v16 }
  0xe6   : > { %v497_v23 = vpop.f32.mrf.mxu0  ;;  %v545_v24 = vpop.f32.mrf.mxu1 }
  0xe7   : > { %574 = vst [vmem:[%s988_s18 + $0x40] sm:$0xff] %v496_v21  ;;  %590 = vst [vmem:[%s988_s18 + $0xc0] sm:$0xff] %v544_v22  ;;  %v498_v26 = vadd.f32 %v497_v23, %v976_v42  ;;  %v546_v27 = vadd.f32 %v545_v24, %v339_v16 }
  0xe8   : > { %v501_v28 = vpop.f32.mrf.mxu0  ;;  %v549_v29 = vpop.f32.mrf.mxu1 }
  0xe9   : > { %575 = vst [vmem:[%s988_s18 + $0x48] sm:$0xff] %v498_v26  ;;  %591 = vst [vmem:[%s988_s18 + $0xc8] sm:$0xff] %v546_v27  ;;  %v502_v30 = vadd.f32 %v501_v28, %v978_v43  ;;  %v550_v31 = vadd.f32 %v549_v29, %v344_v25 }
  0xea   : > { %v503_v32 = vpop.f32.mrf.mxu0  ;;  %v551_v33 = vpop.f32.mrf.mxu1 }
  0xeb   : > { %576 = vst [vmem:[%s988_s18 + $0x50] sm:$0xff] %v502_v30  ;;  %592 = vst [vmem:[%s988_s18 + $0xd0] sm:$0xff] %v550_v31  ;;  %v504_v35 = vadd.f32 %v503_v32, %v978_v43  ;;  %v552_v36 = vadd.f32 %v551_v33, %v344_v25 }
  0xec   : > { %v507_v37 = vpop.f32.mrf.mxu0  ;;  %v555_v38 = vpop.f32.mrf.mxu1 }
  0xed   : > { %577 = vst [vmem:[%s988_s18 + $0x58] sm:$0xff] %v504_v35  ;;  %593 = vst [vmem:[%s988_s18 + $0xd8] sm:$0xff] %v552_v36  ;;  %v508_v39 = vadd.f32 %v507_v37, %v980_v44  ;;  %v556_v40 = vadd.f32 %v555_v38, %v349_v34 }
  0xee   : > { %v509_v41 = vpop.f32.mrf.mxu0  ;;  %v557_v42 = vpop.f32.mrf.mxu1 }
  0xef   : > { %578 = vst [vmem:[%s988_s18 + $0x60] sm:$0xff] %v508_v39  ;;  %594 = vst [vmem:[%s988_s18 + $0xe0] sm:$0xff] %v556_v40  ;;  %v510_v43 = vadd.f32 %v509_v41, %v980_v44  ;;  %v558_v47 = vadd.f32 %v557_v42, %v349_v34 }
  0xf0   : > { %v513_v48 = vpop.f32.mrf.mxu0  ;;  %v561_v49 = vpop.f32.mrf.mxu1 }
  0xf1   : > { %579 = vst [vmem:[%s988_s18 + $0x68] sm:$0xff] %v510_v43  ;;  %595 = vst [vmem:[%s988_s18 + $0xe8] sm:$0xff] %v558_v47  ;;  %v514_v50 = vadd.f32 %v513_v48, %v983_v45  ;;  %v562_v51 = vadd.f32 %v561_v49, %v354_v46 }
  0xf2   : > { %v515_v52 = vpop.f32.mrf.mxu0  ;;  %v563_v53 = vpop.f32.mrf.mxu1 }
  0xf3   : > { %580 = vst [vmem:[%s988_s18 + $0x70] sm:$0xff] %v514_v50  ;;  %596 = vst [vmem:[%s988_s18 + $0xf0] sm:$0xff] %v562_v51  ;;  %v516_v54 = vadd.f32 %v515_v52, %v983_v45  ;;  %v564_v55 = vadd.f32 %v563_v53, %v354_v46 }
  0xf5   : > { %581 = vst [vmem:[%s988_s18 + $0x78] sm:$0xff] %v516_v54  ;;  %597 = vst [vmem:[%s988_s18 + $0xf8] sm:$0xff] %v564_v55 }
  0xf6 PF: > { %s13_s14 = sadd.s32 1, %s800_s14   ;;  %s1043_s12 = smov %s796_s13 }
  0xf7   : > { %p10_p5 = scmp.ge.s32.totalorder %s13_s14, 4   ;;  %s1044_s13 = smov %s1046_s15 }
  0xf9   :  { %12 = sbr.rel (!%p10_p5) target bundleno = 2 (0x2), region = 68 }

// kernel: embedding_forward.5
= control target key start
LH: loop header
LB: loop body
LE: loop exit
PB: predicated region body
PF: predicated region fallthrough
CT: control target
= control target key end

     0   :  { %v17_v0 = vlaneseq  ;;  %vm181_vm0 = vcmask 1040384   ;;  %s393_s0 = inlined_call_operand.vmem [shape: f32[257,128], index: 0, kind: input, shape index: {}]   ;;  %s394_s1 = inlined_call_operand.vmem [shape: f32[1,128], index: 1, kind: input, shape index: {}]   ;;  %s395_s2 = inlined_call_operand.vmem [shape: f32[1,128], index: 2, kind: input, shape index: {}]   ;;  %s396_s3 = inlined_call_operand.vmem [shape: f32[1,128], index: 3, kind: input, shape index: {}]   ;;  %s397_s4 = inlined_call_operand.vmem [shape: f32[1,128], index: 4, kind: output, shape index: {}]  }
   0x1   :  { %v84_v7 = vld [vmem:[%s393_s0] sm:$0xff]  ;;  %v85_v8 = vld [vmem:[%s393_s0 + $0x8] sm:$0xff]  ;;  %v86_v11 = vld [vmem:[%s393_s0 + $0x10] sm:$0xff] }
   0x2   :  { %v244_v1 = vshrl.u32 %v17_v0, 7  ;;  %v87_v16 = vld [vmem:[%s393_s0 + $0x18] sm:$0xff]  ;;  %v88_v20 = vld [vmem:[%s393_s0 + $0x20] sm:$0xff]  ;;  %v89_v25 = vld [vmem:[%s393_s0 + $0x28] sm:$0xff] }
   0x3   :  { %v90_v30 = vld [vmem:[%s393_s0 + $0x30] sm:$0xff]  ;;  %v91_v35 = vld [vmem:[%s393_s0 + $0x38] sm:$0xff]  ;;  %v92_v40 = vld [vmem:[%s393_s0 + $0x40] sm:$0xff] }
   0x4   :  { %v19_v2 = vadd.s32 8, %v244_v1  ;;  %v20_v3 = vadd.s32 16, %v244_v1  ;;  %v21_v4 = vadd.s32 24, %v244_v1  ;;  %v51_v5 = vcvt.s32.f32 %v244_v1  ;;  %v93_v45 = vld [vmem:[%s393_s0 + $0x48] sm:$0xff]  ;;  %v94_v50 = vld [vmem:[%s393_s0 + $0x50] sm:$0xff]  ;;  %v95_v55 = vld [vmem:[%s393_s0 + $0x58] sm:$0xff] }
   0x5   :  { %v22_v9 = vadd.s32 32, %v244_v1  ;;  %v23_v12 = vadd.s32 40, %v244_v1  ;;  %v24_v17 = vadd.s32 48, %v244_v1  ;;  %v25_v21 = vadd.s32 56, %v244_v1  ;;  %v96_v60 = vld [vmem:[%s393_s0 + $0x60] sm:$0xff] }
   0x6   :  { %v52_v6 = vcvt.s32.f32 %v19_v2  ;;  %v53_v10 = vcvt.s32.f32 %v20_v3  ;;  %v54_v13 = vcvt.s32.f32 %v21_v4  ;;  %v117_v14 = vmul.f32 %v84_v7, %v51_v5  ;;  %v97_v2 = vld [vmem:[%s393_s0 + $0x68] sm:$0xff]  ;;  %v98_v7 = vld [vmem:[%s393_s0 + $0x70] sm:$0xff] }
   0x7   :  { %v55_v18 = vcvt.s32.f32 %v22_v9  ;;  %v56_v22 = vcvt.s32.f32 %v23_v12  ;;  %v26_v26 = vadd.s32 64, %v244_v1  ;;  %v57_v27 = vcvt.s32.f32 %v24_v17  ;;  %v99_v12 = vld [vmem:[%s393_s0 + $0x78] sm:$0xff]  ;;  %v100_v17 = vld [vmem:[%s393_s0 + $0x80] sm:$0xff] }
   0x8   :  { %v118_v15 = vmul.f32 %v85_v8, %v52_v6  ;;  %v119_v19 = vmul.f32 %v86_v11, %v53_v10  ;;  %v120_v23 = vmul.f32 %v87_v16, %v54_v13  ;;  %v27_v31 = vadd.s32 72, %v244_v1 }
   0x9   :  { %v121_v28 = vmul.f32 %v88_v20, %v55_v18  ;;  %v58_v32 = vcvt.s32.f32 %v25_v21  ;;  %v122_v33 = vmul.f32 %v89_v25, %v56_v22  ;;  %v28_v36 = vadd.s32 80, %v244_v1  ;;  %v101_v22 = vld [vmem:[%s393_s0 + $0x88] sm:$0xff] }
   0xa   :  { %v150_v24 = vadd.f32 %v118_v15, %v117_v14  ;;  %v59_v37 = vcvt.s32.f32 %v26_v26  ;;  %v123_v38 = vmul.f32 %v90_v30, %v57_v27  ;;  %v29_v41 = vadd.s32 88, %v244_v1  ;;  %v102_v27 = vld [vmem:[%s393_s0 + $0x90] sm:$0xff] }
   0xb   :  { %v60_v42 = vcvt.s32.f32 %v27_v31  ;;  %v124_v43 = vmul.f32 %v91_v35, %v58_v32  ;;  %v30_v46 = vadd.s32 96, %v244_v1  ;;  %v61_v47 = vcvt.s32.f32 %v28_v36  ;;  %v103_v32 = vld [vmem:[%s393_s0 + $0x98] sm:$0xff] }
   0xc   :  { %v151_v29 = vadd.f32 %v150_v24, %v119_v19  ;;  %v125_v48 = vmul.f32 %v92_v40, %v59_v37  ;;  %v31_v51 = vadd.s32 104, %v244_v1  ;;  %v62_v52 = vcvt.s32.f32 %v29_v41  ;;  %v104_v37 = vld [vmem:[%s393_s0 + $0xa0] sm:$0xff] }
   0xd   :  { %v126_v53 = vmul.f32 %v93_v45, %v60_v42  ;;  %v32_v56 = vadd.s32 112, %v244_v1  ;;  %v63_v57 = vcvt.s32.f32 %v30_v46  ;;  %v127_v58 = vmul.f32 %v94_v50, %v61_v47  ;;  %v105_v42 = vld [vmem:[%s393_s0 + $0xa8] sm:$0xff]  ;;  %v106_v47 = vld [vmem:[%s393_s0 + $0xb0] sm:$0xff] }
   0xe   :  { %v152_v34 = vadd.f32 %v151_v29, %v120_v23  ;;  %v33_v61 = vadd.s32 120, %v244_v1  ;;  %v64_v62 = vcvt.s32.f32 %v31_v51  ;;  %v128_v63 = vmul.f32 %v95_v55, %v62_v52  ;;  %v107_v52 = vld [vmem:[%s393_s0 + $0xb8] sm:$0xff] }
   0xf   :  { %v34_v3 = vadd.s32 128, %v244_v1  ;;  %v65_v4 = vcvt.s32.f32 %v32_v56  ;;  %v129_v5 = vmul.f32 %v96_v60, %v63_v57  ;;  %v35_v8 = vadd.s32 136, %v244_v1  ;;  %v108_v57 = vld [vmem:[%s393_s0 + $0xc0] sm:$0xff] }
  0x10   :  { %v153_v39 = vadd.f32 %v152_v34, %v121_v28  ;;  %v66_v9 = vcvt.s32.f32 %v33_v61  ;;  %v130_v10 = vmul.f32 %v97_v2, %v64_v62  ;;  %v36_v13 = vadd.s32 144, %v244_v1  ;;  %v109_v62 = vld [vmem:[%s393_s0 + $0xc8] sm:$0xff] }
  0x11   :  { %v67_v14 = vcvt.s32.f32 %v34_v3  ;;  %v131_v15 = vmul.f32 %v98_v7, %v65_v4  ;;  %v37_v18 = vadd.s32 152, %v244_v1  ;;  %v68_v19 = vcvt.s32.f32 %v35_v8  ;;  %v110_v4 = vld [vmem:[%s393_s0 + $0xd0] sm:$0xff] }
  0x12   :  { %v154_v44 = vadd.f32 %v153_v39, %v122_v33  ;;  %v132_v20 = vmul.f32 %v99_v12, %v66_v9  ;;  %v38_v23 = vadd.s32 160, %v244_v1  ;;  %v69_v24 = vcvt.s32.f32 %v36_v13  ;;  %v111_v9 = vld [vmem:[%s393_s0 + $0xd8] sm:$0xff] }
  0x13   :  { %v133_v25 = vmul.f32 %v100_v17, %v67_v14  ;;  %v39_v28 = vadd.s32 168, %v244_v1  ;;  %v70_v29 = vcvt.s32.f32 %v37_v18  ;;  %v134_v30 = vmul.f32 %v101_v22, %v68_v19 }
  0x14   :  { %v155_v49 = vadd.f32 %v154_v44, %v123_v38  ;;  %v40_v33 = vadd.s32 176, %v244_v1  ;;  %v71_v34 = vcvt.s32.f32 %v38_v23  ;;  %v135_v35 = vmul.f32 %v102_v27, %v69_v24 }
  0x15   :  { %v41_v38 = vadd.s32 184, %v244_v1  ;;  %v72_v39 = vcvt.s32.f32 %v39_v28  ;;  %v136_v40 = vmul.f32 %v103_v32, %v70_v29  ;;  %v50_v14 = vadd.s32 256, %v244_v1  ;;  %v115_v29 = vld [vmem:[%s393_s0 + $0xf8] sm:$0xff] }
  0x16   :  { %v156_v54 = vadd.f32 %v155_v49, %v124_v43  ;;  %v42_v43 = vadd.s32 192, %v244_v1  ;;  %v73_v44 = vcvt.s32.f32 %v40_v33  ;;  %v137_v45 = vmul.f32 %v104_v37, %v71_v34 }
  0x17   :  { %v74_v49 = vcvt.s32.f32 %v41_v38  ;;  %v138_v50 = vmul.f32 %v105_v42, %v72_v39  ;;  %v83_v24 = vcvt.s32.f32 %v50_v14 }
  0x18   :  { %v157_v59 = vadd.f32 %v156_v54, %v125_v48  ;;  %v43_v48 = vadd.s32 200, %v244_v1  ;;  %v75_v54 = vcvt.s32.f32 %v42_v43  ;;  %v139_v55 = vmul.f32 %v106_v47, %v73_v44  ;;  %v190_v44 = vld [vmem:[%s394_s1] sm:$0x1] }
  0x19   :  { %v140_v60 = vmul.f32 %v107_v52, %v74_v49 }
  0x1a   :  { %v158_v0 = vadd.f32 %v157_v59, %v126_v53  ;;  %v44_v53 = vadd.s32 208, %v244_v1  ;;  %v76_v59 = vcvt.s32.f32 %v43_v48  ;;  %v141_v2 = vmul.f32 %v108_v57, %v75_v54 }
  0x1c   :  { %v159_v6 = vadd.f32 %v158_v0, %v127_v58  ;;  %v45_v58 = vadd.s32 216, %v244_v1  ;;  %v77_v0 = vcvt.s32.f32 %v44_v53  ;;  %v142_v7 = vmul.f32 %v109_v62, %v76_v59  ;;  %v210_v62 = vld [vmem:[%s396_s3] sm:$0x1] }
  0x1e   :  { %v160_v11 = vadd.f32 %v159_v6, %v128_v63  ;;  %v46_v63 = vadd.s32 224, %v244_v1  ;;  %v78_v6 = vcvt.s32.f32 %v45_v58  ;;  %v143_v12 = vmul.f32 %v110_v4, %v77_v0 }
  0x20   :  { %v161_v16 = vadd.f32 %v160_v11, %v129_v5  ;;  %v47_v5 = vadd.s32 232, %v244_v1  ;;  %v79_v11 = vcvt.s32.f32 %v46_v63  ;;  %v144_v18 = vmul.f32 %v111_v9, %v78_v6 }
  0x22   :  { %v162_v21 = vadd.f32 %v161_v16, %v130_v10  ;;  %v48_v10 = vadd.s32 240, %v244_v1  ;;  %v49_v16 = vadd.s32 248, %v244_v1  ;;  %v80_v17 = vcvt.s32.f32 %v47_v5  ;;  %v116_v1 = vld [vmem:[%s393_s0 + $0x100] sm:$0x1] }
  0x23   :  { %v149_v32 = vmul.f32 %v116_v1, %v83_v24 }
  0x24   :  { %v163_v26 = vadd.f32 %v162_v21, %v131_v15  ;;  %v112_v15 = vld [vmem:[%s393_s0 + $0xe0] sm:$0xff]  ;;  %v81_v21 = vcvt.s32.f32 %v48_v10 }
  0x25   :  { %v145_v22 = vmul.f32 %v112_v15, %v79_v11 }
  0x26   :  { %v164_v31 = vadd.f32 %v163_v26, %v132_v20  ;;  %v113_v20 = vld [vmem:[%s393_s0 + $0xe8] sm:$0xff]  ;;  %v82_v26 = vcvt.s32.f32 %v49_v16 }
  0x27   :  { %v146_v27 = vmul.f32 %v113_v20, %v80_v17 }
  0x28   :  { %v165_v36 = vadd.f32 %v164_v31, %v133_v25  ;;  %v114_v25 = vld [vmem:[%s393_s0 + $0xf0] sm:$0xff]  ;;  %v148_v33 = vmul.f32 %v115_v29, %v82_v26 }
  0x2a   :  { %v166_v41 = vadd.f32 %v165_v36, %v134_v30  ;;  %v147_v30 = vmul.f32 %v114_v25, %v81_v21  ;;  %v182_v36 = vsel %vm181_vm0, %v149_v32, 0.0 }
  0x2c   :  { %v167_v46 = vadd.f32 %v166_v41, %v135_v35 }
  0x2e   :  { %v168_v51 = vadd.f32 %v167_v46, %v136_v40 }
  0x30   :  { %v169_v56 = vadd.f32 %v168_v51, %v137_v45 }
  0x32   :  { %v170_v61 = vadd.f32 %v169_v56, %v138_v50 }
  0x34   :  { %v171_v3 = vadd.f32 %v170_v61, %v139_v55 }
  0x36   :  { %v172_v8 = vadd.f32 %v171_v3, %v140_v60  ;;  %v208_v60 = vld [vmem:[%s395_s2] sm:$0x1] }
  0x38   :  { %v173_v13 = vadd.f32 %v172_v8, %v141_v2 }
  0x3a   :  { %v174_v19 = vadd.f32 %v173_v13, %v142_v7 }
  0x3c   :  { %v175_v23 = vadd.f32 %v174_v19, %v143_v12 }
  0x3e   :  { %v176_v28 = vadd.f32 %v175_v23, %v144_v18 }
  0x40   :  { %v177_v31 = vadd.f32 %v176_v28, %v145_v22 }
  0x42   :  { %v178_v34 = vadd.f32 %v177_v31, %v146_v27 }
  0x44   :  { %v179_v35 = vadd.f32 %v178_v34, %v147_v30 }
  0x46   :  { %v180_v37 = vadd.f32 %v179_v35, %v148_v33 }
  0x48   :  { %v183_v38 = vadd.f32 %v182_v36, %v180_v37 }
  0x4a   :  { %v184_v39 = vrot.slane %v183_v38, 4 }
  0x4c   :  { %v185_v40 = vadd.f32 %v184_v39, %v183_v38 }
  0x4e   :  { %v186_v41 = vrot.slane %v185_v40, 2 }
  0x50   :  { %v187_v42 = vadd.f32 %v186_v41, %v185_v40 }
  0x52   :  { %v188_v43 = vrot.slane %v187_v42, 1 }
  0x54   :  { %v189_v45 = vadd.f32 %v188_v43, %v187_v42 }
  0x56   :  { %v191_v46 = vadd.f32 %v190_v44, %v189_v45 }
  0x58   :  { %v192_v47 = vsel %vm181_vm0, %v191_v46, 0.0  ;;  %v196_v48 = vmul.f32 %v191_v46, %v191_v46 }
  0x59   :  { %193 = vadd.xlane.f32.xlu0 %v192_v47 }
  0x5a   :  { %v197_v49 = vsel %vm181_vm0, %v196_v48, 0.0 }
  0x5d   :  { %198 = vadd.xlane.f32.xlu0 %v197_v49 }
  0xe2   :  { %v194_v50 = vpop.xlane.xlu0 %193 }
  0xe3   :  { %v195_v51 = vmul.f32 0.0078125, %v194_v50 }
  0xe5   :  { %v201_v53 = vmul.f32 %v195_v51, %v195_v51  ;;  %v206_v58 = vsub.f32 %v191_v46, %v195_v51 }
  0xe6   :  { %v199_v52 = vpop.xlane.xlu0 %198 }
  0xe7   :  { %v200_v54 = vmul.f32 0.0078125, %v199_v52 }
  0xe9   :  { %v202_v55 = vsub.f32 %v200_v54, %v201_v53 }
  0xeb   :  { %v203_v56 = vmax.f32 %v202_v55, 0.0 }
  0xed   :  { %v204_v57 = vadd.f32 1e-05, %v203_v56 }
  0xef   :  { %217 = vrsqrt.f32 %v204_v57 }
  0xfc   :  { %v218_v59 = vpop.eup %217 }
  0xfd   :  { %v207_v61 = vmul.f32 %v218_v59, %v206_v58 }
  0xff   :  { %v209_v63 = vmul.f32 %v208_v60, %v207_v61 }
 0x101   :  { %v211_v0 = vadd.f32 %v210_v62, %v209_v63 }
 0x103   :  { %212 = vst [vmem:[%s397_s4] sm:$0x1] %v211_v0 }

// kernel: embedding_forward.4
= control target key start
LH: loop header
LB: loop body
LE: loop exit
PB: predicated region body
PF: predicated region fallthrough
CT: control target
= control target key end

     0   :  { %10 = vsyncpa [#allocation3], 0  ;;  %s7858_s0 = inlined_call_operand.vmem [shape: f32[4096,16], index: 0, kind: input, shape index: {}]   ;;  %s7859_s1 = inlined_call_operand.vmem [shape: f32[16,128], index: 1, kind: input, shape index: {}]   ;;  %s7860_s2 = inlined_call_operand.vmem [shape: f32[1,128], index: 2, kind: input, shape index: {}]   ;;  %s7861_s3 = inlined_call_operand.vmem [shape: f32[1,128], index: 3, kind: input, shape index: {}]   ;;  %s7862_s4 = inlined_call_operand.vmem [shape: f32[1,128], index: 4, kind: input, shape index: {}]   ;;  %s7863_s5 = inlined_call_operand.hbm [shape: f32[4096,128], index: 5, kind: output, shape index: {}]  }
   0x1   :  { %12 = vsyncpa [#allocation3 + $0x1], 0  ;;  %s4592_s18 = smov 0   ;;  %s4594_s19 = smov 0  }
   0x2   :  { %s4596_s20 = smov 0   ;;  %s4598_s21 = smov 0  }
   0x3 LB: > { %s4613_s22 = sadd.s32 4294967295, %s4557_s21   ;;  %s3719_s23 = sadd.s32 4294967294, %s4557_s21   ;;  %s4557_s21 = sphi %s4598_s21, %s8970_s21   ;;  %s4553_s20 = sphi %s4596_s20, %s8969_s20   ;;  %s4549_s19 = sphi %s4594_s19, %s8968_s19   ;;  %s4545_s18 = sphi %s4592_s18, %s8967_s18  }
   0x4   : > { %s4617_s24 = sadd.s32 1, %s4557_s21   ;;  %s135_s25 = sadd.s32 1, %s4553_s20 }
   0x5   : > { %s132_s26 = ssub.s32 %s4557_s21, %s4617_s24  ;;  %p145_p0 = scmp.ne.s32.totalorder %s4553_s20, %s4549_s19 }
   0x6   : > { %p133_p1 = scmp.eq.s32.totalorder %s132_s26, 0  ;;  %p146_p2 = scmp.eq.s32.totalorder %s4613_s22, 3 }
   0x7   : > { %p151_p3 = scmp.ne.s32.totalorder %s4549_s19, %s4545_s18  ;;  %p152_p4 = scmp.eq.s32.totalorder %s3719_s23, 3 }
   0x8   : > { %s4628_s27 = scalar_select %p133_p1, %s4553_s20, %s135_s25  }
   0x9   : > { %p4630_p5 = por %p146_p2, %p145_p0  ;;  %p4634_p6 = por %p152_p4, %p151_p3 }
   0xa   : > { %p3722_p7 = scmp.ge.s32.totalorder %s4557_s21, 1  ;;  %p191_p8 = scmp.lt.s32.totalorder %s4557_s21, 5 }
   0xc   : > { %p192_p9 = pnand %p3722_p7, %p191_p8 }
   0xe   : > { %195 = sbr.rel (%p192_p9) target bundleno = 947 (0x3b3), region = 40 }
  0x13   : > { %v355_v0 = vld [vmem:[%s7859_s1 + $0x8] sm:$0xff]  ;;  %v354_v1 = vld [vmem:[%s7859_s1] sm:$0xff]  ;;  %s3724_s9 = sshll.u32 %s4613_s22, 7  ;;  %vm363_vm0 = vcmask 130048   ;;  %s216_s16 = sand.u32 1, %s4549_s19  }
  0x14   : > { %3993 = vmatprep.subr.mxu0 %v355_v0  ;;  %4189 = vmatprep.subr.mxu1 %v355_v0  ;;  %p220_p10 = scmp.lt.s32.totalorder %s3724_s9, 511  ;;  %s3723_s25 = sshll.u32 %s216_s16, 10 }
  0x15   : > { %3994 = vmatpush3.msra.mxu0 %v355_v0  ;;  %4191 = vmatpush3.msra.mxu1 %v355_v0  ;;  %s5255_s6 = scalar_lea.vmem [#allocation2], %s3723_s25  ;;  %s3862_s7 = sshll.u32 %s4613_s22, 14 }
  0x16   : > { %3995 = vmatprep.subr.mxu0 %v354_v1  ;;  %4190 = vmatprep.subr.mxu1 %v354_v1  ;;  %s8972_s9 = smov (!%p220_p10, %s3724_s9), 511  ;;  %s3657_s8 = sshll.u32 %s5255_s6, 4  ;;  %s7811_s8 = int_to_ptr.vmem [resolvable:$true] %s3657_s8 }
  0x17   : > { %3996 = vmatpush3.msra.mxu0 %v354_v1  ;;  %4192 = vmatpush3.msra.mxu1 %v354_v1  ;;  %s3725_s10 = sshll.u32 %s8972_s9, 3  ;;  %s7809_s11 = scalar_lea.hbm %s7863_s5, %s3862_s7 }
  0x18   : > { %s4650_s13 = scalar_lea.vmem %s7858_s0, %s3725_s10  ;;  %s7818_s22 = scalar_lea.sflag [#allocation3], %s216_s16 }
  0x19   : > { %v226_v2 = vld [vmem:[%s4650_s13] sm:$0xff]  ;;  %v227_v4 = vld [vmem:[%s4650_s13 + $0x8] sm:$0xff]  ;;  %v228_v6 = vld [vmem:[%s4650_s13 + $0x10] sm:$0xff]  ;;  %s4497_s12 = scalar_lea.vmem %s7811_s8, 16384 }
  0x1a   : > { %v290_v3 = vld [vmem:[%s4650_s13 + $0x200] sm:$0xff]  ;;  %3997 = vmatprep.mubr.msk.f32.mxu0 %vm363_vm0, %v226_v2  ;;  %v291_v5 = vld [vmem:[%s4650_s13 + $0x208] sm:$0xff]  ;;  %v292_v7 = vld [vmem:[%s4650_s13 + $0x210] sm:$0xff]  ;;  %p4498_p11 = scmp.ne.s32.totalorder %s7811_s8, %s4497_s12 }
  0x1b   : > { %4093 = vmatprep.mubr.msk.f32.mxu1 %vm363_vm0, %v290_v3  ;;  %3998 = vmatmul.mubr.msk.f32.vlgmr.msra.gmra.mxu0 %vm363_vm0, %v227_v4  ;;  %v229_v8 = vld [vmem:[%s4650_s13 + $0x18] sm:$0xff]  ;;  %v230_v10 = vld [vmem:[%s4650_s13 + $0x20] sm:$0xff]  ;;  %v231_v12 = vld [vmem:[%s4650_s13 + $0x28] sm:$0xff] }
  0x1c   : > { %4094 = vmatmul.mubr.msk.f32.vlgmr.msra.gmra.mxu1 %vm363_vm0, %v291_v5  ;;  %4000 = vmatprep.mubr.msk.f32.mxu0 %vm363_vm0, %v228_v6  ;;  %v293_v9 = vld [vmem:[%s4650_s13 + $0x218] sm:$0xff]  ;;  %v294_v11 = vld [vmem:[%s4650_s13 + $0x220] sm:$0xff]  ;;  %v295_v13 = vld [vmem:[%s4650_s13 + $0x228] sm:$0xff]  ;;  %p4499_p12 = pnand %p4498_p11, %p4630_p5 }
  0x1d   : > { %4096 = vmatprep.mubr.msk.f32.mxu1 %vm363_vm0, %v292_v7  ;;  %v232_v14 = vld [vmem:[%s4650_s13 + $0x30] sm:$0xff]  ;;  %v233_v16 = vld [vmem:[%s4650_s13 + $0x38] sm:$0xff]  ;;  %v234_v18 = vld [vmem:[%s4650_s13 + $0x40] sm:$0xff] }
  0x1e   : > { %v296_v15 = vld [vmem:[%s4650_s13 + $0x230] sm:$0xff]  ;;  %v297_v17 = vld [vmem:[%s4650_s13 + $0x238] sm:$0xff]  ;;  %v298_v19 = vld [vmem:[%s4650_s13 + $0x240] sm:$0xff]  ;;  %p4500_p13 = pneg %p4499_p12 }
  0x1f   : > { %4001 = vmatmul.mubr.msk.f32.gmra.mxu0 %vm363_vm0, %v229_v8  ;;  %v235_v20 = vld [vmem:[%s4650_s13 + $0x48] sm:$0xff]  ;;  %v236_v22 = vld [vmem:[%s4650_s13 + $0x50] sm:$0xff]  ;;  %v237_v24 = vld [vmem:[%s4650_s13 + $0x58] sm:$0xff] }
  0x20   : > { %4097 = vmatmul.mubr.msk.f32.gmra.mxu1 %vm363_vm0, %v293_v9  ;;  %4003 = vmatprep.mubr.msk.f32.mxu0 %vm363_vm0, %v230_v10  ;;  %v299_v21 = vld [vmem:[%s4650_s13 + $0x248] sm:$0xff]  ;;  %v300_v23 = vld [vmem:[%s4650_s13 + $0x250] sm:$0xff]  ;;  %v301_v25 = vld [vmem:[%s4650_s13 + $0x258] sm:$0xff] }
  0x21   : > { %4099 = vmatprep.mubr.msk.f32.mxu1 %vm363_vm0, %v294_v11  ;;  %v238_v26 = vld [vmem:[%s4650_s13 + $0x60] sm:$0xff]  ;;  %v239_v28 = vld [vmem:[%s4650_s13 + $0x68] sm:$0xff]  ;;  %v240_v30 = vld [vmem:[%s4650_s13 + $0x70] sm:$0xff] }
  0x22   : > { %v302_v27 = vld [vmem:[%s4650_s13 + $0x260] sm:$0xff]  ;;  %v303_v29 = vld [vmem:[%s4650_s13 + $0x268] sm:$0xff]  ;;  %v304_v31 = vld [vmem:[%s4650_s13 + $0x270] sm:$0xff] }
  0x23   : > { %4004 = vmatmul.mubr.msk.f32.gmra.mxu0 %vm363_vm0, %v231_v12  ;;  %v241_v32 = vld [vmem:[%s4650_s13 + $0x78] sm:$0xff]  ;;  %v242_v34 = vld [vmem:[%s4650_s13 + $0x80] sm:$0xff]  ;;  %v243_v36 = vld [vmem:[%s4650_s13 + $0x88] sm:$0xff] }
  0x24   : > { %4100 = vmatmul.mubr.msk.f32.gmra.mxu1 %vm363_vm0, %v295_v13  ;;  %4006 = vmatprep.mubr.msk.f32.mxu0 %vm363_vm0, %v232_v14  ;;  %v305_v33 = vld [vmem:[%s4650_s13 + $0x278] sm:$0xff]  ;;  %v306_v35 = vld [vmem:[%s4650_s13 + $0x280] sm:$0xff]  ;;  %v307_v37 = vld [vmem:[%s4650_s13 + $0x288] sm:$0xff] }
  0x25   : > { %4102 = vmatprep.mubr.msk.f32.mxu1 %vm363_vm0, %v296_v15  ;;  %v244_v38 = vld [vmem:[%s4650_s13 + $0x90] sm:$0xff]  ;;  %v245_v40 = vld [vmem:[%s4650_s13 + $0x98] sm:$0xff]  ;;  %v246_v42 = vld [vmem:[%s4650_s13 + $0xa0] sm:$0xff] }
  0x26   : > { %v308_v39 = vld [vmem:[%s4650_s13 + $0x290] sm:$0xff]  ;;  %v309_v41 = vld [vmem:[%s4650_s13 + $0x298] sm:$0xff]  ;;  %v310_v43 = vld [vmem:[%s4650_s13 + $0x2a0] sm:$0xff] }
  0x27   : > { %4007 = vmatmul.mubr.msk.f32.gmra.mxu0 %vm363_vm0, %v233_v16  ;;  %v247_v44 = vld [vmem:[%s4650_s13 + $0xa8] sm:$0xff]  ;;  %v248_v46 = vld [vmem:[%s4650_s13 + $0xb0] sm:$0xff]  ;;  %v249_v48 = vld [vmem:[%s4650_s13 + $0xb8] sm:$0xff] }
  0x28   : > { %4103 = vmatmul.mubr.msk.f32.gmra.mxu1 %vm363_vm0, %v297_v17  ;;  %4009 = vmatprep.mubr.msk.f32.mxu0 %vm363_vm0, %v234_v18  ;;  %v311_v45 = vld [vmem:[%s4650_s13 + $0x2a8] sm:$0xff]  ;;  %v312_v47 = vld [vmem:[%s4650_s13 + $0x2b0] sm:$0xff]  ;;  %v313_v49 = vld [vmem:[%s4650_s13 + $0x2b8] sm:$0xff] }
  0x29   : > { %4105 = vmatprep.mubr.msk.f32.mxu1 %vm363_vm0, %v298_v19  ;;  %v250_v50 = vld [vmem:[%s4650_s13 + $0xc0] sm:$0xff]  ;;  %v251_v52 = vld [vmem:[%s4650_s13 + $0xc8] sm:$0xff]  ;;  %v252_v54 = vld [vmem:[%s4650_s13 + $0xd0] sm:$0xff] }
  0x2a   : > { %v314_v51 = vld [vmem:[%s4650_s13 + $0x2c0] sm:$0xff]  ;;  %v315_v53 = vld [vmem:[%s4650_s13 + $0x2c8] sm:$0xff]  ;;  %v316_v55 = vld [vmem:[%s4650_s13 + $0x2d0] sm:$0xff] }
  0x2b   : > { %4010 = vmatmul.mubr.msk.f32.gmra.mxu0 %vm363_vm0, %v235_v20  ;;  %v253_v56 = vld [vmem:[%s4650_s13 + $0xd8] sm:$0xff]  ;;  %v254_v58 = vld [vmem:[%s4650_s13 + $0xe0] sm:$0xff]  ;;  %v255_v60 = vld [vmem:[%s4650_s13 + $0xe8] sm:$0xff] }
  0x2c   : > { %4106 = vmatmul.mubr.msk.f32.gmra.mxu1 %vm363_vm0, %v299_v21  ;;  %4012 = vmatprep.mubr.msk.f32.mxu0 %vm363_vm0, %v236_v22  ;;  %v317_v57 = vld [vmem:[%s4650_s13 + $0x2d8] sm:$0xff]  ;;  %v318_v59 = vld [vmem:[%s4650_s13 + $0x2e0] sm:$0xff]  ;;  %v319_v61 = vld [vmem:[%s4650_s13 + $0x2e8] sm:$0xff] }
  0x2d   : > { %4108 = vmatprep.mubr.msk.f32.mxu1 %vm363_vm0, %v300_v23  ;;  %v256_v62 = vld [vmem:[%s4650_s13 + $0xf0] sm:$0xff]  ;;  %v257_v0 = vld [vmem:[%s4650_s13 + $0xf8] sm:$0xff]  ;;  %v258_v2 = vld [vmem:[%s4650_s13 + $0x100] sm:$0xff] }
  0x2e   : > { %v320_v63 = vld [vmem:[%s4650_s13 + $0x2f0] sm:$0xff]  ;;  %v321_v1 = vld [vmem:[%s4650_s13 + $0x2f8] sm:$0xff]  ;;  %v322_v3 = vld [vmem:[%s4650_s13 + $0x300] sm:$0xff] }
  0x2f   : > { %4013 = vmatmul.mubr.msk.f32.gmra.mxu0 %vm363_vm0, %v237_v24  ;;  %v259_v4 = vld [vmem:[%s4650_s13 + $0x108] sm:$0xff]  ;;  %v260_v6 = vld [vmem:[%s4650_s13 + $0x110] sm:$0xff]  ;;  %v261_v7 = vld [vmem:[%s4650_s13 + $0x118] sm:$0xff] }
  0x30   : > { %4109 = vmatmul.mubr.msk.f32.gmra.mxu1 %vm363_vm0, %v301_v25  ;;  %4015 = vmatprep.mubr.msk.f32.mxu0 %vm363_vm0, %v238_v26  ;;  %v323_v5 = vld [vmem:[%s4650_s13 + $0x308] sm:$0xff]  ;;  %v324_v8 = vld [vmem:[%s4650_s13 + $0x310] sm:$0xff]  ;;  %v325_v9 = vld [vmem:[%s4650_s13 + $0x318] sm:$0xff] }
  0x31   : > { %4111 = vmatprep.mubr.msk.f32.mxu1 %vm363_vm0, %v302_v27  ;;  %v262_v10 = vld [vmem:[%s4650_s13 + $0x120] sm:$0xff]  ;;  %v263_v11 = vld [vmem:[%s4650_s13 + $0x128] sm:$0xff]  ;;  %v264_v14 = vld [vmem:[%s4650_s13 + $0x130] sm:$0xff] }
  0x32   : > { %v326_v12 = vld [vmem:[%s4650_s13 + $0x320] sm:$0xff]  ;;  %v327_v13 = vld [vmem:[%s4650_s13 + $0x328] sm:$0xff]  ;;  %v265_v15 = vld [vmem:[%s4650_s13 + $0x138] sm:$0xff] }
  0x33   : > { %4016 = vmatmul.mubr.msk.f32.gmra.mxu0 %vm363_vm0, %v239_v28  ;;  %v328_v16 = vld [vmem:[%s4650_s13 + $0x330] sm:$0xff]  ;;  %v329_v17 = vld [vmem:[%s4650_s13 + $0x338] sm:$0xff]  ;;  %v266_v18 = vld [vmem:[%s4650_s13 + $0x140] sm:$0xff] }
  0x34   : > { %4112 = vmatmul.mubr.msk.f32.gmra.mxu1 %vm363_vm0, %v303_v29  ;;  %4018 = vmatprep.mubr.msk.f32.mxu0 %vm363_vm0, %v240_v30  ;;  %v267_v19 = vld [vmem:[%s4650_s13 + $0x148] sm:$0xff]  ;;  %v330_v20 = vld [vmem:[%s4650_s13 + $0x340] sm:$0xff]  ;;  %v268_v22 = vld [vmem:[%s4650_s13 + $0x150] sm:$0xff] }
  0x35   : > { %4114 = vmatprep.mubr.msk.f32.mxu1 %vm363_vm0, %v304_v31  ;;  %v331_v21 = vld [vmem:[%s4650_s13 + $0x348] sm:$0xff]  ;;  %v269_v23 = vld [vmem:[%s4650_s13 + $0x158] sm:$0xff]  ;;  %v332_v24 = vld [vmem:[%s4650_s13 + $0x350] sm:$0xff] }
  0x36   : > { %v333_v25 = vld [vmem:[%s4650_s13 + $0x358] sm:$0xff]  ;;  %v270_v26 = vld [vmem:[%s4650_s13 + $0x160] sm:$0xff]  ;;  %v271_v27 = vld [vmem:[%s4650_s13 + $0x168] sm:$0xff] }
  0x37   : > { %4019 = vmatmul.mubr.msk.f32.gmra.mxu0 %vm363_vm0, %v241_v32  ;;  %v334_v28 = vld [vmem:[%s4650_s13 + $0x360] sm:$0xff]  ;;  %v335_v29 = vld [vmem:[%s4650_s13 + $0x368] sm:$0xff]  ;;  %v272_v30 = vld [vmem:[%s4650_s13 + $0x170] sm:$0xff] }
  0x38   : > { %4115 = vmatmul.mubr.msk.f32.gmra.mxu1 %vm363_vm0, %v305_v33  ;;  %4021 = vmatprep.mubr.msk.f32.mxu0 %vm363_vm0, %v242_v34  ;;  %v273_v31 = vld [vmem:[%s4650_s13 + $0x178] sm:$0xff]  ;;  %v336_v32 = vld [vmem:[%s4650_s13 + $0x370] sm:$0xff]  ;;  %v274_v34 = vld [vmem:[%s4650_s13 + $0x180] sm:$0xff] }
  0x39   : > { %4117 = vmatprep.mubr.msk.f32.mxu1 %vm363_vm0, %v306_v35  ;;  %v337_v33 = vld [vmem:[%s4650_s13 + $0x378] sm:$0xff]  ;;  %v275_v35 = vld [vmem:[%s4650_s13 + $0x188] sm:$0xff] }
  0x3b   : > { %4022 = vmatmul.mubr.msk.f32.gmra.mxu0 %vm363_vm0, %v243_v36  ;;  %v338_v36 = vld [vmem:[%s4650_s13 + $0x380] sm:$0xff] }
  0x3c   : > { %4118 = vmatmul.mubr.msk.f32.gmra.mxu1 %vm363_vm0, %v307_v37  ;;  %4024 = vmatprep.mubr.msk.f32.mxu0 %vm363_vm0, %v244_v38  ;;  %v339_v37 = vld [vmem:[%s4650_s13 + $0x388] sm:$0xff]  ;;  %v276_v38 = vld [vmem:[%s4650_s13 + $0x190] sm:$0xff] }
  0x3d   : > { %4120 = vmatprep.mubr.msk.f32.mxu1 %vm363_vm0, %v308_v39  ;;  %v277_v39 = vld [vmem:[%s4650_s13 + $0x198] sm:$0xff] }
  0x3f   : > { %4025 = vmatmul.mubr.msk.f32.gmra.mxu0 %vm363_vm0, %v245_v40  ;;  %v340_v40 = vld [vmem:[%s4650_s13 + $0x390] sm:$0xff] }
  0x40   : > { %4121 = vmatmul.mubr.msk.f32.gmra.mxu1 %vm363_vm0, %v309_v41  ;;  %4027 = vmatprep.mubr.msk.f32.mxu0 %vm363_vm0, %v246_v42  ;;  %v341_v41 = vld [vmem:[%s4650_s13 + $0x398] sm:$0xff]  ;;  %v278_v42 = vld [vmem:[%s4650_s13 + $0x1a0] sm:$0xff] }
  0x41   : > { %4123 = vmatprep.mubr.msk.f32.mxu1 %vm363_vm0, %v310_v43  ;;  %v279_v43 = vld [vmem:[%s4650_s13 + $0x1a8] sm:$0xff] }
  0x43   : > { %4028 = vmatmul.mubr.msk.f32.gmra.mxu0 %vm363_vm0, %v247_v44  ;;  %v342_v44 = vld [vmem:[%s4650_s13 + $0x3a0] sm:$0xff] }
  0x44   : > { %4124 = vmatmul.mubr.msk.f32.gmra.mxu1 %vm363_vm0, %v311_v45  ;;  %4030 = vmatprep.mubr.msk.f32.mxu0 %vm363_vm0, %v248_v46  ;;  %v343_v45 = vld [vmem:[%s4650_s13 + $0x3a8] sm:$0xff]  ;;  %v280_v46 = vld [vmem:[%s4650_s13 + $0x1b0] sm:$0xff] }
  0x45   : > { %4126 = vmatprep.mubr.msk.f32.mxu1 %vm363_vm0, %v312_v47  ;;  %v281_v47 = vld [vmem:[%s4650_s13 + $0x1b8] sm:$0xff] }
  0x47   : > { %4031 = vmatmul.mubr.msk.f32.gmra.mxu0 %vm363_vm0, %v249_v48  ;;  %v344_v48 = vld [vmem:[%s4650_s13 + $0x3b0] sm:$0xff] }
  0x48   : > { %4127 = vmatmul.mubr.msk.f32.gmra.mxu1 %vm363_vm0, %v313_v49  ;;  %4033 = vmatprep.mubr.msk.f32.mxu0 %vm363_vm0, %v250_v50  ;;  %v345_v49 = vld [vmem:[%s4650_s13 + $0x3b8] sm:$0xff]  ;;  %v282_v50 = vld [vmem:[%s4650_s13 + $0x1c0] sm:$0xff] }
  0x49   : > { %4129 = vmatprep.mubr.msk.f32.mxu1 %vm363_vm0, %v314_v51  ;;  %v283_v51 = vld [vmem:[%s4650_s13 + $0x1c8] sm:$0xff] }
  0x4b   : > { %4034 = vmatmul.mubr.msk.f32.gmra.mxu0 %vm363_vm0, %v251_v52  ;;  %v346_v52 = vld [vmem:[%s4650_s13 + $0x3c0] sm:$0xff] }
  0x4c   : > { %4130 = vmatmul.mubr.msk.f32.gmra.mxu1 %vm363_vm0, %v315_v53  ;;  %4036 = vmatprep.mubr.msk.f32.mxu0 %vm363_vm0, %v252_v54  ;;  %v347_v53 = vld [vmem:[%s4650_s13 + $0x3c8] sm:$0xff]  ;;  %v284_v54 = vld [vmem:[%s4650_s13 + $0x1d0] sm:$0xff] }
  0x4d   : > { %4132 = vmatprep.mubr.msk.f32.mxu1 %vm363_vm0, %v316_v55  ;;  %v285_v55 = vld [vmem:[%s4650_s13 + $0x1d8] sm:$0xff] }
  0x4f   : > { %4037 = vmatmul.mubr.msk.f32.gmra.mxu0 %vm363_vm0, %v253_v56  ;;  %v348_v56 = vld [vmem:[%s4650_s13 + $0x3d0] sm:$0xff] }
  0x50   : > { %4133 = vmatmul.mubr.msk.f32.gmra.mxu1 %vm363_vm0, %v317_v57  ;;  %4039 = vmatprep.mubr.msk.f32.mxu0 %vm363_vm0, %v254_v58  ;;  %v349_v57 = vld [vmem:[%s4650_s13 + $0x3d8] sm:$0xff]  ;;  %v286_v58 = vld [vmem:[%s4650_s13 + $0x1e0] sm:$0xff] }
  0x51   : > { %4135 = vmatprep.mubr.msk.f32.mxu1 %vm363_vm0, %v318_v59  ;;  %v287_v59 = vld [vmem:[%s4650_s13 + $0x1e8] sm:$0xff] }
  0x53   : > { %4040 = vmatmul.mubr.msk.f32.gmra.mxu0 %vm363_vm0, %v255_v60  ;;  %v350_v60 = vld [vmem:[%s4650_s13 + $0x3e0] sm:$0xff] }
  0x54   : > { %4136 = vmatmul.mubr.msk.f32.gmra.mxu1 %vm363_vm0, %v319_v61  ;;  %4042 = vmatprep.mubr.msk.f32.mxu0 %vm363_vm0, %v256_v62  ;;  %v351_v61 = vld [vmem:[%s4650_s13 + $0x3e8] sm:$0xff]  ;;  %v288_v62 = vld [vmem:[%s4650_s13 + $0x1f0] sm:$0xff] }
  0x55   : > { %4138 = vmatprep.mubr.msk.f32.mxu1 %vm363_vm0, %v320_v63  ;;  %v4905_v63 = vld [vmem:[%s7860_s2] ss:$0 sm:$0xff] }
  0x57   : > { %4043 = vmatmul.mubr.msk.f32.gmra.mxu0 %vm363_vm0, %v257_v0  ;;  %v289_v0 = vld [vmem:[%s4650_s13 + $0x1f8] sm:$0xff] }
  0x58   : > { %4139 = vmatmul.mubr.msk.f32.gmra.mxu1 %vm363_vm0, %v321_v1  ;;  %4045 = vmatprep.mubr.msk.f32.mxu0 %vm363_vm0, %v258_v2  ;;  %v352_v1 = vld [vmem:[%s4650_s13 + $0x3f0] sm:$0xff] }
  0x59   : > { %4141 = vmatprep.mubr.msk.f32.mxu1 %vm363_vm0, %v322_v3 }
  0x5b   : > { %4046 = vmatmul.mubr.msk.f32.gmra.mxu0 %vm363_vm0, %v259_v4 }
  0x5c   : > { %4142 = vmatmul.mubr.msk.f32.gmra.mxu1 %vm363_vm0, %v323_v5  ;;  %4048 = vmatprep.mubr.msk.f32.mxu0 %vm363_vm0, %v260_v6 }
  0x5d   : > { %4144 = vmatprep.mubr.msk.f32.mxu1 %vm363_vm0, %v324_v8 }
  0x5f   : > { %4049 = vmatmul.mubr.msk.f32.gmra.mxu0 %vm363_vm0, %v261_v7  ;;  %v353_v7 = vld [vmem:[%s4650_s13 + $0x3f8] sm:$0xff]  ;;  %s4559_s13 = smov [#allocation2]  }
  0x60   : > { %4145 = vmatmul.mubr.msk.f32.gmra.mxu1 %vm363_vm0, %v325_v9  ;;  %4051 = vmatprep.mubr.msk.f32.mxu0 %vm363_vm0, %v262_v10  ;;  %s4501_s14 = sshll.u32 %s4559_s13, 4  ;;  %s4502_s14 = int_to_ptr.vmem [resolvable:$false] %s4501_s14 }
  0x61   : > { %4147 = vmatprep.mubr.msk.f32.mxu1 %vm363_vm0, %v326_v12  ;;  %s4503_s15 = scalar_lea.vmem %s4502_s14, 32768  ;;  %p4504_p0 = scmp.lt.s32.totalorder %s7811_s8, %s4502_s14 }
  0x62   : > { %p4505_p1 = scmp.lt.s32.totalorder %s4503_s15, %s4497_s12 }
  0x63   : > { %4052 = vmatmul.mubr.msk.f32.gmra.mxu0 %vm363_vm0, %v263_v11 }
  0x64   : > { %4148 = vmatmul.mubr.msk.f32.gmra.mxu1 %vm363_vm0, %v327_v13  ;;  %4054 = vmatprep.mubr.msk.f32.mxu0 %vm363_vm0, %v264_v14  ;;  %p4506_p2 = por %p4505_p1, %p4504_p0 }
  0x65   : > { %4150 = vmatprep.mubr.msk.f32.mxu1 %vm363_vm0, %v328_v16 }
  0x66   : > { %p4507_p3 = pnand %p4506_p2, %p4500_p13 }
  0x67   : > { %4055 = vmatmul.mubr.msk.f32.gmra.mxu0 %vm363_vm0, %v265_v15 }
  0x68   : > { %4151 = vmatmul.mubr.msk.f32.gmra.mxu1 %vm363_vm0, %v329_v17  ;;  %4057 = vmatprep.mubr.msk.f32.mxu0 %vm363_vm0, %v266_v18 }
  0x69   : > { %4153 = vmatprep.mubr.msk.f32.mxu1 %vm363_vm0, %v330_v20 }
  0x6b   : > { %4058 = vmatmul.mubr.msk.f32.gmra.mxu0 %vm363_vm0, %v267_v19 }
  0x6c   : > { %4154 = vmatmul.mubr.msk.f32.gmra.mxu1 %vm363_vm0, %v331_v21  ;;  %4060 = vmatprep.mubr.msk.f32.mxu0 %vm363_vm0, %v268_v22 }
  0x6d   : > { %4156 = vmatprep.mubr.msk.f32.mxu1 %vm363_vm0, %v332_v24 }
  0x6f   : > { %4061 = vmatmul.mubr.msk.f32.gmra.mxu0 %vm363_vm0, %v269_v23 }
  0x70   : > { %4157 = vmatmul.mubr.msk.f32.gmra.mxu1 %vm363_vm0, %v333_v25  ;;  %4063 = vmatprep.mubr.msk.f32.mxu0 %vm363_vm0, %v270_v26 }
  0x71   : > { %4159 = vmatprep.mubr.msk.f32.mxu1 %vm363_vm0, %v334_v28 }
  0x73   : > { %4064 = vmatmul.mubr.msk.f32.gmra.mxu0 %vm363_vm0, %v271_v27 }
  0x74   : > { %4160 = vmatmul.mubr.msk.f32.gmra.mxu1 %vm363_vm0, %v335_v29  ;;  %4066 = vmatprep.mubr.msk.f32.mxu0 %vm363_vm0, %v272_v30 }
  0x75   : > { %4162 = vmatprep.mubr.msk.f32.mxu1 %vm363_vm0, %v336_v32 }
  0x77   : > { %4067 = vmatmul.mubr.msk.f32.gmra.mxu0 %vm363_vm0, %v273_v31 }
  0x78   : > { %4163 = vmatmul.mubr.msk.f32.gmra.mxu1 %vm363_vm0, %v337_v33  ;;  %4069 = vmatprep.mubr.msk.f32.mxu0 %vm363_vm0, %v274_v34 }
  0x79   : > { %4165 = vmatprep.mubr.msk.f32.mxu1 %vm363_vm0, %v338_v36 }
  0x7b   : > { %4070 = vmatmul.mubr.msk.f32.gmra.mxu0 %vm363_vm0, %v275_v35 }
  0x7c   : > { %4166 = vmatmul.mubr.msk.f32.gmra.mxu1 %vm363_vm0, %v339_v37  ;;  %4072 = vmatprep.mubr.msk.f32.mxu0 %vm363_vm0, %v276_v38 }
  0x7d   : > { %4168 = vmatprep.mubr.msk.f32.mxu1 %vm363_vm0, %v340_v40 }
  0x7f   : > { %4073 = vmatmul.mubr.msk.f32.gmra.mxu0 %vm363_vm0, %v277_v39 }
  0x80   : > { %4169 = vmatmul.mubr.msk.f32.gmra.mxu1 %vm363_vm0, %v341_v41  ;;  %4075 = vmatprep.mubr.msk.f32.mxu0 %vm363_vm0, %v278_v42 }
  0x81   : > { %4171 = vmatprep.mubr.msk.f32.mxu1 %vm363_vm0, %v342_v44 }
  0x83   : > { %4076 = vmatmul.mubr.msk.f32.gmra.mxu0 %vm363_vm0, %v279_v43 }
  0x84   : > { %4172 = vmatmul.mubr.msk.f32.gmra.mxu1 %vm363_vm0, %v343_v45  ;;  %4078 = vmatprep.mubr.msk.f32.mxu0 %vm363_vm0, %v280_v46 }
  0x85   : > { %4174 = vmatprep.mubr.msk.f32.mxu1 %vm363_vm0, %v344_v48 }
  0x87   : > { %4079 = vmatmul.mubr.msk.f32.gmra.mxu0 %vm363_vm0, %v281_v47 }
  0x88   : > { %4175 = vmatmul.mubr.msk.f32.gmra.mxu1 %vm363_vm0, %v345_v49  ;;  %4081 = vmatprep.mubr.msk.f32.mxu0 %vm363_vm0, %v282_v50 }
  0x89   : > { %4177 = vmatprep.mubr.msk.f32.mxu1 %vm363_vm0, %v346_v52 }
  0x8b   : > { %4082 = vmatmul.mubr.msk.f32.gmra.mxu0 %vm363_vm0, %v283_v51 }
  0x8c   : > { %4178 = vmatmul.mubr.msk.f32.gmra.mxu1 %vm363_vm0, %v347_v53  ;;  %4084 = vmatprep.mubr.msk.f32.mxu0 %vm363_vm0, %v284_v54 }
  0x8d   : > { %4180 = vmatprep.mubr.msk.f32.mxu1 %vm363_vm0, %v348_v56 }
  0x8f   : > { %4085 = vmatmul.mubr.msk.f32.gmra.mxu0 %vm363_vm0, %v285_v55 }
  0x90   : > { %4181 = vmatmul.mubr.msk.f32.gmra.mxu1 %vm363_vm0, %v349_v57  ;;  %4087 = vmatprep.mubr.msk.f32.mxu0 %vm363_vm0, %v286_v58 }
  0x91   : > { %4183 = vmatprep.mubr.msk.f32.mxu1 %vm363_vm0, %v350_v60 }
  0x93   : > { %4088 = vmatmul.mubr.msk.f32.gmra.mxu0 %vm363_vm0, %v287_v59 }
  0x94   : > { %4184 = vmatmul.mubr.msk.f32.gmra.mxu1 %vm363_vm0, %v351_v61  ;;  %4090 = vmatprep.mubr.msk.f32.mxu0 %vm363_vm0, %v288_v62 }
  0x95   : > { %4186 = vmatprep.mubr.msk.f32.mxu1 %vm363_vm0, %v352_v1 }
  0x97   : > { %4091 = vmatmul.mubr.msk.f32.gmra.mxu0 %vm363_vm0, %v289_v0 }
  0x98   : > { %4187 = vmatmul.mubr.msk.f32.gmra.mxu1 %vm363_vm0, %v353_v7 }
  0xdb   : > { %v3999_v2 = vpop.f32.mrf.mxu0 }
  0xdc   : > { %v4095_v3 = vpop.f32.mrf.mxu1  ;;  %v4912_v4 = vadd.f32 %v3999_v2, %v4905_v63 }
  0xdd   : > { %v4915_v5 = vadd.f32 %v4095_v3, %v4905_v63  ;;  %v814_v6 = vpop.f32.mrf.mxu0 }
  0xde   : > { %1455 = vadd.xlane.f32.xlu0 %v4912_v4  ;;  %v4922_v8 = vadd.f32 %v4905_v63, %v814_v6  ;;  %v1838_v9 = vmul.f32 %v4912_v4, %v4912_v4  ;;  %v1134_v10 = vpop.f32.mrf.mxu1 }
  0xdf   : > { %8155 = vst [vmem:[#allocation5_spill] sm:$0xff] %v4915_v5  ;;  %1583 = vadd.xlane.f32.xlu1 %v4915_v5  ;;  %v4002_v11 = vpop.f32.mrf.mxu0  ;;  %v4931_v13 = vadd.f32 %v4905_v63, %v1134_v10 }
  0xe0   : > { %v4927_v12 = vadd.f32 %v4002_v11, %v4905_v63  ;;  %v4098_v14 = vpop.f32.mrf.mxu1  ;;  %v1837_v16 = vmul.f32 %v4922_v8, %v4922_v8 }
  0xe1   : > { %8156 = vst [vmem:[#allocation6_spill] sm:$0xff] %v4931_v13  ;;  %v4934_v15 = vadd.f32 %v4098_v14, %v4905_v63  ;;  %v824_v17 = vpop.f32.mrf.mxu0 }
  0xe2   : > { %1453 = vadd.xlane.f32.xlu0 %v4922_v8  ;;  %v1144_v18 = vpop.f32.mrf.mxu1  ;;  %v4942_v19 = vadd.f32 %v4905_v63, %v824_v17  ;;  %v1840_v22 = vmul.f32 %v4927_v12, %v4927_v12 }
  0xe3   : > { %1967 = vadd.xlane.f32.xlu1 %v1838_v9  ;;  %8157 = vst [vmem:[#allocation7_spill] sm:$0xff] %v4934_v15  ;;  %v4945_v20 = vadd.f32 %v4905_v63, %v1144_v18  ;;  %v4005_v21 = vpop.f32.mrf.mxu0 }
  0xe4   : > { %v1839_v23 = vmul.f32 %v4942_v19, %v4942_v19  ;;  %v4101_v25 = vpop.f32.mrf.mxu1  ;;  %v4954_v26 = vadd.f32 %v4005_v21, %v4905_v63 }
  0xe5   : > { %8158 = vst [vmem:[#allocation8_spill] sm:$0xff] %v4945_v20  ;;  %v834_v24 = vpop.f32.mrf.mxu0  ;;  %v4962_v29 = vadd.f32 %v4101_v25, %v4905_v63 }
  0xe6   : > { %1581 = vadd.xlane.f32.xlu0 %v4931_v13  ;;  %v4957_v27 = vadd.f32 %v4905_v63, %v834_v24  ;;  %v1154_v28 = vpop.f32.mrf.mxu1  ;;  %v1842_v32 = vmul.f32 %v4954_v26, %v4954_v26 }
  0xe7   : > { %1459 = vadd.xlane.f32.xlu1 %v4927_v12  ;;  %8159 = vst [vmem:[#allocation9_spill] sm:$0xff] %v4962_v29  ;;  %v4965_v30 = vadd.f32 %v4905_v63, %v1154_v28  ;;  %v4008_v31 = vpop.f32.mrf.mxu0 }
  0xe8   : > { %v1841_v33 = vmul.f32 %v4957_v27, %v4957_v27  ;;  %v4104_v35 = vpop.f32.mrf.mxu1  ;;  %v4974_v36 = vadd.f32 %v4008_v31, %v4905_v63 }
  0xe9   : > { %8160 = vst [vmem:[#allocation10_spill] sm:$0xff] %v4965_v30  ;;  %v844_v34 = vpop.f32.mrf.mxu0  ;;  %v4982_v39 = vadd.f32 %v4104_v35, %v4905_v63 }
  0xea   : > { %1965 = vadd.xlane.f32.xlu0 %v1837_v16  ;;  %v4977_v37 = vadd.f32 %v4905_v63, %v844_v34  ;;  %v1164_v38 = vpop.f32.mrf.mxu1  ;;  %v1844_v42 = vmul.f32 %v4974_v36, %v4974_v36 }
  0xeb   : > { %1587 = vadd.xlane.f32.xlu1 %v4934_v15  ;;  %8161 = vst [vmem:[#allocation11_spill] sm:$0xff] %v4982_v39  ;;  %v4985_v40 = vadd.f32 %v4905_v63, %v1164_v38  ;;  %v4011_v41 = vpop.f32.mrf.mxu0 }
  0xec   : > { %v1843_v43 = vmul.f32 %v4977_v37, %v4977_v37  ;;  %v4107_v45 = vpop.f32.mrf.mxu1  ;;  %v4994_v46 = vadd.f32 %v4011_v41, %v4905_v63 }
  0xed   : > { %8162 = vst [vmem:[#allocation12_spill] sm:$0xff] %v4985_v40  ;;  %v854_v44 = vpop.f32.mrf.mxu0  ;;  %v5002_v49 = vadd.f32 %v4107_v45, %v4905_v63 }
  0xee   : > { %1585 = vadd.xlane.f32.xlu0 %v4945_v20  ;;  %v4997_v47 = vadd.f32 %v4905_v63, %v854_v44  ;;  %v1174_v48 = vpop.f32.mrf.mxu1  ;;  %v1846_v52 = vmul.f32 %v4994_v46, %v4994_v46 }
  0xef   : > { %1457 = vadd.xlane.f32.xlu1 %v4942_v19  ;;  %8163 = vst [vmem:[#allocation13_spill] sm:$0xff] %v5002_v49  ;;  %v5005_v50 = vadd.f32 %v4905_v63, %v1174_v48  ;;  %v4014_v51 = vpop.f32.mrf.mxu0 }
  0xf0   : > { %v1845_v53 = vmul.f32 %v4997_v47, %v4997_v47  ;;  %v4110_v55 = vpop.f32.mrf.mxu1  ;;  %v5014_v56 = vadd.f32 %v4014_v51, %v4905_v63 }
  0xf1   : > { %8164 = vst [vmem:[#allocation14_spill] sm:$0xff] %v5005_v50  ;;  %v864_v54 = vpop.f32.mrf.mxu0  ;;  %v5022_v59 = vadd.f32 %v4110_v55, %v4905_v63 }
  0xf2   : > { %1969 = vadd.xlane.f32.xlu0 %v1839_v23  ;;  %v5017_v57 = vadd.f32 %v4905_v63, %v864_v54  ;;  %v1184_v58 = vpop.f32.mrf.mxu1  ;;  %v1848_v62 = vmul.f32 %v5014_v56, %v5014_v56 }
  0xf3   : > { %1971 = vadd.xlane.f32.xlu1 %v1840_v22  ;;  %8165 = vst [vmem:[#allocation15_spill] sm:$0xff] %v5022_v59  ;;  %v5025_v60 = vadd.f32 %v4905_v63, %v1184_v58  ;;  %v4017_v61 = vpop.f32.mrf.mxu0 }
  0xf4   : > { %v1847_v0 = vmul.f32 %v5017_v57, %v5017_v57  ;;  %v4113_v2 = vpop.f32.mrf.mxu1  ;;  %v5034_v3 = vadd.f32 %v4017_v61, %v4905_v63 }
  0xf5   : > { %8166 = vst [vmem:[#allocation16_spill] sm:$0xff] %v5025_v60  ;;  %v874_v1 = vpop.f32.mrf.mxu0  ;;  %v5042_v9 = vadd.f32 %v4113_v2, %v4905_v63 }
  0xf6   : > { %1461 = vadd.xlane.f32.xlu0 %v4957_v27  ;;  %v5037_v6 = vadd.f32 %v4905_v63, %v874_v1  ;;  %v1194_v7 = vpop.f32.mrf.mxu1  ;;  %v1850_v14 = vmul.f32 %v5034_v3, %v5034_v3 }
  0xf7   : > { %1463 = vadd.xlane.f32.xlu1 %v4954_v26  ;;  %8167 = vst [vmem:[#allocation17_spill] sm:$0xff] %v5042_v9  ;;  %v5045_v10 = vadd.f32 %v4905_v63, %v1194_v7  ;;  %v4020_v11 = vpop.f32.mrf.mxu0 }
  0xf8   : > { %v1849_v16 = vmul.f32 %v5037_v6, %v5037_v6  ;;  %v4116_v18 = vpop.f32.mrf.mxu1  ;;  %v5054_v21 = vadd.f32 %v4020_v11, %v4905_v63 }
  0xf9   : > { %8168 = vst [vmem:[#allocation18_spill] sm:$0xff] %v5045_v10  ;;  %v884_v17 = vpop.f32.mrf.mxu0  ;;  %v5062_v24 = vadd.f32 %v4116_v18, %v4905_v63 }
  0xfa   : > { %1589 = vadd.xlane.f32.xlu0 %v4965_v30  ;;  %v5057_v22 = vadd.f32 %v4905_v63, %v884_v17  ;;  %v1204_v23 = vpop.f32.mrf.mxu1  ;;  %v1852_v31 = vmul.f32 %v5054_v21, %v5054_v21 }
  0xfb   : > { %1591 = vadd.xlane.f32.xlu1 %v4962_v29  ;;  %8169 = vst [vmem:[#allocation19_spill] sm:$0xff] %v5062_v24  ;;  %v5065_v25 = vadd.f32 %v4905_v63, %v1204_v23  ;;  %v4023_v28 = vpop.f32.mrf.mxu0 }
  0xfc   : > { %v4119_v34 = vpop.f32.mrf.mxu1  ;;  %v5074_v35 = vadd.f32 %v4023_v28, %v4905_v63 }
  0xfd   : > { %8170 = vst [vmem:[#allocation20_spill] sm:$0xff] %v5065_v25 }
  0xfe   : > { %1973 = vadd.xlane.f32.xlu0 %v1841_v33  ;;  %v894_v33 = vpop.f32.mrf.mxu0  ;;  %v1214_v41 = vpop.f32.mrf.mxu1  ;;  %v1854_v45 = vmul.f32 %v5074_v35, %v5074_v35 }
  0xff   : > { %1975 = vadd.xlane.f32.xlu1 %v1842_v32  ;;  %v1851_v32 = vmul.f32 %v5057_v22, %v5057_v22  ;;  %v5077_v38 = vadd.f32 %v4905_v63, %v894_v33 }
 0x100   : > { %v4026_v44 = vpop.f32.mrf.mxu0 }
 0x101   : > { %v1853_v48 = vmul.f32 %v5077_v38, %v5077_v38 }
 0x102   : > { %1465 = vadd.xlane.f32.xlu0 %v4977_v37  ;;  %v904_v51 = vpop.f32.mrf.mxu0 }
 0x103   : > { %1467 = vadd.xlane.f32.xlu1 %v4974_v36  ;;  %v5097_v54 = vadd.f32 %v4905_v63, %v904_v51 }
 0x105   : > { %v1855_v1 = vmul.f32 %v5097_v54, %v5097_v54 }
 0x106   : > { %1593 = vadd.xlane.f32.xlu0 %v4985_v40 }
 0x107   : > { %1595 = vadd.xlane.f32.xlu1 %v4982_v39 }
 0x10a   : > { %1977 = vadd.xlane.f32.xlu0 %v1843_v43  ;;  %v5085_v43 = vadd.f32 %v4905_v63, %v1214_v41 }
 0x10b   : > { %1979 = vadd.xlane.f32.xlu1 %v1844_v42  ;;  %v5082_v42 = vadd.f32 %v4119_v34, %v4905_v63 }
 0x10c   : > { %8172 = vst [vmem:[#allocation22_spill] sm:$0xff] %v5085_v43 }
 0x10d   : > { %8171 = vst [vmem:[#allocation21_spill] sm:$0xff] %v5082_v42 }
 0x10e   : > { %1469 = vadd.xlane.f32.xlu0 %v4997_v47 }
 0x10f   : > { %1471 = vadd.xlane.f32.xlu1 %v4994_v46 }
 0x112   : > { %1597 = vadd.xlane.f32.xlu0 %v5005_v50 }
 0x113   : > { %1599 = vadd.xlane.f32.xlu1 %v5002_v49 }
 0x116   : > { %1981 = vadd.xlane.f32.xlu0 %v1845_v53  ;;  %v5094_v53 = vadd.f32 %v4026_v44, %v4905_v63 }
 0x117   : > { %1983 = vadd.xlane.f32.xlu1 %v1846_v52  ;;  %v4122_v52 = vpop.f32.mrf.mxu1 }
 0x118   : > { %v5102_v58 = vadd.f32 %v4122_v52, %v4905_v63 }
 0x119   : > { %v1224_v55 = vpop.f32.mrf.mxu1 }
 0x11a   : > { %1473 = vadd.xlane.f32.xlu0 %v5017_v57  ;;  %8173 = vst [vmem:[#allocation23_spill] sm:$0xff] %v5102_v58  ;;  %v5105_v61 = vadd.f32 %v4905_v63, %v1224_v55 }
 0x11b   : > { %1475 = vadd.xlane.f32.xlu1 %v5014_v56  ;;  %v4125_v7 = vpop.f32.mrf.mxu1 }
 0x11c   : > { %8174 = vst [vmem:[#allocation24_spill] sm:$0xff] %v5105_v61  ;;  %v5122_v17 = vadd.f32 %v4125_v7, %v4905_v63 }
 0x11e   : > { %1601 = vadd.xlane.f32.xlu0 %v5025_v60  ;;  %8175 = vst [vmem:[#allocation25_spill] sm:$0xff] %v5122_v17 }
 0x11f   : > { %1603 = vadd.xlane.f32.xlu1 %v5022_v59 }
 0x122   : > { %1985 = vadd.xlane.f32.xlu0 %v1847_v0  ;;  %v1856_v0 = vmul.f32 %v5094_v53, %v5094_v53 }
 0x123   : > { %1987 = vadd.xlane.f32.xlu1 %v1848_v62  ;;  %v4029_v62 = vpop.f32.mrf.mxu0 }
 0x124   : > { %v5114_v11 = vadd.f32 %v4029_v62, %v4905_v63 }
 0x125   : > { %v914_v2 = vpop.f32.mrf.mxu0 }
 0x126   : > { %1477 = vadd.xlane.f32.xlu0 %v5037_v6  ;;  %v1858_v28 = vmul.f32 %v5114_v11, %v5114_v11 }
 0x127   : > { %1479 = vadd.xlane.f32.xlu1 %v5034_v3  ;;  %v4032_v23 = vpop.f32.mrf.mxu0 }
 0x128   : > { %v5134_v34 = vadd.f32 %v4032_v23, %v4905_v63 }
 0x12a   : > { %1605 = vadd.xlane.f32.xlu0 %v5045_v10 }
 0x12b   : > { %1607 = vadd.xlane.f32.xlu1 %v5042_v9 }
 0x12e   : > { %1989 = vadd.xlane.f32.xlu0 %v1849_v16  ;;  %v1234_v16 = vpop.f32.mrf.mxu1 }
 0x12f   : > { %1991 = vadd.xlane.f32.xlu1 %v1850_v14  ;;  %v5117_v14 = vadd.f32 %v4905_v63, %v914_v2  ;;  %v5125_v18 = vadd.f32 %v4905_v63, %v1234_v16 }
 0x130   : > { %v4128_v33 = vpop.f32.mrf.mxu1 }
 0x131   : > { %8176 = vst [vmem:[#allocation26_spill] sm:$0xff] %v5125_v18 }
 0x132   : > { %1481 = vadd.xlane.f32.xlu0 %v5057_v22  ;;  %v1244_v44 = vpop.f32.mrf.mxu1 }
 0x133   : > { %1483 = vadd.xlane.f32.xlu1 %v5054_v21 }
 0x134   : > { %v4131_v7 = vpop.f32.mrf.mxu1 }
 0x136   : > { %1609 = vadd.xlane.f32.xlu0 %v5065_v25 }
 0x137   : > { %1611 = vadd.xlane.f32.xlu1 %v5062_v24 }
 0x13a   : > { %1993 = vadd.xlane.f32.xlu0 %v1851_v32  ;;  %v924_v32 = vpop.f32.mrf.mxu0 }
 0x13b   : > { %1995 = vadd.xlane.f32.xlu1 %v1852_v31  ;;  %v1857_v31 = vmul.f32 %v5117_v14, %v5117_v14  ;;  %v5137_v41 = vadd.f32 %v4905_v63, %v924_v32 }
 0x13c   : > { %v4035_v51 = vpop.f32.mrf.mxu0 }
 0x13e   : > { %1485 = vadd.xlane.f32.xlu0 %v5077_v38  ;;  %v934_v2 = vpop.f32.mrf.mxu0 }
 0x13f   : > { %1487 = vadd.xlane.f32.xlu1 %v5074_v35 }
 0x142   : > { %1613 = vadd.xlane.f32.xlu0 %v5085_v43 }
 0x143   : > { %1615 = vadd.xlane.f32.xlu1 %v5082_v42 }
 0x146   : > { %1997 = vadd.xlane.f32.xlu0 %v1853_v48  ;;  %v5145_v48 = vadd.f32 %v4905_v63, %v1244_v44 }
 0x147   : > { %1999 = vadd.xlane.f32.xlu1 %v1854_v45  ;;  %v5142_v45 = vadd.f32 %v4128_v33, %v4905_v63  ;;  %v5163_v33 = vadd.f32 %v4905_v63, %v934_v2 }
 0x148   : > { %8178 = vst [vmem:[#allocation28_spill] sm:$0xff] %v5145_v48 }
 0x149   : > { %8177 = vst [vmem:[#allocation27_spill] sm:$0xff] %v5142_v45 }
 0x14a   : > { %1489 = vadd.xlane.f32.xlu0 %v5097_v54 }
 0x14b   : > { %1491 = vadd.xlane.f32.xlu1 %v5094_v53 }
 0x14e   : > { %1617 = vadd.xlane.f32.xlu0 %v5105_v61 }
 0x14f   : > { %1619 = vadd.xlane.f32.xlu1 %v5102_v58 }
 0x152   : > { %2001 = vadd.xlane.f32.xlu0 %v1855_v1  ;;  %v1859_v1 = vmul.f32 %v5137_v41, %v5137_v41 }
 0x153   : > { %2003 = vadd.xlane.f32.xlu1 %v1856_v0  ;;  %v1860_v0 = vmul.f32 %v5134_v34, %v5134_v34 }
 0x156   : > { %1493 = vadd.xlane.f32.xlu0 %v5117_v14 }
 0x157   : > { %1495 = vadd.xlane.f32.xlu1 %v5114_v11 }
 0x15a   : > { %1621 = vadd.xlane.f32.xlu0 %v5125_v18 }
 0x15b   : > { %1623 = vadd.xlane.f32.xlu1 %v5122_v17 }
 0x15e   : > { %2005 = vadd.xlane.f32.xlu0 %v1857_v31  ;;  %v5160_v31 = vadd.f32 %v4035_v51, %v4905_v63 }
 0x15f   : > { %2007 = vadd.xlane.f32.xlu1 %v1858_v28 }
 0x162   : > { %1497 = vadd.xlane.f32.xlu0 %v5137_v41 }
 0x163   : > { %1499 = vadd.xlane.f32.xlu1 %v5134_v34 }
 0x166   : > { %1625 = vadd.xlane.f32.xlu0 %v5145_v48 }
 0x167   : > { %1627 = vadd.xlane.f32.xlu1 %v5142_v45  ;;  %v1456_v55 = vpop.xlane.xlu0 %1455 }
 0x168   : > { %v5149_v52 = vpop.xlane.xlu1 %1583  ;;  %v5151_v62 = vmul.f32 0.0078125, %v1456_v55  ;;  %v1254_v55 = vpop.f32.mrf.mxu1 }
 0x169   : > { %8179 = vst [vmem:[#allocation29_spill] sm:$0xff] %v5149_v52  ;;  %v5170_v52 = vadd.f32 %v4131_v7, %v4905_v63  ;;  %v5175_v51 = vadd.f32 %v4905_v63, %v1254_v55 }
 0x16a   : > { %2009 = vadd.xlane.f32.xlu0 %v1859_v1  ;;  %v2350_v28 = vmul.f32 %v5151_v62, %v5151_v62 }
 0x16b   : > { %2011 = vadd.xlane.f32.xlu1 %v1860_v0  ;;  %v1454_v23 = vpop.xlane.xlu0 %1453  ;;  %8181 = vst [vmem:[#allocation31_spill] sm:$0xff] %v5170_v52  ;;  %8182 = vst [vmem:[#allocation32_spill] sm:$0xff] %v5175_v51 }
 0x16c   : > { %v1968_v16 = vpop.xlane.xlu1 %1967  ;;  %v5172_v45 = vmul.f32 0.0078125, %v1454_v23  ;;  %v1862_v23 = vmul.f32 %v5160_v31, %v5160_v31 }
 0x16d   : > { %v2222_v32 = vmul.f32 0.0078125, %v1968_v16  ;;  %v4038_v16 = vpop.f32.mrf.mxu0 }
 0x16e   : > { %1501 = vadd.xlane.f32.xlu0 %v5163_v33  ;;  %v2349_v7 = vmul.f32 %v5172_v45, %v5172_v45 }
 0x16f   : > { %v2478_v44 = vsub.f32 %v2222_v32, %v2350_v28  ;;  %1503 = vadd.xlane.f32.xlu1 %v5160_v31  ;;  %v5167_v1 = vpop.xlane.xlu0 %1581  ;;  %v944_v55 = vpop.f32.mrf.mxu0 }
 0x170   : > { %v1460_v0 = vpop.xlane.xlu1 %1459  ;;  %8180 = vst [vmem:[#allocation30_spill] sm:$0xff] %v5167_v1  ;;  %v5197_v61 = vadd.f32 %v4905_v63, %v944_v55 }
 0x171   : > { %v2606_v48 = vmax.f32 %v2478_v44, 0.0  ;;  %v1861_v44 = vmul.f32 %v5163_v33, %v5163_v33  ;;  %v5187_v18 = vmul.f32 0.0078125, %v1460_v0 }
 0x172   : > { %1629 = vadd.xlane.f32.xlu0 %v5175_v51 }
 0x173   : > { %v2734_v2 = vadd.f32 1e-05, %v2606_v48  ;;  %1631 = vadd.xlane.f32.xlu1 %v5170_v52  ;;  %v1966_v32 = vpop.xlane.xlu0 %1965  ;;  %v4134_v52 = vpop.f32.mrf.mxu1  ;;  %v2352_v0 = vmul.f32 %v5187_v18, %v5187_v18 }
 0x174   : > { %v5179_v28 = vpop.xlane.xlu1 %1587  ;;  %v2221_v1 = vmul.f32 0.0078125, %v1966_v32 }
 0x175   : > { %8183 = vst [vmem:[#allocation33_spill] sm:$0xff] %v5179_v28  ;;  %4234 = vrsqrt.f32 %v2734_v2  ;;  %v5192_v2 = vadd.f32 %v4038_v16, %v4905_v63 }
 0x176   : > { %v2477_v48 = vsub.f32 %v2221_v1, %v2349_v7  ;;  %2013 = vadd.xlane.f32.xlu0 %v1861_v44  ;;  %v1264_v1 = vpop.f32.mrf.mxu1  ;;  %v5203_v7 = vadd.f32 %v4134_v52, %v4905_v63  ;;  %v4041_v52 = vpop.f32.mrf.mxu0 }
 0x177   : > { %2015 = vadd.xlane.f32.xlu1 %v1862_v23  ;;  %v5189_v51 = vpop.xlane.xlu0 %1585  ;;  %v5209_v55 = vadd.f32 %v4905_v63, %v1264_v1  ;;  %v1864_v1 = vmul.f32 %v5192_v2, %v5192_v2 }
 0x178   : > { %v1458_v28 = vpop.xlane.xlu1 %1457  ;;  %8184 = vst [vmem:[#allocation34_spill] sm:$0xff] %v5189_v51  ;;  %v2605_v32 = vmax.f32 %v2477_v48, 0.0  ;;  %8185 = vst [vmem:[#allocation35_spill] sm:$0xff] %v5203_v7 }
 0x179   : > { %v5194_v17 = vmul.f32 0.0078125, %v1458_v28  ;;  %8186 = vst [vmem:[#allocation36_spill] sm:$0xff] %v5209_v55 }
 0x17a   : > { %v2733_v58 = vadd.f32 1e-05, %v2605_v32  ;;  %1505 = vadd.xlane.f32.xlu0 %v5197_v61 }
 0x17b   : > { %1507 = vadd.xlane.f32.xlu1 %v5192_v2  ;;  %v1970_v23 = vpop.xlane.xlu0 %1969  ;;  %v2351_v28 = vmul.f32 %v5194_v17, %v5194_v17 }
 0x17c   : > { %v1972_v16 = vpop.xlane.xlu1 %1971  ;;  %4236 = vrsqrt.f32 %v2733_v58  ;;  %v2223_v48 = vmul.f32 0.0078125, %v1970_v23  ;;  %v2990_v58 = vsub.f32 %v4912_v4, %v5151_v62  ;;  %v954_v4 = vpop.f32.mrf.mxu0 }
 0x17d   : > { %v2224_v44 = vmul.f32 0.0078125, %v1972_v16  ;;  %v4137_v62 = vpop.f32.mrf.mxu1 }
 0x17e   : > { %v2479_v51 = vsub.f32 %v2223_v48, %v2351_v28  ;;  %1633 = vadd.xlane.f32.xlu0 %v5209_v55  ;;  %v1863_v28 = vmul.f32 %v5197_v61, %v5197_v61  ;;  %v4044_v10 = vpop.f32.mrf.mxu0 }
 0x17f   : > { %v2480_v32 = vsub.f32 %v2224_v44, %v2352_v0  ;;  %1635 = vadd.xlane.f32.xlu1 %v5203_v7  ;;  %v1462_v42 = vpop.xlane.xlu0 %1461  ;;  %v5221_v0 = vld [vmem:[%s7861_s3] ss:$0 sm:$0xff] }
 0x180   : > { %v1464_v43 = vpop.xlane.xlu1 %1463  ;;  %v2607_v16 = vmax.f32 %v2479_v51, 0.0  ;;  %v5230_v51 = vld [vmem:[%s7862_s4] ss:$0 sm:$0xff] }
 0x181   : > { %v2608_v25 = vmax.f32 %v2480_v32, 0.0  ;;  %v5233_v32 = vadd.f32 %v4041_v52, %v4905_v63  ;;  %v1274_v52 = vpop.f32.mrf.mxu1 }
 0x182   : > { %v4235_v23 = vpop.eup %4234  ;;  %v2735_v55 = vadd.f32 1e-05, %v2607_v16  ;;  %2017 = vadd.xlane.f32.xlu0 %v1863_v28  ;;  %v5242_v16 = vmul.f32 0.0078125, %v1462_v42  ;;  %v2989_v28 = vsub.f32 %v4922_v8, %v5172_v45  ;;  %v5263_v45 = vadd.f32 %v4905_v63, %v1274_v52 }
 0x183   : > { %v3118_v44 = vmul.f32 %v4235_v23, %v2990_v58  ;;  %v2736_v48 = vadd.f32 1e-05, %v2608_v25  ;;  %2019 = vadd.xlane.f32.xlu1 %v1864_v1  ;;  %v5237_v24 = vpop.xlane.xlu0 %1589  ;;  %v5240_v25 = vmul.f32 0.0078125, %v1464_v43  ;;  %v5245_v1 = vadd.f32 %v4905_v63, %v954_v4 }
 0x184   : > { %v5235_v7 = vpop.xlane.xlu1 %1591  ;;  %8188 = vst [vmem:[#allocation38_spill] sm:$0xff] %v5237_v24  ;;  %v5252_v24 = vadd.f32 %v4137_v62, %v4905_v63  ;;  %8190 = vst [vmem:[#allocation40_spill] sm:$0xff] %v5263_v45 }
 0x185   : > { %8187 = vst [vmem:[#allocation37_spill] sm:$0xff] %v5235_v7  ;;  %v3253_v58 = vmul.f32 %v5221_v0, %v3118_v44  ;;  %4238 = vrsqrt.f32 %v2736_v48  ;;  %v2353_v44 = vmul.f32 %v5242_v16, %v5242_v16  ;;  %v1865_v52 = vmul.f32 %v5245_v1, %v5245_v1 }
 0x186   : > { %4240 = vrsqrt.f32 %v2735_v55  ;;  %8189 = vst [vmem:[#allocation39_spill] sm:$0xff] %v5252_v24  ;;  %1509 = vadd.xlane.f32.xlu0 %v5245_v1  ;;  %v2354_v55 = vmul.f32 %v5240_v25, %v5240_v25 }
 0x187   : > { %v3388_v23 = vadd.f32 %v5230_v51, %v3253_v58  ;;  %1511 = vadd.xlane.f32.xlu1 %v5233_v32  ;;  %v1974_v42 = vpop.xlane.xlu0 %1973 }
 0x188   : > { %v1976_v43 = vpop.xlane.xlu1 %1975  ;;  %v2225_v4 = vmul.f32 0.0078125, %v1974_v42  ;;  %v1866_v42 = vmul.f32 %v5233_v32, %v5233_v32 }
 0x189   : > { %3516 = vst [vmem:[%s5255_s6 + $0x8] sm:$0xff] %v3388_v23  ;;  %v2226_v48 = vmul.f32 0.0078125, %v1976_v43  ;;  %v4237_v8 = vpop.eup %4236 }
 0x18a   : > { %v3117_v62 = vmul.f32 %v4237_v8, %v2989_v28  ;;  %v2481_v7 = vsub.f32 %v2225_v4, %v2353_v44  ;;  %1637 = vadd.xlane.f32.xlu0 %v5263_v45  ;;  %v4140_v4 = vpop.f32.mrf.mxu1  ;;  %v5283_v45 = vadd.f32 %v4044_v10, %v4905_v63 }
 0x18b   : > { %v2482_v58 = vsub.f32 %v2226_v48, %v2354_v55  ;;  %1639 = vadd.xlane.f32.xlu1 %v5252_v24  ;;  %v1466_v9 = vpop.xlane.xlu0 %1465  ;;  %v964_v48 = vpop.f32.mrf.mxu0 }
 0x18c   : > { %v1468_v23 = vpop.xlane.xlu1 %1467  ;;  %v3252_v60 = vmul.f32 %v5221_v0, %v3117_v62  ;;  %v2609_v43 = vmax.f32 %v2481_v7, 0.0  ;;  %v2992_v7 = vsub.f32 %v4927_v12, %v5187_v18 }
 0x18d   : > { %v2610_v59 = vmax.f32 %v2482_v58, 0.0  ;;  %v5273_v8 = vmul.f32 0.0078125, %v1468_v23  ;;  %v2991_v23 = vsub.f32 %v4942_v19, %v5194_v17 }
 0x18e   : > { %v3387_v28 = vadd.f32 %v5230_v51, %v3252_v60  ;;  %v2737_v44 = vadd.f32 1e-05, %v2609_v43  ;;  %2021 = vadd.xlane.f32.xlu0 %v1865_v52  ;;  %v5290_v43 = vadd.f32 %v4905_v63, %v964_v48 }
 0x18f   : > { %v2738_v55 = vadd.f32 1e-05, %v2610_v59  ;;  %2023 = vadd.xlane.f32.xlu1 %v1866_v42  ;;  %v5277_v58 = vpop.xlane.xlu0 %1593  ;;  %v5285_v59 = vmul.f32 0.0078125, %v1466_v9  ;;  %v2356_v10 = vmul.f32 %v5273_v8, %v5273_v8  ;;  %v5296_v9 = vadd.f32 %v4140_v4, %v4905_v63 }
 0x190   : > { %v5275_v62 = vpop.xlane.xlu1 %1595  ;;  %8192 = vst [vmem:[#allocation42_spill] sm:$0xff] %v5277_v58  ;;  %3515 = vst [vmem:[%s5255_s6] sm:$0xff] %v3387_v28  ;;  %v1284_v58 = vpop.f32.mrf.mxu1 }
 0x191   : > { %8191 = vst [vmem:[#allocation41_spill] sm:$0xff] %v5275_v62  ;;  %4242 = vrsqrt.f32 %v2738_v55  ;;  %8193 = vst [vmem:[#allocation43_spill] sm:$0xff] %v5296_v9  ;;  %v2355_v28 = vmul.f32 %v5285_v59, %v5285_v59 }
 0x192   : > { %v4239_v60 = vpop.eup %4238  ;;  %4244 = vrsqrt.f32 %v2737_v44  ;;  %1513 = vadd.xlane.f32.xlu0 %v5290_v43 }
 0x193   : > { %v4241_v42 = vpop.eup %4240  ;;  %v3120_v52 = vmul.f32 %v4239_v60, %v2992_v7  ;;  %1515 = vadd.xlane.f32.xlu1 %v5283_v45  ;;  %v1978_v19 = vpop.xlane.xlu0 %1977  ;;  %v5304_v7 = vadd.f32 %v4905_v63, %v1284_v58  ;;  %v1868_v58 = vmul.f32 %v5283_v45, %v5283_v45 }
 0x194   : > { %v3119_v12 = vmul.f32 %v4241_v42, %v2991_v23  ;;  %v1980_v18 = vpop.xlane.xlu1 %1979  ;;  %v2227_v44 = vmul.f32 0.0078125, %v1978_v19  ;;  %v4047_v42 = vpop.f32.mrf.mxu0 }
 0x195   : > { %v3255_v17 = vmul.f32 %v5221_v0, %v3120_v52  ;;  %v2228_v55 = vmul.f32 0.0078125, %v1980_v18  ;;  %8194 = vst [vmem:[#allocation44_spill] sm:$0xff] %v5304_v7 }
 0x196   : > { %v3254_v48 = vmul.f32 %v5221_v0, %v3119_v12  ;;  %v2483_v23 = vsub.f32 %v2227_v44, %v2355_v28  ;;  %1641 = vadd.xlane.f32.xlu0 %v5304_v7  ;;  %v1867_v12 = vmul.f32 %v5290_v43, %v5290_v43  ;;  %v974_v28 = vpop.f32.mrf.mxu0 }
 0x197   : > { %v3390_v4 = vadd.f32 %v5230_v51, %v3255_v17  ;;  %v2484_v60 = vsub.f32 %v2228_v55, %v2356_v10  ;;  %1643 = vadd.xlane.f32.xlu1 %v5296_v9  ;;  %v1470_v18 = vpop.xlane.xlu0 %1469  ;;  %v4143_v55 = vpop.f32.mrf.mxu1 }
 0x198   : > { %v3389_v52 = vadd.f32 %v5230_v51, %v3254_v48  ;;  %v1472_v62 = vpop.xlane.xlu1 %1471  ;;  %v2611_v24 = vmax.f32 %v2483_v23, 0.0  ;;  %v5325_v23 = vadd.f32 %v4047_v42, %v4905_v63  ;;  %v5338_v42 = vadd.f32 %v4143_v55, %v4905_v63 }
 0x199   : > { %3518 = vst [vmem:[%s5255_s6 + $0x18] sm:$0xff] %v3390_v4  ;;  %v2612_v19 = vmax.f32 %v2484_v60, 0.0  ;;  %v5316_v44 = vmul.f32 0.0078125, %v1472_v62  ;;  %v2994_v60 = vsub.f32 %v4954_v26, %v5240_v25  ;;  %v5332_v62 = vadd.f32 %v4905_v63, %v974_v28 }
 0x19a   : > { %3517 = vst [vmem:[%s5255_s6 + $0x10] sm:$0xff] %v3389_v52  ;;  %v2739_v17 = vadd.f32 1e-05, %v2611_v24  ;;  %2025 = vadd.xlane.f32.xlu0 %v1867_v12  ;;  %v5327_v52 = vmul.f32 0.0078125, %v1470_v18  ;;  %8197 = vst [vmem:[#allocation47_spill] sm:$0xff] %v5338_v42 }
 0x19b   : > { %v2740_v10 = vadd.f32 1e-05, %v2612_v19  ;;  %2027 = vadd.xlane.f32.xlu1 %v1868_v58  ;;  %v5320_v4 = vpop.xlane.xlu0 %1597  ;;  %v2993_v19 = vsub.f32 %v4957_v27, %v5242_v16  ;;  %v2358_v25 = vmul.f32 %v5316_v44, %v5316_v44 }
 0x19c   : > { %v5318_v48 = vpop.xlane.xlu1 %1599  ;;  %8196 = vst [vmem:[#allocation46_spill] sm:$0xff] %v5320_v4  ;;  %v1294_v4 = vpop.f32.mrf.mxu1 }
 0x19d   : > { %8195 = vst [vmem:[#allocation45_spill] sm:$0xff] %v5318_v48  ;;  %4246 = vrsqrt.f32 %v2740_v10  ;;  %v2357_v10 = vmul.f32 %v5327_v52, %v5327_v52  ;;  %v4050_v48 = vpop.f32.mrf.mxu0 }
 0x19e   : > { %v4243_v24 = vpop.eup %4242  ;;  %4248 = vrsqrt.f32 %v2739_v17  ;;  %1517 = vadd.xlane.f32.xlu0 %v5332_v62 }
 0x19f   : > { %v4245_v58 = vpop.eup %4244  ;;  %v3122_v12 = vmul.f32 %v4243_v24, %v2994_v60  ;;  %1519 = vadd.xlane.f32.xlu1 %v5325_v23  ;;  %v1982_v27 = vpop.xlane.xlu0 %1981  ;;  %v5346_v24 = vadd.f32 %v4905_v63, %v1294_v4  ;;  %v1870_v4 = vmul.f32 %v5325_v23, %v5325_v23 }
 0x1a0   : > { %v3121_v26 = vmul.f32 %v4245_v58, %v2993_v19  ;;  %v1984_v18 = vpop.xlane.xlu1 %1983  ;;  %v2229_v28 = vmul.f32 0.0078125, %v1982_v27 }
 0x1a1   : > { %v3257_v16 = vmul.f32 %v5221_v0, %v3122_v12  ;;  %v2230_v17 = vmul.f32 0.0078125, %v1984_v18  ;;  %8198 = vst [vmem:[#allocation48_spill] sm:$0xff] %v5346_v24 }
 0x1a2   : > { %v3256_v60 = vmul.f32 %v5221_v0, %v3121_v26  ;;  %v2485_v58 = vsub.f32 %v2229_v28, %v2357_v10  ;;  %1645 = vadd.xlane.f32.xlu0 %v5346_v24  ;;  %v1869_v26 = vmul.f32 %v5332_v62, %v5332_v62  ;;  %v984_v10 = vpop.f32.mrf.mxu0 }
 0x1a3   : > { %v3392_v55 = vadd.f32 %v5230_v51, %v3257_v16  ;;  %v2486_v19 = vsub.f32 %v2230_v17, %v2358_v25  ;;  %1647 = vadd.xlane.f32.xlu1 %v5338_v42  ;;  %v1474_v18 = vpop.xlane.xlu0 %1473  ;;  %v4146_v17 = vpop.f32.mrf.mxu1 }
 0x1a4   : > { %v3391_v12 = vadd.f32 %v5230_v51, %v3256_v60  ;;  %v1476_v7 = vpop.xlane.xlu1 %1475  ;;  %v2613_v9 = vmax.f32 %v2485_v58, 0.0  ;;  %v5367_v58 = vadd.f32 %v4050_v48, %v4905_v63  ;;  %v5380_v48 = vadd.f32 %v4146_v17, %v4905_v63 }
 0x1a5   : > { %3520 = vst [vmem:[%s5255_s6 + $0x28] sm:$0xff] %v3392_v55  ;;  %v2614_v27 = vmax.f32 %v2486_v19, 0.0  ;;  %v5358_v28 = vmul.f32 0.0078125, %v1476_v7  ;;  %v2996_v19 = vsub.f32 %v4974_v36, %v5273_v8  ;;  %v5374_v7 = vadd.f32 %v4905_v63, %v984_v10 }
 0x1a6   : > { %3519 = vst [vmem:[%s5255_s6 + $0x20] sm:$0xff] %v3391_v12  ;;  %v2741_v16 = vadd.f32 1e-05, %v2613_v9  ;;  %2029 = vadd.xlane.f32.xlu0 %v1869_v26  ;;  %v5369_v12 = vmul.f32 0.0078125, %v1474_v18  ;;  %8201 = vst [vmem:[#allocation51_spill] sm:$0xff] %v5380_v48 }
 0x1a7   : > { %v2742_v25 = vadd.f32 1e-05, %v2614_v27  ;;  %2031 = vadd.xlane.f32.xlu1 %v1870_v4  ;;  %v5362_v55 = vpop.xlane.xlu0 %1601  ;;  %v2995_v27 = vsub.f32 %v4977_v37, %v5285_v59  ;;  %v2360_v8 = vmul.f32 %v5358_v28, %v5358_v28 }
 0x1a8   : > { %v5360_v60 = vpop.xlane.xlu1 %1603  ;;  %8200 = vst [vmem:[#allocation50_spill] sm:$0xff] %v5362_v55  ;;  %v1304_v55 = vpop.f32.mrf.mxu1 }
 0x1a9   : > { %8199 = vst [vmem:[#allocation49_spill] sm:$0xff] %v5360_v60  ;;  %4250 = vrsqrt.f32 %v2742_v25  ;;  %v2359_v25 = vmul.f32 %v5369_v12, %v5369_v12  ;;  %v4053_v60 = vpop.f32.mrf.mxu0 }
 0x1aa   : > { %v4247_v9 = vpop.eup %4246  ;;  %4252 = vrsqrt.f32 %v2741_v16  ;;  %1521 = vadd.xlane.f32.xlu0 %v5374_v7 }
 0x1ab   : > { %v4249_v4 = vpop.eup %4248  ;;  %v3124_v26 = vmul.f32 %v4247_v9, %v2996_v19  ;;  %1523 = vadd.xlane.f32.xlu1 %v5367_v58  ;;  %v1986_v37 = vpop.xlane.xlu0 %1985  ;;  %v5388_v9 = vadd.f32 %v4905_v63, %v1304_v55  ;;  %v1872_v55 = vmul.f32 %v5367_v58, %v5367_v58 }
 0x1ac   : > { %v3123_v36 = vmul.f32 %v4249_v4, %v2995_v27  ;;  %v1988_v18 = vpop.xlane.xlu1 %1987  ;;  %v2231_v10 = vmul.f32 0.0078125, %v1986_v37 }
 0x1ad   : > { %v3259_v59 = vmul.f32 %v5221_v0, %v3124_v26  ;;  %v2232_v16 = vmul.f32 0.0078125, %v1988_v18  ;;  %8202 = vst [vmem:[#allocation52_spill] sm:$0xff] %v5388_v9 }
 0x1ae   : > { %v3258_v19 = vmul.f32 %v5221_v0, %v3123_v36  ;;  %v2487_v4 = vsub.f32 %v2231_v10, %v2359_v25  ;;  %1649 = vadd.xlane.f32.xlu0 %v5388_v9  ;;  %v1871_v36 = vmul.f32 %v5374_v7, %v5374_v7  ;;  %v994_v25 = vpop.f32.mrf.mxu0 }
 0x1af   : > { %v3394_v17 = vadd.f32 %v5230_v51, %v3259_v59  ;;  %v2488_v27 = vsub.f32 %v2232_v16, %v2360_v8  ;;  %1651 = vadd.xlane.f32.xlu1 %v5380_v48  ;;  %v1478_v18 = vpop.xlane.xlu0 %1477  ;;  %v4149_v16 = vpop.f32.mrf.mxu1 }
 0x1b0   : > { %v3393_v26 = vadd.f32 %v5230_v51, %v3258_v19  ;;  %v1480_v24 = vpop.xlane.xlu1 %1479  ;;  %v2615_v42 = vmax.f32 %v2487_v4, 0.0  ;;  %v5409_v4 = vadd.f32 %v4053_v60, %v4905_v63  ;;  %v5422_v60 = vadd.f32 %v4149_v16, %v4905_v63 }
 0x1b1   : > { %3522 = vst [vmem:[%s5255_s6 + $0x38] sm:$0xff] %v3394_v17  ;;  %v2616_v37 = vmax.f32 %v2488_v27, 0.0  ;;  %v5400_v10 = vmul.f32 0.0078125, %v1480_v24  ;;  %v2998_v27 = vsub.f32 %v4994_v46, %v5316_v44  ;;  %v5416_v24 = vadd.f32 %v4905_v63, %v994_v25 }
 0x1b2   : > { %3521 = vst [vmem:[%s5255_s6 + $0x30] sm:$0xff] %v3393_v26  ;;  %v2743_v59 = vadd.f32 1e-05, %v2615_v42  ;;  %2033 = vadd.xlane.f32.xlu0 %v1871_v36  ;;  %v5411_v26 = vmul.f32 0.0078125, %v1478_v18  ;;  %8205 = vst [vmem:[#allocation55_spill] sm:$0xff] %v5422_v60 }
 0x1b3   : > { %v2744_v8 = vadd.f32 1e-05, %v2616_v37  ;;  %2035 = vadd.xlane.f32.xlu1 %v1872_v55  ;;  %v5404_v17 = vpop.xlane.xlu0 %1605  ;;  %v2997_v37 = vsub.f32 %v4997_v47, %v5327_v52  ;;  %v2362_v44 = vmul.f32 %v5400_v10, %v5400_v10 }
 0x1b4   : > { %v5402_v19 = vpop.xlane.xlu1 %1607  ;;  %8204 = vst [vmem:[#allocation54_spill] sm:$0xff] %v5404_v17  ;;  %v1314_v17 = vpop.f32.mrf.mxu1 }
 0x1b5   : > { %8203 = vst [vmem:[#allocation53_spill] sm:$0xff] %v5402_v19  ;;  %4254 = vrsqrt.f32 %v2744_v8  ;;  %v2361_v8 = vmul.f32 %v5411_v26, %v5411_v26  ;;  %v4056_v19 = vpop.f32.mrf.mxu0 }
 0x1b6   : > { %v4251_v42 = vpop.eup %4250  ;;  %4256 = vrsqrt.f32 %v2743_v59  ;;  %1525 = vadd.xlane.f32.xlu0 %v5416_v24 }
 0x1b7   : > { %v4253_v55 = vpop.eup %4252  ;;  %v3126_v36 = vmul.f32 %v4251_v42, %v2998_v27  ;;  %1527 = vadd.xlane.f32.xlu1 %v5409_v4  ;;  %v1990_v47 = vpop.xlane.xlu0 %1989  ;;  %v5430_v42 = vadd.f32 %v4905_v63, %v1314_v17  ;;  %v1874_v63 = vmul.f32 %v5409_v4, %v5409_v4  ;;  %v1873_v17 = vmul.f32 %v5416_v24, %v5416_v24 }
 0x1b8   : > { %v3125_v46 = vmul.f32 %v4253_v55, %v2997_v37  ;;  %v1992_v18 = vpop.xlane.xlu1 %1991  ;;  %v2233_v25 = vmul.f32 0.0078125, %v1990_v47 }
 0x1b9   : > { %v3261_v52 = vmul.f32 %v5221_v0, %v3126_v36  ;;  %v2234_v59 = vmul.f32 0.0078125, %v1992_v18  ;;  %8206 = vst [vmem:[#allocation56_spill] sm:$0xff] %v5430_v42 }
 0x1ba   : > { %v3260_v27 = vmul.f32 %v5221_v0, %v3125_v46  ;;  %v2489_v55 = vsub.f32 %v2233_v25, %v2361_v8  ;;  %1653 = vadd.xlane.f32.xlu0 %v5430_v42  ;;  %v4152_v8 = vpop.f32.mrf.mxu1 }
 0x1bb   : > { %v3396_v16 = vadd.f32 %v5230_v51, %v3261_v52  ;;  %v2490_v37 = vsub.f32 %v2234_v59, %v2362_v44  ;;  %1655 = vadd.xlane.f32.xlu1 %v5422_v60  ;;  %v1482_v18 = vpop.xlane.xlu0 %1481  ;;  %v1004_v52 = vpop.f32.mrf.mxu0 }
 0x1bc   : > { %v3395_v36 = vadd.f32 %v5230_v51, %v3260_v27  ;;  %v1484_v9 = vpop.xlane.xlu1 %1483  ;;  %v2617_v48 = vmax.f32 %v2489_v55, 0.0  ;;  %v5458_v55 = vmul.f32 0.0078125, %v1482_v18 }
 0x1bd   : > { %3524 = vst [vmem:[%s5255_s6 + $0x48] sm:$0xff] %v3396_v16  ;;  %v2618_v47 = vmax.f32 %v2490_v37, 0.0  ;;  %v5442_v59 = vmul.f32 0.0078125, %v1484_v9  ;;  %v3000_v16 = vsub.f32 %v5014_v56, %v5358_v28  ;;  %v5453_v37 = vld [vmem:[%s7860_s2] ss:$0 sm:$0xff] }
 0x1be   : > { %3523 = vst [vmem:[%s5255_s6 + $0x40] sm:$0xff] %v3395_v36  ;;  %v2745_v44 = vadd.f32 1e-05, %v2617_v48  ;;  %2037 = vadd.xlane.f32.xlu0 %v1873_v17  ;;  %v5456_v48 = vadd.f32 %v5453_v37, %v4056_v19  ;;  %v2999_v36 = vsub.f32 %v5017_v57, %v5369_v12  ;;  %v4059_v17 = vpop.f32.mrf.mxu0  ;;  %v5469_v18 = vadd.f32 %v5453_v37, %v4152_v8 }
 0x1bf   : > { %v2746_v46 = vadd.f32 1e-05, %v2618_v47  ;;  %2039 = vadd.xlane.f32.xlu1 %v1874_v63  ;;  %v5446_v27 = vpop.xlane.xlu0 %1609  ;;  %v5463_v47 = vadd.f32 %v5453_v37, %v1004_v52  ;;  %v1324_v63 = vpop.f32.mrf.mxu1  ;;  %v2364_v19 = vmul.f32 %v5442_v59, %v5442_v59  ;;  %v2363_v52 = vmul.f32 %v5458_v55, %v5458_v55 }
 0x1c0   : > { %v5444_v25 = vpop.xlane.xlu1 %1611  ;;  %8208 = vst [vmem:[#allocation58_spill] sm:$0xff] %v5446_v27  ;;  %8209 = vst [vmem:[#allocation59_spill] sm:$0xff] %v5456_v48  ;;  %v1014_v42 = vpop.f32.mrf.mxu0 }
 0x1c1   : > { %8207 = vst [vmem:[#allocation57_spill] sm:$0xff] %v5444_v25  ;;  %4258 = vrsqrt.f32 %v2746_v46  ;;  %8210 = vst [vmem:[#allocation60_spill] sm:$0xff] %v5463_v47 }
 0x1c2   : > { %v4255_v9 = vpop.eup %4254  ;;  %4260 = vrsqrt.f32 %v2745_v44  ;;  %8211 = vst [vmem:[#allocation61_spill] sm:$0xff] %v5469_v18  ;;  %1529 = vadd.xlane.f32.xlu0 %v5463_v47 }
 0x1c3   : > { %v4257_v56 = vpop.eup %4256  ;;  %v3128_v28 = vmul.f32 %v4255_v9, %v3000_v16  ;;  %1531 = vadd.xlane.f32.xlu1 %v5456_v48  ;;  %v1994_v12 = vpop.xlane.xlu0 %1993 }
 0x1c4   : > { %v3127_v46 = vmul.f32 %v4257_v56, %v2999_v36  ;;  %v1996_v57 = vpop.xlane.xlu1 %1995  ;;  %v2235_v9 = vmul.f32 0.0078125, %v1994_v12  ;;  %v5477_v56 = vadd.f32 %v5453_v37, %v1324_v63 }
 0x1c5   : > { %v3263_v44 = vmul.f32 %v5221_v0, %v3128_v28  ;;  %v2236_v16 = vmul.f32 0.0078125, %v1996_v57  ;;  %v4155_v28 = vpop.f32.mrf.mxu1 }
 0x1c6   : > { %v3262_v36 = vmul.f32 %v5221_v0, %v3127_v46  ;;  %8212 = vst [vmem:[#allocation62_spill] sm:$0xff] %v5477_v56  ;;  %v2491_v25 = vsub.f32 %v2235_v9, %v2363_v52  ;;  %1657 = vadd.xlane.f32.xlu0 %v5477_v56  ;;  %v5485_v46 = vadd.f32 %v5453_v37, %v4059_v17  ;;  %v4062_v9 = vpop.f32.mrf.mxu0 }
 0x1c7   : > { %v3398_v8 = vadd.f32 %v5230_v51, %v3263_v44  ;;  %v2492_v27 = vsub.f32 %v2236_v16, %v2364_v19  ;;  %1659 = vadd.xlane.f32.xlu1 %v5469_v18  ;;  %v1486_v12 = vpop.xlane.xlu0 %1485  ;;  %v5489_v19 = vadd.f32 %v5453_v37, %v1014_v42  ;;  %v1334_v16 = vpop.f32.mrf.mxu1  ;;  %v5502_v42 = vadd.f32 %v5453_v37, %v4155_v28 }
 0x1c8   : > { %v3397_v60 = vadd.f32 %v5230_v51, %v3262_v36  ;;  %v1488_v57 = vpop.xlane.xlu1 %1487  ;;  %8213 = vst [vmem:[#allocation63_spill] sm:$0xff] %v5485_v46  ;;  %v2619_v50 = vmax.f32 %v2491_v25, 0.0 }
 0x1c9   : > { %3526 = vst [vmem:[%s5255_s6 + $0x58] sm:$0xff] %v3398_v8  ;;  %v2620_v63 = vmax.f32 %v2492_v27, 0.0  ;;  %8214 = vst [vmem:[#allocation64_spill] sm:$0xff] %v5489_v19  ;;  %v5492_v36 = vmul.f32 0.0078125, %v1488_v57  ;;  %v3001_v27 = vsub.f32 %v5037_v6, %v5411_v26  ;;  %v5509_v57 = vadd.f32 %v5453_v37, %v1334_v16 }
 0x1ca   : > { %3525 = vst [vmem:[%s5255_s6 + $0x50] sm:$0xff] %v3397_v60  ;;  %v2747_v52 = vadd.f32 1e-05, %v2619_v50  ;;  %1533 = vadd.xlane.f32.xlu0 %v5489_v19  ;;  %v3002_v60 = vsub.f32 %v5034_v3, %v5400_v10  ;;  %8217 = vst [vmem:[#allocation67_spill] sm:$0xff] %v5502_v42  ;;  %v5504_v50 = vmul.f32 0.0078125, %v1486_v12  ;;  %v4158_v3 = vpop.f32.mrf.mxu1  ;;  %v5515_v12 = vadd.f32 %v5453_v37, %v4062_v9 }
 0x1cb   : > { %v2748_v44 = vadd.f32 1e-05, %v2620_v63  ;;  %1535 = vadd.xlane.f32.xlu1 %v5485_v46  ;;  %v5497_v17 = vpop.xlane.xlu0 %1613  ;;  %8218 = vst [vmem:[#allocation68_spill] sm:$0xff] %v5509_v57  ;;  %v2366_v28 = vmul.f32 %v5492_v36, %v5492_v36 }
 0x1cc   : > { %v5495_v8 = vpop.xlane.xlu1 %1615  ;;  %8216 = vst [vmem:[#allocation66_spill] sm:$0xff] %v5497_v17  ;;  %v1024_v17 = vpop.f32.mrf.mxu0  ;;  %8219 = vst [vmem:[#allocation69_spill] sm:$0xff] %v5515_v12 }
 0x1cd   : > { %8215 = vst [vmem:[#allocation65_spill] sm:$0xff] %v5495_v8  ;;  %4262 = vrsqrt.f32 %v2748_v44 }
 0x1ce   : > { %v4259_v25 = vpop.eup %4258  ;;  %4264 = vrsqrt.f32 %v2747_v52  ;;  %1661 = vadd.xlane.f32.xlu0 %v5509_v57  ;;  %v2365_v52 = vmul.f32 %v5504_v50, %v5504_v50 }
 0x1cf   : > { %v4261_v63 = vpop.eup %4260  ;;  %v3130_v8 = vmul.f32 %v4259_v25, %v3002_v60  ;;  %1663 = vadd.xlane.f32.xlu1 %v5502_v42  ;;  %v1998_v26 = vpop.xlane.xlu0 %1997 }
 0x1d0   : > { %v3129_v10 = vmul.f32 %v4261_v63, %v3001_v27  ;;  %v2000_v6 = vpop.xlane.xlu1 %1999  ;;  %v2237_v60 = vmul.f32 0.0078125, %v1998_v26  ;;  %v5523_v27 = vadd.f32 %v5453_v37, %v1024_v17  ;;  %v1344_v42 = vpop.f32.mrf.mxu1 }
 0x1d1   : > { %v3265_v44 = vmul.f32 %v5221_v0, %v3130_v8  ;;  %v2238_v16 = vmul.f32 0.0078125, %v2000_v6  ;;  %v4065_v8 = vpop.f32.mrf.mxu0 }
 0x1d2   : > { %v3264_v25 = vmul.f32 %v5221_v0, %v3129_v10  ;;  %8220 = vst [vmem:[#allocation70_spill] sm:$0xff] %v5523_v27  ;;  %v2493_v57 = vsub.f32 %v2237_v60, %v2365_v52  ;;  %1537 = vadd.xlane.f32.xlu0 %v5523_v27  ;;  %v5531_v10 = vadd.f32 %v5453_v37, %v4158_v3  ;;  %v4161_v60 = vpop.f32.mrf.mxu1 }
 0x1d3   : > { %v3400_v9 = vadd.f32 %v5230_v51, %v3265_v44  ;;  %v2494_v63 = vsub.f32 %v2238_v16, %v2366_v28  ;;  %1539 = vadd.xlane.f32.xlu1 %v5515_v12  ;;  %v1490_v26 = vpop.xlane.xlu0 %1489  ;;  %v5535_v28 = vadd.f32 %v5453_v37, %v1344_v42  ;;  %v1034_v16 = vpop.f32.mrf.mxu0  ;;  %v5548_v42 = vadd.f32 %v5453_v37, %v4065_v8 }
 0x1d4   : > { %v3399_v56 = vadd.f32 %v5230_v51, %v3264_v25  ;;  %v1492_v6 = vpop.xlane.xlu1 %1491  ;;  %8221 = vst [vmem:[#allocation71_spill] sm:$0xff] %v5531_v10  ;;  %v2621_v18 = vmax.f32 %v2493_v57, 0.0 }
 0x1d5   : > { %3528 = vst [vmem:[%s5255_s6 + $0x68] sm:$0xff] %v3400_v9  ;;  %v2622_v17 = vmax.f32 %v2494_v63, 0.0  ;;  %8222 = vst [vmem:[#allocation72_spill] sm:$0xff] %v5535_v28  ;;  %v5538_v25 = vmul.f32 0.0078125, %v1492_v6  ;;  %v3003_v63 = vsub.f32 %v5057_v22, %v5458_v55  ;;  %v5555_v6 = vadd.f32 %v5453_v37, %v1034_v16 }
 0x1d6   : > { %3527 = vst [vmem:[%s5255_s6 + $0x60] sm:$0xff] %v3399_v56  ;;  %v2749_v52 = vadd.f32 1e-05, %v2621_v18  ;;  %1665 = vadd.xlane.f32.xlu0 %v5535_v28  ;;  %v3004_v56 = vsub.f32 %v5054_v21, %v5442_v59  ;;  %8225 = vst [vmem:[#allocation75_spill] sm:$0xff] %v5548_v42  ;;  %v5550_v18 = vmul.f32 0.0078125, %v1490_v26  ;;  %v4068_v21 = vpop.f32.mrf.mxu0  ;;  %v5561_v26 = vadd.f32 %v5453_v37, %v4161_v60 }
 0x1d7   : > { %v2750_v44 = vadd.f32 1e-05, %v2622_v17  ;;  %1667 = vadd.xlane.f32.xlu1 %v5531_v10  ;;  %v5543_v3 = vpop.xlane.xlu0 %1617  ;;  %8226 = vst [vmem:[#allocation76_spill] sm:$0xff] %v5555_v6  ;;  %v2368_v8 = vmul.f32 %v5538_v25, %v5538_v25 }
 0x1d8   : > { %v5541_v9 = vpop.xlane.xlu1 %1619  ;;  %8224 = vst [vmem:[#allocation74_spill] sm:$0xff] %v5543_v3  ;;  %v1354_v3 = vpop.f32.mrf.mxu1  ;;  %8227 = vst [vmem:[#allocation77_spill] sm:$0xff] %v5561_v26 }
 0x1d9   : > { %8223 = vst [vmem:[#allocation73_spill] sm:$0xff] %v5541_v9  ;;  %4266 = vrsqrt.f32 %v2750_v44  ;;  %v1044_v10 = vpop.f32.mrf.mxu0 }
 0x1da   : > { %v4263_v57 = vpop.eup %4262  ;;  %4268 = vrsqrt.f32 %v2749_v52  ;;  %1541 = vadd.xlane.f32.xlu0 %v5555_v6  ;;  %v2367_v52 = vmul.f32 %v5550_v18, %v5550_v18 }
 0x1db   : > { %v4265_v17 = vpop.eup %4264  ;;  %v3132_v9 = vmul.f32 %v4263_v57, %v3004_v56  ;;  %1543 = vadd.xlane.f32.xlu1 %v5548_v42  ;;  %v2002_v55 = vpop.xlane.xlu0 %2001 }
 0x1dc   : > { %v3131_v59 = vmul.f32 %v4265_v17, %v3003_v63  ;;  %v2004_v22 = vpop.xlane.xlu1 %2003  ;;  %v2239_v56 = vmul.f32 0.0078125, %v2002_v55  ;;  %v5569_v63 = vadd.f32 %v5453_v37, %v1354_v3 }
 0x1dd   : > { %v3267_v44 = vmul.f32 %v5221_v0, %v3132_v9  ;;  %v2240_v16 = vmul.f32 0.0078125, %v2004_v22  ;;  %v4164_v9 = vpop.f32.mrf.mxu1 }
 0x1de   : > { %v3266_v57 = vmul.f32 %v5221_v0, %v3131_v59  ;;  %8228 = vst [vmem:[#allocation78_spill] sm:$0xff] %v5569_v63  ;;  %v2495_v28 = vsub.f32 %v2239_v56, %v2367_v52  ;;  %1669 = vadd.xlane.f32.xlu0 %v5569_v63  ;;  %v5577_v59 = vadd.f32 %v5453_v37, %v4068_v21  ;;  %v4071_v56 = vpop.f32.mrf.mxu0 }
 0x1df   : > { %v3402_v60 = vadd.f32 %v5230_v51, %v3267_v44  ;;  %v2496_v17 = vsub.f32 %v2240_v16, %v2368_v8  ;;  %1671 = vadd.xlane.f32.xlu1 %v5561_v26  ;;  %v1494_v55 = vpop.xlane.xlu0 %1493  ;;  %v5581_v8 = vadd.f32 %v5453_v37, %v1044_v10  ;;  %v1364_v16 = vpop.f32.mrf.mxu1  ;;  %v5594_v10 = vadd.f32 %v5453_v37, %v4164_v9 }
 0x1e0   : > { %v3401_v49 = vadd.f32 %v5230_v51, %v3266_v57  ;;  %v1496_v22 = vpop.xlane.xlu1 %1495  ;;  %8229 = vst [vmem:[#allocation79_spill] sm:$0xff] %v5577_v59  ;;  %v2623_v40 = vmax.f32 %v2495_v28, 0.0 }
 0x1e1   : > { %3530 = vst [vmem:[%s5255_s6 + $0x78] sm:$0xff] %v3402_v60  ;;  %v2624_v3 = vmax.f32 %v2496_v17, 0.0  ;;  %8230 = vst [vmem:[#allocation80_spill] sm:$0xff] %v5581_v8  ;;  %v5584_v57 = vmul.f32 0.0078125, %v1496_v22  ;;  %v3005_v17 = vsub.f32 %v5077_v38, %v5504_v50  ;;  %v5601_v22 = vadd.f32 %v5453_v37, %v1364_v16 }
 0x1e2   : > { %3529 = vst [vmem:[%s5255_s6 + $0x70] sm:$0xff] %v3401_v49  ;;  %v2751_v52 = vadd.f32 1e-05, %v2623_v40  ;;  %1545 = vadd.xlane.f32.xlu0 %v5581_v8  ;;  %v3006_v49 = vsub.f32 %v5074_v35, %v5492_v36  ;;  %8233 = vst [vmem:[#allocation83_spill] sm:$0xff] %v5594_v10  ;;  %v5596_v40 = vmul.f32 0.0078125, %v1494_v55  ;;  %v4167_v35 = vpop.f32.mrf.mxu1  ;;  %v5607_v55 = vadd.f32 %v5453_v37, %v4071_v56 }
 0x1e3   : > { %v2752_v44 = vadd.f32 1e-05, %v2624_v3  ;;  %1547 = vadd.xlane.f32.xlu1 %v5577_v59  ;;  %v5589_v21 = vpop.xlane.xlu0 %1621  ;;  %8234 = vst [vmem:[#allocation84_spill] sm:$0xff] %v5601_v22  ;;  %v2370_v9 = vmul.f32 %v5584_v57, %v5584_v57 }
 0x1e4   : > { %v5587_v60 = vpop.xlane.xlu1 %1623  ;;  %8232 = vst [vmem:[#allocation82_spill] sm:$0xff] %v5589_v21  ;;  %v1054_v21 = vpop.f32.mrf.mxu0  ;;  %8235 = vst [vmem:[#allocation85_spill] sm:$0xff] %v5607_v55 }
 0x1e5   : > { %8231 = vst [vmem:[#allocation81_spill] sm:$0xff] %v5587_v60  ;;  %4270 = vrsqrt.f32 %v2752_v44 }
 0x1e6   : > { %v4267_v28 = vpop.eup %4266  ;;  %4272 = vrsqrt.f32 %v2751_v52  ;;  %1673 = vadd.xlane.f32.xlu0 %v5601_v22  ;;  %v2369_v52 = vmul.f32 %v5596_v40, %v5596_v40 }
 0x1e7   : > { %v4269_v3 = vpop.eup %4268  ;;  %v3134_v60 = vmul.f32 %v4267_v28, %v3006_v49  ;;  %1675 = vadd.xlane.f32.xlu1 %v5594_v10  ;;  %v2006_v50 = vpop.xlane.xlu0 %2005 }
 0x1e8   : > { %v3133_v36 = vmul.f32 %v4269_v3, %v3005_v17  ;;  %v2008_v38 = vpop.xlane.xlu1 %2007  ;;  %v2241_v49 = vmul.f32 0.0078125, %v2006_v50  ;;  %v5615_v17 = vadd.f32 %v5453_v37, %v1054_v21  ;;  %v1374_v10 = vpop.f32.mrf.mxu1 }
 0x1e9   : > { %v3269_v44 = vmul.f32 %v5221_v0, %v3134_v60  ;;  %v2242_v16 = vmul.f32 0.0078125, %v2008_v38  ;;  %v4074_v60 = vpop.f32.mrf.mxu0 }
 0x1ea   : > { %v3268_v28 = vmul.f32 %v5221_v0, %v3133_v36  ;;  %8236 = vst [vmem:[#allocation86_spill] sm:$0xff] %v5615_v17  ;;  %v2497_v22 = vsub.f32 %v2241_v49, %v2369_v52  ;;  %1549 = vadd.xlane.f32.xlu0 %v5615_v17  ;;  %v5623_v36 = vadd.f32 %v5453_v37, %v4167_v35  ;;  %v4170_v49 = vpop.f32.mrf.mxu1 }
 0x1eb   : > { %v3404_v56 = vadd.f32 %v5230_v51, %v3269_v44  ;;  %v2498_v3 = vsub.f32 %v2242_v16, %v2370_v9  ;;  %1551 = vadd.xlane.f32.xlu1 %v5607_v55  ;;  %v1498_v50 = vpop.xlane.xlu0 %1497  ;;  %v5627_v9 = vadd.f32 %v5453_v37, %v1374_v10  ;;  %v1064_v16 = vpop.f32.mrf.mxu0  ;;  %v3008_v35 = vsub.f32 %v5094_v53, %v5538_v25 }
 0x1ec   : > { %v3403_v63 = vadd.f32 %v5230_v51, %v3268_v28  ;;  %v1500_v38 = vpop.xlane.xlu1 %1499  ;;  %8237 = vst [vmem:[#allocation87_spill] sm:$0xff] %v5623_v36  ;;  %v2625_v26 = vmax.f32 %v2497_v22, 0.0  ;;  %v3007_v22 = vsub.f32 %v5097_v54, %v5550_v18  ;;  %v5655_v18 = vadd.f32 %v5453_v37, %v4170_v49 }
 0x1ed   : > { %3532 = vst [vmem:[%s5255_s6 + $0x88] sm:$0xff] %v3404_v56  ;;  %v2626_v21 = vmax.f32 %v2498_v3, 0.0  ;;  %8238 = vst [vmem:[#allocation88_spill] sm:$0xff] %v5627_v9  ;;  %v5640_v10 = vmul.f32 0.0078125, %v1500_v38  ;;  %v5644_v3 = vmul.f32 0.0078125, %v1498_v50  ;;  %v4077_v53 = vpop.f32.mrf.mxu0 }
 0x1ee   : > { %3531 = vst [vmem:[%s5255_s6 + $0x80] sm:$0xff] %v3403_v63  ;;  %v2753_v52 = vadd.f32 1e-05, %v2625_v26  ;;  %1677 = vadd.xlane.f32.xlu0 %v5627_v9  ;;  %v5638_v63 = vadd.f32 %v5453_v37, %v4074_v60  ;;  %v1384_v9 = vpop.f32.mrf.mxu1  ;;  %8243 = vst [vmem:[#allocation93_spill] sm:$0xff] %v5655_v18 }
 0x1ef   : > { %v2754_v44 = vadd.f32 1e-05, %v2626_v21  ;;  %1679 = vadd.xlane.f32.xlu1 %v5623_v36  ;;  %v5633_v56 = vpop.xlane.xlu0 %1625  ;;  %v5647_v21 = vadd.f32 %v5453_v37, %v1064_v16  ;;  %v2372_v54 = vmul.f32 %v5640_v10, %v5640_v10  ;;  %v2371_v16 = vmul.f32 %v5644_v3, %v5644_v3 }
 0x1f0   : > { %v5631_v28 = vpop.xlane.xlu1 %1627  ;;  %8240 = vst [vmem:[#allocation90_spill] sm:$0xff] %v5633_v56  ;;  %8241 = vst [vmem:[#allocation91_spill] sm:$0xff] %v5638_v63  ;;  %v4173_v49 = vpop.f32.mrf.mxu1 }
 0x1f1   : > { %8239 = vst [vmem:[#allocation89_spill] sm:$0xff] %v5631_v28  ;;  %4274 = vrsqrt.f32 %v2754_v44  ;;  %8242 = vst [vmem:[#allocation92_spill] sm:$0xff] %v5647_v21 }
 0x1f2   : > { %v4271_v26 = vpop.eup %4270  ;;  %4276 = vrsqrt.f32 %v2753_v52  ;;  %1553 = vadd.xlane.f32.xlu0 %v5647_v21 }
 0x1f3   : > { %v4273_v56 = vpop.eup %4272  ;;  %v3136_v28 = vmul.f32 %v4271_v26, %v3008_v35  ;;  %1555 = vadd.xlane.f32.xlu1 %v5638_v63  ;;  %v2010_v44 = vpop.xlane.xlu0 %2009 }
 0x1f4   : > { %v3135_v25 = vmul.f32 %v4273_v56, %v3007_v22  ;;  %v2012_v60 = vpop.xlane.xlu1 %2011  ;;  %v5661_v56 = vadd.f32 %v5453_v37, %v1384_v9  ;;  %v2243_v35 = vmul.f32 0.0078125, %v2010_v44  ;;  %v1074_v22 = vpop.f32.mrf.mxu0 }
 0x1f5   : > { %v3271_v38 = vmul.f32 %v5221_v0, %v3136_v28  ;;  %v2244_v50 = vmul.f32 0.0078125, %v2012_v60 }
 0x1f6   : > { %v3270_v52 = vmul.f32 %v5221_v0, %v3135_v25  ;;  %8244 = vst [vmem:[#allocation94_spill] sm:$0xff] %v5661_v56  ;;  %v2499_v36 = vsub.f32 %v2243_v35, %v2371_v16  ;;  %1681 = vadd.xlane.f32.xlu0 %v5661_v56  ;;  %v5669_v25 = vadd.f32 %v5453_v37, %v4077_v53 }
 0x1f7   : > { %v3406_v28 = vadd.f32 %v5230_v51, %v3271_v38  ;;  %v2500_v26 = vsub.f32 %v2244_v50, %v2372_v54  ;;  %1683 = vadd.xlane.f32.xlu1 %v5655_v18  ;;  %v1502_v39 = vpop.xlane.xlu0 %1501  ;;  %v5673_v38 = vadd.f32 %v5453_v37, %v1074_v22  ;;  %v1394_v50 = vpop.f32.mrf.mxu1  ;;  %v3010_v53 = vsub.f32 %v5114_v11, %v5584_v57 }
 0x1f8   : > { %v3405_v60 = vadd.f32 %v5230_v51, %v3270_v52  ;;  %v1504_v0 = vpop.xlane.xlu1 %1503  ;;  %8245 = vst [vmem:[#allocation95_spill] sm:$0xff] %v5669_v25  ;;  %v2627_v44 = vmax.f32 %v2499_v36, 0.0  ;;  %v4080_v51 = vpop.f32.mrf.mxu0  ;;  %v5682_v35 = vadd.f32 %v5453_v37, %v4173_v49  ;;  %v3009_v22 = vsub.f32 %v5117_v14, %v5596_v40  ;;  %v5700_v14 = vld [vmem:[%s7861_s3] ss:$0 sm:$0xff] }
 0x1f9   : > { %3534 = vst [vmem:[%s5255_s6 + $0x98] sm:$0xff] %v3406_v28  ;;  %v2628_v9 = vmax.f32 %v2500_v26, 0.0  ;;  %8246 = vst [vmem:[#allocation96_spill] sm:$0xff] %v5673_v38  ;;  %v5684_v36 = vmul.f32 0.0078125, %v1504_v0  ;;  %v4176_v49 = vpop.f32.mrf.mxu1 }
 0x1fa   : > { %3533 = vst [vmem:[%s5255_s6 + $0x90] sm:$0xff] %v3405_v60  ;;  %v2755_v52 = vadd.f32 1e-05, %v2627_v44  ;;  %1557 = vadd.xlane.f32.xlu0 %v5673_v38  ;;  %8248 = vst [vmem:[#allocation98_spill] sm:$0xff] %v5682_v35  ;;  %v5690_v60 = vmul.f32 0.0078125, %v1502_v39  ;;  %v1084_v57 = vpop.f32.mrf.mxu0 }
 0x1fb   : > { %v2756_v54 = vadd.f32 1e-05, %v2628_v9  ;;  %1559 = vadd.xlane.f32.xlu1 %v5669_v25  ;;  %v5686_v28 = vpop.xlane.xlu0 %1629  ;;  %v5693_v9 = vadd.f32 %v5453_v37, %v1394_v50  ;;  %v2374_v40 = vmul.f32 %v5684_v36, %v5684_v36  ;;  %v5706_v50 = vadd.f32 %v5453_v37, %v4080_v51 }
 0x1fc   : > { %v5677_v16 = vpop.xlane.xlu1 %1631  ;;  %8249 = vst [vmem:[#allocation99_spill] sm:$0xff] %v5686_v28 }
 0x1fd   : > { %8247 = vst [vmem:[#allocation97_spill] sm:$0xff] %v5677_v16  ;;  %4278 = vrsqrt.f32 %v2756_v54  ;;  %8250 = vst [vmem:[#allocation100_spill] sm:$0xff] %v5693_v9  ;;  %v1404_v16 = vpop.f32.mrf.mxu1 }
 0x1fe   : > { %v4275_v26 = vpop.eup %4274  ;;  %4280 = vrsqrt.f32 %v2755_v52  ;;  %1685 = vadd.xlane.f32.xlu0 %v5693_v9  ;;  %8251 = vst [vmem:[#allocation101_spill] sm:$0xff] %v5706_v50 }
 0x1ff   : > { %v4277_v44 = vpop.eup %4276  ;;  %v3138_v11 = vmul.f32 %v4275_v26, %v3010_v53  ;;  %1687 = vadd.xlane.f32.xlu1 %v5682_v35  ;;  %v2014_v53 = vpop.xlane.xlu0 %2013 }
 0x200   : > { %v3137_v0 = vmul.f32 %v4277_v44, %v3009_v22  ;;  %v2016_v54 = vpop.xlane.xlu1 %2015  ;;  %v2373_v22 = vmul.f32 %v5690_v60, %v5690_v60  ;;  %v5712_v44 = vadd.f32 %v5453_v37, %v1084_v57  ;;  %v2245_v28 = vmul.f32 0.0078125, %v2014_v53 }
 0x201   : > { %v3273_v39 = vmul.f32 %v5700_v14, %v3138_v11  ;;  %v2246_v52 = vmul.f32 0.0078125, %v2016_v54  ;;  %v5717_v11 = vld [vmem:[%s7862_s4] ss:$0 sm:$0xff]  ;;  %v5725_v53 = vadd.f32 %v5453_v37, %v4176_v49  ;;  %v3012_v49 = vsub.f32 %v5134_v34, %v5640_v10 }
 0x202   : > { %v3272_v26 = vmul.f32 %v5700_v14, %v3137_v0  ;;  %8252 = vst [vmem:[#allocation102_spill] sm:$0xff] %v5712_v44  ;;  %v4083_v0 = vpop.f32.mrf.mxu0  ;;  %v2501_v35 = vsub.f32 %v2245_v28, %v2373_v22  ;;  %1561 = vadd.xlane.f32.xlu0 %v5712_v44 }
 0x203   : > { %v3408_v51 = vadd.f32 %v5717_v11, %v3273_v39  ;;  %v2502_v54 = vsub.f32 %v2246_v52, %v2374_v40  ;;  %1563 = vadd.xlane.f32.xlu1 %v5706_v50  ;;  %8253 = vst [vmem:[#allocation103_spill] sm:$0xff] %v5725_v53  ;;  %v1506_v18 = vpop.xlane.xlu0 %1505  ;;  %v5729_v39 = vadd.f32 %v5453_v37, %v1404_v16 }
 0x204   : > { %v3407_v9 = vadd.f32 %v5717_v11, %v3272_v26  ;;  %v1508_v57 = vpop.xlane.xlu1 %1507  ;;  %v2629_v30 = vmax.f32 %v2501_v35, 0.0  ;;  %v1094_v52 = vpop.f32.mrf.mxu0 }
 0x205   : > { %3536 = vst [vmem:[%s5255_s6 + $0xa8] sm:$0xff] %v3408_v51  ;;  %v2630_v56 = vmax.f32 %v2502_v54, 0.0  ;;  %8254 = vst [vmem:[#allocation104_spill] sm:$0xff] %v5729_v39  ;;  %v4179_v26 = vpop.f32.mrf.mxu1  ;;  %v5740_v35 = vmul.f32 0.0078125, %v1508_v57  ;;  %v3011_v51 = vsub.f32 %v5137_v41, %v5644_v3  ;;  %v5749_v54 = vadd.f32 %v5453_v37, %v1094_v52 }
 0x206   : > { %3535 = vst [vmem:[%s5255_s6 + $0xa0] sm:$0xff] %v3407_v9  ;;  %v2757_v28 = vadd.f32 1e-05, %v2629_v30  ;;  %1689 = vadd.xlane.f32.xlu0 %v5729_v39  ;;  %v5738_v9 = vadd.f32 %v5453_v37, %v4083_v0  ;;  %v5746_v30 = vmul.f32 0.0078125, %v1506_v18  ;;  %v4086_v0 = vpop.f32.mrf.mxu0  ;;  %v5757_v3 = vadd.f32 %v5453_v37, %v4179_v26 }
 0x207   : > { %v2758_v40 = vadd.f32 1e-05, %v2630_v56  ;;  %1691 = vadd.xlane.f32.xlu1 %v5725_v53  ;;  %v5742_v16 = vpop.xlane.xlu0 %1633  ;;  %8258 = vst [vmem:[#allocation108_spill] sm:$0xff] %v5749_v54  ;;  %v1414_v10 = vpop.f32.mrf.mxu1  ;;  %v2376_v41 = vmul.f32 %v5740_v35, %v5740_v35  ;;  %v5771_v29 = vadd.f32 %v5453_v37, %v4086_v0  ;;  %v3014_v0 = vsub.f32 %v5160_v31, %v5684_v36 }
 0x208   : > { %v5733_v22 = vpop.xlane.xlu1 %1635  ;;  %8256 = vst [vmem:[#allocation106_spill] sm:$0xff] %v5738_v9  ;;  %8257 = vst [vmem:[#allocation107_spill] sm:$0xff] %v5742_v16  ;;  %v1104_v39 = vpop.f32.mrf.mxu0 }
 0x209   : > { %8255 = vst [vmem:[#allocation105_spill] sm:$0xff] %v5733_v22  ;;  %4282 = vrsqrt.f32 %v2758_v40  ;;  %8259 = vst [vmem:[#allocation109_spill] sm:$0xff] %v5757_v3  ;;  %v4182_v26 = vpop.f32.mrf.mxu1 }
 0x20a   : > { %v4279_v56 = vpop.eup %4278  ;;  %4284 = vrsqrt.f32 %v2757_v28  ;;  %1565 = vadd.xlane.f32.xlu0 %v5749_v54  ;;  %8261 = vst [vmem:[#allocation111_spill] sm:$0xff] %v5771_v29 }
 0x20b   : > { %v4281_v22 = vpop.eup %4280  ;;  %v3140_v34 = vmul.f32 %v4279_v56, %v3012_v49  ;;  %1567 = vadd.xlane.f32.xlu1 %v5738_v9  ;;  %v2018_v52 = vpop.xlane.xlu0 %2017  ;;  %v2375_v49 = vmul.f32 %v5746_v30, %v5746_v30 }
 0x20c   : > { %v3139_v57 = vmul.f32 %v4281_v22, %v3011_v51  ;;  %v2020_v40 = vpop.xlane.xlu1 %2019  ;;  %v5763_v22 = vadd.f32 %v5453_v37, %v1414_v10  ;;  %v2247_v56 = vmul.f32 0.0078125, %v2018_v52 }
 0x20d   : > { %v3275_v16 = vmul.f32 %v5700_v14, %v3140_v34  ;;  %v2248_v18 = vmul.f32 0.0078125, %v2020_v40 }
 0x20e   : > { %v3274_v28 = vmul.f32 %v5700_v14, %v3139_v57  ;;  %8260 = vst [vmem:[#allocation110_spill] sm:$0xff] %v5763_v22  ;;  %v2503_v53 = vsub.f32 %v2247_v56, %v2375_v49  ;;  %1693 = vadd.xlane.f32.xlu0 %v5763_v22 }
 0x20f   : > { %v3410_v51 = vadd.f32 %v5717_v11, %v3275_v16  ;;  %v2504_v34 = vsub.f32 %v2248_v18, %v2376_v41  ;;  %1695 = vadd.xlane.f32.xlu1 %v5757_v3  ;;  %v1510_v20 = vpop.xlane.xlu0 %1509  ;;  %v5775_v16 = vadd.f32 %v5453_v37, %v1104_v39  ;;  %v1424_v18 = vpop.f32.mrf.mxu1 }
 0x210   : > { %v3409_v40 = vadd.f32 %v5717_v11, %v3274_v28  ;;  %v1512_v57 = vpop.xlane.xlu1 %1511  ;;  %v2631_v52 = vmax.f32 %v2503_v53, 0.0  ;;  %v4089_v28 = vpop.f32.mrf.mxu0 }
 0x211   : > { %3538 = vst [vmem:[%s5255_s6 + $0xb8] sm:$0xff] %v3410_v51  ;;  %v2632_v10 = vmax.f32 %v2504_v34, 0.0  ;;  %8262 = vst [vmem:[#allocation112_spill] sm:$0xff] %v5775_v16  ;;  %v5784_v51 = vadd.f32 %v5453_v37, %v4182_v26  ;;  %v5786_v53 = vmul.f32 0.0078125, %v1512_v57  ;;  %v4185_v26 = vpop.f32.mrf.mxu1 }
 0x212   : > { %3537 = vst [vmem:[%s5255_s6 + $0xb0] sm:$0xff] %v3409_v40  ;;  %v2759_v49 = vadd.f32 1e-05, %v2631_v52  ;;  %1569 = vadd.xlane.f32.xlu0 %v5775_v16  ;;  %v3013_v40 = vsub.f32 %v5163_v33, %v5690_v60  ;;  %v5795_v52 = vadd.f32 %v5453_v37, %v1424_v18  ;;  %v1114_v36 = vpop.f32.mrf.mxu0  ;;  %v5817_v22 = vadd.f32 %v5453_v37, %v4185_v26 }
 0x213   : > { %v2760_v41 = vadd.f32 1e-05, %v2632_v10  ;;  %1571 = vadd.xlane.f32.xlu1 %v5771_v29  ;;  %8264 = vst [vmem:[#allocation114_spill] sm:$0xff] %v5784_v51  ;;  %v5788_v39 = vpop.xlane.xlu0 %1637  ;;  %v5792_v10 = vmul.f32 0.0078125, %v1510_v20  ;;  %v2378_v33 = vmul.f32 %v5786_v53, %v5786_v53  ;;  %v5803_v20 = vadd.f32 %v5453_v37, %v4089_v28 }
 0x214   : > { %v5779_v56 = vpop.xlane.xlu1 %1639  ;;  %8265 = vst [vmem:[#allocation115_spill] sm:$0xff] %v5788_v39  ;;  %8266 = vst [vmem:[#allocation116_spill] sm:$0xff] %v5795_v52  ;;  %v4092_v28 = vpop.f32.mrf.mxu0  ;;  %v3016_v26 = vsub.f32 %v5192_v2, %v5740_v35 }
 0x215   : > { %8263 = vst [vmem:[#allocation113_spill] sm:$0xff] %v5779_v56  ;;  %4286 = vrsqrt.f32 %v2760_v41  ;;  %8267 = vst [vmem:[#allocation117_spill] sm:$0xff] %v5803_v20 }
 0x216   : > { %v4283_v34 = vpop.eup %4282  ;;  %4288 = vrsqrt.f32 %v2759_v49  ;;  %1697 = vadd.xlane.f32.xlu0 %v5795_v52  ;;  %v1434_v52 = vpop.f32.mrf.mxu1  ;;  %8269 = vst [vmem:[#allocation119_spill] sm:$0xff] %v5817_v22 }
 0x217   : > { %v4285_v56 = vpop.eup %4284  ;;  %v3142_v31 = vmul.f32 %v4283_v34, %v3014_v0  ;;  %1699 = vadd.xlane.f32.xlu1 %v5784_v51  ;;  %v2022_v18 = vpop.xlane.xlu0 %2021  ;;  %v2377_v0 = vmul.f32 %v5792_v10, %v5792_v10 }
 0x218   : > { %v3141_v57 = vmul.f32 %v4285_v56, %v3013_v40  ;;  %v2024_v41 = vpop.xlane.xlu1 %2023  ;;  %v5809_v56 = vadd.f32 %v5453_v37, %v1114_v36  ;;  %v2249_v34 = vmul.f32 0.0078125, %v2022_v18 }
 0x219   : > { %v3277_v39 = vmul.f32 %v5700_v14, %v3142_v31  ;;  %v2250_v60 = vmul.f32 0.0078125, %v2024_v41 }
 0x21a   : > { %v3276_v49 = vmul.f32 %v5700_v14, %v3141_v57  ;;  %8268 = vst [vmem:[#allocation118_spill] sm:$0xff] %v5809_v56  ;;  %v2505_v51 = vsub.f32 %v2249_v34, %v2377_v0  ;;  %1573 = vadd.xlane.f32.xlu0 %v5809_v56 }
 0x21b   : > { %v3412_v40 = vadd.f32 %v5717_v11, %v3277_v39  ;;  %v2506_v31 = vsub.f32 %v2250_v60, %v2378_v33  ;;  %1575 = vadd.xlane.f32.xlu1 %v5803_v20  ;;  %v1514_v3 = vpop.xlane.xlu0 %1513  ;;  %v5821_v39 = vadd.f32 %v5453_v37, %v1434_v52  ;;  %v1124_v60 = vpop.f32.mrf.mxu0 }
 0x21c   : > { %v3411_v41 = vadd.f32 %v5717_v11, %v3276_v49  ;;  %v1516_v57 = vpop.xlane.xlu1 %1515  ;;  %v2633_v18 = vmax.f32 %v2505_v51, 0.0  ;;  %v4188_v49 = vpop.f32.mrf.mxu1 }
 0x21d   : > { %3540 = vst [vmem:[%s5255_s6 + $0xc8] sm:$0xff] %v3412_v40  ;;  %v2634_v36 = vmax.f32 %v2506_v31, 0.0  ;;  %8270 = vst [vmem:[#allocation120_spill] sm:$0xff] %v5821_v39  ;;  %v5830_v40 = vadd.f32 %v5453_v37, %v4092_v28  ;;  %v5832_v51 = vmul.f32 0.0078125, %v1516_v57 }
 0x21e   : > { %3539 = vst [vmem:[%s5255_s6 + $0xc0] sm:$0xff] %v3411_v41  ;;  %v2761_v0 = vadd.f32 1e-05, %v2633_v18  ;;  %1701 = vadd.xlane.f32.xlu0 %v5821_v39  ;;  %v3015_v41 = vsub.f32 %v5197_v61, %v5746_v30  ;;  %v5841_v18 = vadd.f32 %v5453_v37, %v1124_v60  ;;  %v1444_v35 = vpop.f32.mrf.mxu1  ;;  %v5849_v30 = vadd.f32 %v5453_v37, %v4188_v49 }
 0x21f   : > { %v2762_v33 = vadd.f32 1e-05, %v2634_v36  ;;  %1703 = vadd.xlane.f32.xlu1 %v5817_v22  ;;  %8272 = vst [vmem:[#allocation122_spill] sm:$0xff] %v5830_v40  ;;  %v5834_v52 = vpop.xlane.xlu0 %1641  ;;  %v5838_v36 = vmul.f32 0.0078125, %v1514_v3  ;;  %v2380_v61 = vmul.f32 %v5832_v51, %v5832_v51  ;;  %v1876_v22 = vmul.f32 %v5456_v48, %v5456_v48 }
 0x220   : > { %v5825_v34 = vpop.xlane.xlu1 %1643  ;;  %8273 = vst [vmem:[#allocation123_spill] sm:$0xff] %v5834_v52  ;;  %8274 = vst [vmem:[#allocation124_spill] sm:$0xff] %v5841_v18 }
 0x221   : > { %8271 = vst [vmem:[#allocation121_spill] sm:$0xff] %v5825_v34  ;;  %4290 = vrsqrt.f32 %v2762_v33  ;;  %8275 = vst [vmem:[#allocation125_spill] sm:$0xff] %v5849_v30 }
 0x222   : > { %v4287_v31 = vpop.eup %4286  ;;  %4292 = vrsqrt.f32 %v2761_v0  ;;  %1577 = vadd.xlane.f32.xlu0 %v5841_v18 }
 0x223   : > { %v4289_v34 = vpop.eup %4288  ;;  %v3144_v2 = vmul.f32 %v4287_v31, %v3016_v26  ;;  %1579 = vadd.xlane.f32.xlu1 %v5830_v40  ;;  %v2026_v60 = vpop.xlane.xlu0 %2025  ;;  %v5855_v26 = vadd.f32 %v5453_v37, %v1444_v35  ;;  %v1875_v35 = vmul.f32 %v5463_v47, %v5463_v47 }
 0x224   : > { %v3143_v28 = vmul.f32 %v4289_v34, %v3015_v41  ;;  %v2028_v57 = vpop.xlane.xlu1 %2027  ;;  %v2379_v34 = vmul.f32 %v5838_v36, %v5838_v36  ;;  %v2251_v31 = vmul.f32 0.0078125, %v2026_v60  ;;  %v3018_v60 = vsub.f32 %v5233_v32, %v5786_v53 }
 0x225   : > { %v3279_v33 = vmul.f32 %v5700_v14, %v3144_v2  ;;  %v2252_v3 = vmul.f32 0.0078125, %v2028_v57  ;;  %8276 = vst [vmem:[#allocation126_spill] sm:$0xff] %v5855_v26 }
 0x226   : > { %v3278_v0 = vmul.f32 %v5700_v14, %v3143_v28  ;;  %v2507_v52 = vsub.f32 %v2251_v31, %v2379_v34  ;;  %1705 = vadd.xlane.f32.xlu0 %v5855_v26 }
 0x227   : > { %v3414_v41 = vadd.f32 %v5717_v11, %v3279_v33  ;;  %v2508_v2 = vsub.f32 %v2252_v3, %v2380_v61  ;;  %1707 = vadd.xlane.f32.xlu1 %v5849_v30  ;;  %v1518_v39 = vpop.xlane.xlu0 %1517 }
 0x228   : > { %v3413_v49 = vadd.f32 %v5717_v11, %v3278_v0  ;;  %v1520_v57 = vpop.xlane.xlu1 %1519  ;;  %v2635_v37 = vmax.f32 %v2507_v52, 0.0  ;;  %v1878_v52 = vmul.f32 %v5485_v46, %v5485_v46 }
 0x229   : > { %3542 = vst [vmem:[%s5255_s6 + $0xd8] sm:$0xff] %v3414_v41  ;;  %v2636_v28 = vmax.f32 %v2508_v2, 0.0  ;;  %v5871_v0 = vmul.f32 0.0078125, %v1520_v57  ;;  %v3017_v41 = vsub.f32 %v5245_v1, %v5792_v10  ;;  %v1877_v2 = vmul.f32 %v5489_v19, %v5489_v19 }
 0x22a   : > { %3541 = vst [vmem:[%s5255_s6 + $0xd0] sm:$0xff] %v3413_v49  ;;  %v2763_v61 = vadd.f32 1e-05, %v2635_v37  ;;  %2041 = vadd.xlane.f32.xlu0 %v1875_v35  ;;  %v1880_v10 = vmul.f32 %v5515_v12, %v5515_v12 }
 0x22b   : > { %v2764_v33 = vadd.f32 1e-05, %v2636_v28  ;;  %2043 = vadd.xlane.f32.xlu1 %v1876_v22  ;;  %v5873_v34 = vpop.xlane.xlu0 %1645  ;;  %v5879_v22 = vmul.f32 0.0078125, %v1518_v39  ;;  %v2382_v37 = vmul.f32 %v5871_v0, %v5871_v0 }
 0x22c   : > { %v5867_v3 = vpop.xlane.xlu1 %1647 }
 0x22d   : > { %4294 = vrsqrt.f32 %v2764_v33  ;;  %v2381_v33 = vmul.f32 %v5879_v22, %v5879_v22 }
 0x22e   : > { %v4291_v31 = vpop.eup %4290  ;;  %4296 = vrsqrt.f32 %v2763_v61  ;;  %2045 = vadd.xlane.f32.xlu0 %v1877_v2 }
 0x22f   : > { %v4293_v49 = vpop.eup %4292  ;;  %v3146_v32 = vmul.f32 %v4291_v31, %v3018_v60  ;;  %2047 = vadd.xlane.f32.xlu1 %v1878_v52  ;;  %v2030_v1 = vpop.xlane.xlu0 %2029  ;;  %v1879_v60 = vmul.f32 %v5523_v27, %v5523_v27  ;;  %v1881_v27 = vmul.f32 %v5555_v6, %v5555_v6  ;;  %v8318_v6 = vld [vmem:[#allocation26_spill] sm:$0xff] }
 0x230   : > { %v3145_v53 = vmul.f32 %v4293_v49, %v3017_v41  ;;  %v2032_v57 = vpop.xlane.xlu1 %2031  ;;  %v2253_v61 = vmul.f32 0.0078125, %v2030_v1 }
 0x231   : > { %v3281_v28 = vmul.f32 %v5700_v14, %v3146_v32  ;;  %v2254_v35 = vmul.f32 0.0078125, %v2032_v57 }
 0x232   : > { %v3280_v39 = vmul.f32 %v5700_v14, %v3145_v53  ;;  %v2509_v2 = vsub.f32 %v2253_v61, %v2381_v33  ;;  %2049 = vadd.xlane.f32.xlu0 %v1879_v60  ;;  %v1882_v53 = vmul.f32 %v5548_v42, %v5548_v42  ;;  %v1884_v33 = vmul.f32 %v5577_v59, %v5577_v59 }
 0x233   : > { %v3416_v52 = vadd.f32 %v5717_v11, %v3281_v28  ;;  %v2510_v31 = vsub.f32 %v2254_v35, %v2382_v37  ;;  %2051 = vadd.xlane.f32.xlu1 %v1880_v10  ;;  %v1522_v57 = vpop.xlane.xlu0 %1521  ;;  %v3020_v35 = vsub.f32 %v5283_v45, %v5832_v51  ;;  %v3019_v60 = vsub.f32 %v5290_v43, %v5838_v36 }
 0x234   : > { %v3415_v41 = vadd.f32 %v5717_v11, %v3280_v39  ;;  %v1524_v49 = vpop.xlane.xlu1 %1523  ;;  %v2637_v1 = vmax.f32 %v2509_v2, 0.0  ;;  %v1886_v36 = vmul.f32 %v5607_v55, %v5607_v55 }
 0x235   : > { %3544 = vst [vmem:[%s5255_s6 + $0xe8] sm:$0xff] %v3416_v52  ;;  %v2638_v32 = vmax.f32 %v2510_v31, 0.0  ;;  %v5905_v10 = vmul.f32 0.0078125, %v1524_v49  ;;  %v5913_v52 = vmul.f32 0.0078125, %v1522_v57 }
 0x236   : > { %3543 = vst [vmem:[%s5255_s6 + $0xe0] sm:$0xff] %v3415_v41  ;;  %v2765_v28 = vadd.f32 1e-05, %v2637_v1  ;;  %2053 = vadd.xlane.f32.xlu0 %v1881_v27  ;;  %v1883_v27 = vmul.f32 %v5581_v8, %v5581_v8  ;;  %v1885_v1 = vmul.f32 %v5615_v17, %v5615_v17  ;;  %v8315_v17 = vld [vmem:[#allocation23_spill] sm:$0xff]  ;;  %v8316_v8 = vld [vmem:[#allocation24_spill] sm:$0xff] }
 0x237   : > { %v2766_v12 = vadd.f32 1e-05, %v2638_v32  ;;  %2055 = vadd.xlane.f32.xlu1 %v1882_v53  ;;  %v5907_v39 = vpop.xlane.xlu0 %1649  ;;  %v2384_v2 = vmul.f32 %v5905_v10, %v5905_v10  ;;  %v2383_v57 = vmul.f32 %v5913_v52, %v5913_v52  ;;  %v6083_v55 = vmul.f32 %v8315_v17, %v8315_v17  ;;  %v8471_v17 = vld [vmem:[#allocation105_spill] sm:$0xff] }
 0x238   : > { %v5901_v37 = vpop.xlane.xlu1 %1651  ;;  %8277 = vst [vmem:[#allocation127_spill] sm:$0xff] %v5907_v39  ;;  %v6087_v59 = vmul.f32 %v8316_v8, %v8316_v8  ;;  %v8369_v39 = vld [vmem:[#allocation77_spill] sm:$0xff] }
 0x239   : > { %4298 = vrsqrt.f32 %v2766_v12 }
 0x23a   : > { %v4295_v61 = vpop.eup %4294  ;;  %4300 = vrsqrt.f32 %v2765_v28  ;;  %2057 = vadd.xlane.f32.xlu0 %v1883_v27 }
 0x23b   : > { %v4297_v31 = vpop.eup %4296  ;;  %v3148_v45 = vmul.f32 %v4295_v61, %v3020_v35  ;;  %2059 = vadd.xlane.f32.xlu1 %v1884_v33  ;;  %v2034_v43 = vpop.xlane.xlu0 %2033 }
 0x23c   : > { %v3147_v12 = vmul.f32 %v4297_v31, %v3019_v60  ;;  %v2036_v51 = vpop.xlane.xlu1 %2035  ;;  %v2255_v53 = vmul.f32 0.0078125, %v2034_v43 }
 0x23d   : > { %v3283_v41 = vmul.f32 %v5700_v14, %v3148_v45  ;;  %v2256_v49 = vmul.f32 0.0078125, %v2036_v51  ;;  %v1888_v45 = vmul.f32 %v5638_v63, %v5638_v63  ;;  %v1887_v51 = vmul.f32 %v5647_v21, %v5647_v21  ;;  %v8314_v21 = vld [vmem:[#allocation22_spill] sm:$0xff] }
 0x23e   : > { %v3282_v32 = vmul.f32 %v5700_v14, %v3147_v12  ;;  %v2511_v61 = vsub.f32 %v2255_v53, %v2383_v57  ;;  %2061 = vadd.xlane.f32.xlu0 %v1885_v1  ;;  %v1890_v57 = vmul.f32 %v5669_v25, %v5669_v25  ;;  %v3021_v1 = vsub.f32 %v5332_v62, %v5879_v22 }
 0x23f   : > { %v3418_v28 = vadd.f32 %v5717_v11, %v3283_v41  ;;  %v2512_v35 = vsub.f32 %v2256_v49, %v2384_v2  ;;  %2063 = vadd.xlane.f32.xlu1 %v1886_v36  ;;  %v1526_v31 = vpop.xlane.xlu0 %1525  ;;  %v3022_v49 = vsub.f32 %v5325_v23, %v5871_v0  ;;  %v1892_v22 = vmul.f32 %v5706_v50, %v5706_v50 }
 0x240   : > { %v3417_v33 = vadd.f32 %v5717_v11, %v3282_v32  ;;  %v1528_v60 = vpop.xlane.xlu1 %1527  ;;  %v2639_v12 = vmax.f32 %v2511_v61, 0.0  ;;  %v6079_v63 = vmul.f32 %v8314_v21, %v8314_v21  ;;  %v8467_v21 = vld [vmem:[#allocation99_spill] sm:$0xff] }
 0x241   : > { %3546 = vst [vmem:[%s5255_s6 + $0xf8] sm:$0xff] %v3418_v28  ;;  %v2640_v27 = vmax.f32 %v2512_v35, 0.0  ;;  %v5939_v36 = vmul.f32 0.0078125, %v1528_v60  ;;  %v5947_v28 = vmul.f32 0.0078125, %v1526_v31  ;;  %v1889_v35 = vmul.f32 %v5673_v38, %v5673_v38  ;;  %v8313_v38 = vld [vmem:[#allocation21_spill] sm:$0xff] }
 0x242   : > { %3545 = vst [vmem:[%s5255_s6 + $0xf0] sm:$0xff] %v3417_v33  ;;  %v2767_v41 = vadd.f32 1e-05, %v2639_v12  ;;  %2065 = vadd.xlane.f32.xlu0 %v1887_v51  ;;  %v6075_v25 = vmul.f32 %v8313_v38, %v8313_v38 }
 0x243   : > { %v2768_v43 = vadd.f32 1e-05, %v2640_v27  ;;  %2067 = vadd.xlane.f32.xlu1 %v1888_v45  ;;  %v5941_v32 = vpop.xlane.xlu0 %1653  ;;  %v2386_v27 = vmul.f32 %v5939_v36, %v5939_v36  ;;  %v2385_v12 = vmul.f32 %v5947_v28, %v5947_v28 }
 0x244   : > { %v5935_v2 = vpop.xlane.xlu1 %1655  ;;  %8279 = vst [vmem:[#allocation129_spill] sm:$0xff] %v5941_v32 }
 0x245   : > { %8278 = vst [vmem:[#allocation128_spill] sm:$0xff] %v5935_v2  ;;  %4302 = vrsqrt.f32 %v2768_v43  ;;  %v1891_v43 = vmul.f32 %v5712_v44, %v5712_v44  ;;  %v8311_v44 = vld [vmem:[#allocation19_spill] sm:$0xff] }
 0x246   : > { %v4299_v53 = vpop.eup %4298  ;;  %4304 = vrsqrt.f32 %v2767_v41  ;;  %2069 = vadd.xlane.f32.xlu0 %v1889_v35 }
 0x247   : > { %v4301_v33 = vpop.eup %4300  ;;  %v3150_v23 = vmul.f32 %v4299_v53, %v3022_v49  ;;  %2071 = vadd.xlane.f32.xlu1 %v1890_v57  ;;  %v2038_v62 = vpop.xlane.xlu0 %2037 }
 0x248   : > { %v3149_v0 = vmul.f32 %v4301_v33, %v3021_v1  ;;  %v2040_v61 = vpop.xlane.xlu1 %2039  ;;  %v2257_v51 = vmul.f32 0.0078125, %v2038_v62  ;;  %v3024_v62 = vsub.f32 %v5367_v58, %v5905_v10 }
 0x249   : > { %v3285_v60 = vmul.f32 %v5700_v14, %v3150_v23  ;;  %v2258_v45 = vmul.f32 0.0078125, %v2040_v61  ;;  %v1894_v23 = vmul.f32 %v5738_v9, %v5738_v9  ;;  %v1893_v61 = vmul.f32 %v5749_v54, %v5749_v54  ;;  %v8310_v54 = vld [vmem:[#allocation18_spill] sm:$0xff] }
 0x24a   : > { %v3284_v31 = vmul.f32 %v5700_v14, %v3149_v0  ;;  %v2513_v53 = vsub.f32 %v2257_v51, %v2385_v12  ;;  %2073 = vadd.xlane.f32.xlu0 %v1891_v43  ;;  %v3023_v51 = vsub.f32 %v5374_v7, %v5913_v52  ;;  %v1895_v43 = vmul.f32 %v5775_v16, %v5775_v16  ;;  %v8309_v16 = vld [vmem:[#allocation17_spill] sm:$0xff] }
 0x24b   : > { %v3420_v41 = vadd.f32 %v5717_v11, %v3285_v60  ;;  %v2514_v49 = vsub.f32 %v2258_v45, %v2386_v27  ;;  %2075 = vadd.xlane.f32.xlu1 %v1892_v22  ;;  %v5966_v33 = vpop.xlane.xlu0 %1529  ;;  %v1898_v7 = vmul.f32 %v5803_v20, %v5803_v20  ;;  %v1913_v9 = vmul.f32 %v8310_v54, %v8310_v54 }
 0x24c   : > { %v3419_v57 = vadd.f32 %v5717_v11, %v3284_v31  ;;  %v5963_v1 = vpop.xlane.xlu1 %1531  ;;  %8281 = vst [vmem:[#allocation131_spill] sm:$0xff] %v5966_v33  ;;  %v2641_v0 = vmax.f32 %v2513_v53, 0.0  ;;  %v1896_v31 = vmul.f32 %v5771_v29, %v5771_v29  ;;  %v1914_v29 = vmul.f32 %v8309_v16, %v8309_v16  ;;  %v8337_v33 = vld [vmem:[#allocation48_spill] sm:$0xff] }
 0x24d   : > { %8280 = vst [vmem:[#allocation130_spill] sm:$0xff] %v5963_v1  ;;  %3548 = vst [vmem:[%s5255_s6 + $0x108] sm:$0xff] %v3420_v41  ;;  %v2642_v35 = vmax.f32 %v2514_v49, 0.0  ;;  %v6147_v1 = vmul.f32 %v8337_v33, %v8337_v33  ;;  %v6510_v54 = vmul.f32 0.0078125, %v8471_v17 }
 0x24e   : > { %3547 = vst [vmem:[%s5255_s6 + $0x100] sm:$0xff] %v3419_v57  ;;  %v2769_v27 = vadd.f32 1e-05, %v2641_v0  ;;  %2077 = vadd.xlane.f32.xlu0 %v1893_v61 }
 0x24f   : > { %v2770_v60 = vadd.f32 1e-05, %v2642_v35  ;;  %2079 = vadd.xlane.f32.xlu1 %v1894_v23  ;;  %v5977_v22 = vpop.xlane.xlu0 %1657  ;;  %v1897_v35 = vmul.f32 %v5809_v56, %v5809_v56  ;;  %v8307_v56 = vld [vmem:[#allocation15_spill] sm:$0xff]  ;;  %8338 = vst [vmem:[#allocation157_spill] sm:$0xff] %v6147_v1  ;;  %v8348_v1 = vld [vmem:[#allocation56_spill] sm:$0xff]  ;;  %8472 = vst [vmem:[#allocation105_spill] sm:$0xff] %v6510_v54 }
 0x250   : > { %v5973_v45 = vpop.xlane.xlu1 %1659  ;;  %8283 = vst [vmem:[#allocation133_spill] sm:$0xff] %v5977_v22  ;;  %v8335_v22 = vld [vmem:[#allocation47_spill] sm:$0xff] }
 0x251   : > { %8282 = vst [vmem:[#allocation132_spill] sm:$0xff] %v5973_v45  ;;  %4306 = vrsqrt.f32 %v2770_v60  ;;  %v6143_v45 = vmul.f32 %v8335_v22, %v8335_v22 }
 0x252   : > { %v4303_v12 = vpop.eup %4302  ;;  %4308 = vrsqrt.f32 %v2769_v27  ;;  %2081 = vadd.xlane.f32.xlu0 %v1895_v43  ;;  %v1900_v27 = vmul.f32 %v5830_v40, %v5830_v40  ;;  %v1902_v43 = vmul.f32 %v4915_v5, %v4915_v5 }
 0x253   : > { %v4305_v41 = vpop.eup %4304  ;;  %v3152_v49 = vmul.f32 %v4303_v12, %v3024_v62  ;;  %2083 = vadd.xlane.f32.xlu1 %v1896_v31  ;;  %v5988_v53 = vpop.xlane.xlu0 %1533  ;;  %v1899_v62 = vmul.f32 %v5841_v18, %v5841_v18  ;;  %v3026_v12 = vsub.f32 %v5409_v4, %v5939_v36  ;;  %8336 = vst [vmem:[#allocation156_spill] sm:$0xff] %v6143_v45 }
 0x254   : > { %v3151_v57 = vmul.f32 %v4305_v41, %v3023_v51  ;;  %v5985_v58 = vpop.xlane.xlu1 %1535  ;;  %8285 = vst [vmem:[#allocation135_spill] sm:$0xff] %v5988_v53  ;;  %v8331_v53 = vld [vmem:[#allocation43_spill] sm:$0xff] }
 0x255   : > { %8284 = vst [vmem:[#allocation134_spill] sm:$0xff] %v5985_v58  ;;  %v3287_v10 = vmul.f32 %v5700_v14, %v3152_v49  ;;  %v3025_v49 = vsub.f32 %v5416_v24, %v5947_v28  ;;  %v8292_v28 = vld [vmem:[#allocation8_spill] sm:$0xff]  ;;  %v6135_v48 = vmul.f32 %v8331_v53, %v8331_v53  ;;  %v8382_v53 = vld [vmem:[#allocation87_spill] sm:$0xff] }
 0x256   : > { %v3286_v52 = vmul.f32 %v5700_v14, %v3151_v57  ;;  %2085 = vadd.xlane.f32.xlu0 %v1897_v35  ;;  %v1901_v57 = vmul.f32 %v4931_v13, %v4931_v13 }
 0x257   : > { %v3422_v23 = vadd.f32 %v5717_v11, %v3287_v10  ;;  %2087 = vadd.xlane.f32.xlu1 %v1898_v7  ;;  %v6000_v60 = vpop.xlane.xlu0 %1661  ;;  %8332 = vst [vmem:[#allocation154_spill] sm:$0xff] %v6135_v48  ;;  %v8343_v48 = vld [vmem:[#allocation52_spill] sm:$0xff] }
 0x258   : > { %v3421_v0 = vadd.f32 %v5717_v11, %v3286_v52  ;;  %v5997_v61 = vpop.xlane.xlu1 %1663  ;;  %8287 = vst [vmem:[#allocation137_spill] sm:$0xff] %v6000_v60 }
 0x259   : > { %8286 = vst [vmem:[#allocation136_spill] sm:$0xff] %v5997_v61  ;;  %3550 = vst [vmem:[%s5255_s6 + $0x118] sm:$0xff] %v3422_v23  ;;  %v1904_v23 = vmul.f32 %v4934_v15, %v4934_v15  ;;  %v8329_v61 = vld [vmem:[#allocation40_spill] sm:$0xff]  ;;  %v8417_v15 = vld [vmem:[#allocation114_spill] sm:$0xff] }
 0x25a   : > { %3549 = vst [vmem:[%s5255_s6 + $0x110] sm:$0xff] %v3421_v0  ;;  %2089 = vadd.xlane.f32.xlu0 %v1899_v62  ;;  %v1903_v0 = vmul.f32 %v8292_v28, %v8292_v28  ;;  %v6131_v47 = vmul.f32 %v8329_v61, %v8329_v61 }
 0x25b   : > { %2091 = vadd.xlane.f32.xlu1 %v1900_v27  ;;  %v6011_v51 = vpop.xlane.xlu0 %1537 }
 0x25c   : > { %v6007_v31 = vpop.xlane.xlu1 %1539  ;;  %8289 = vst [vmem:[#allocation139_spill] sm:$0xff] %v6011_v51  ;;  %v8326_v51 = vld [vmem:[#allocation36_spill] sm:$0xff]  ;;  %8330 = vst [vmem:[#allocation153_spill] sm:$0xff] %v6131_v47  ;;  %v8341_v47 = vld [vmem:[#allocation51_spill] sm:$0xff] }
 0x25d   : > { %8288 = vst [vmem:[#allocation138_spill] sm:$0xff] %v6007_v31  ;;  %v6123_v46 = vmul.f32 %v8326_v51, %v8326_v51  ;;  %v8327_v31 = vld [vmem:[#allocation39_spill] sm:$0xff]  ;;  %v6154_v2 = vmul.f32 %v8341_v47, %v8341_v47 }
 0x25e   : > { %v4307_v41 = vpop.eup %4306  ;;  %2093 = vadd.xlane.f32.xlu0 %v1901_v57  ;;  %v8296_v57 = vld [vmem:[#allocation10_spill] sm:$0xff]  ;;  %v6127_v60 = vmul.f32 %v8327_v31, %v8327_v31 }
 0x25f   : > { %v4309_v10 = vpop.eup %4308  ;;  %v3154_v7 = vmul.f32 %v4307_v41, %v3026_v12  ;;  %2095 = vadd.xlane.f32.xlu1 %v1902_v43  ;;  %v6022_v35 = vpop.xlane.xlu0 %1665  ;;  %v8295_v41 = vld [vmem:[#allocation9_spill] sm:$0xff]  ;;  %8342 = vst [vmem:[#allocation158_spill] sm:$0xff] %v6154_v2  ;;  %v8352_v2 = vld [vmem:[#allocation62_spill] sm:$0xff] }
 0x260   : > { %v3153_v52 = vmul.f32 %v4309_v10, %v3025_v49  ;;  %v6019_v4 = vpop.xlane.xlu1 %1667  ;;  %8291 = vst [vmem:[#allocation141_spill] sm:$0xff] %v6022_v35  ;;  %v1906_v49 = vmul.f32 %v8295_v41, %v8295_v41  ;;  %v8323_v35 = vld [vmem:[#allocation32_spill] sm:$0xff]  ;;  %8328 = vst [vmem:[#allocation152_spill] sm:$0xff] %v6127_v60  ;;  %v8339_v60 = vld [vmem:[#allocation29_spill] sm:$0xff]  ;;  %v6176_v47 = vmul.f32 %v8352_v2, %v8352_v2 }
 0x261   : > { %8290 = vst [vmem:[#allocation140_spill] sm:$0xff] %v6019_v4  ;;  %v3289_v36 = vmul.f32 %v5700_v14, %v3154_v7  ;;  %v6113_v4 = vmul.f32 %v8323_v35, %v8323_v35  ;;  %v6150_v32 = vmul.f32 0.0078125, %v8339_v60  ;;  %v6168_v60 = vmul.f32 %v8348_v1, %v8348_v1  ;;  %v8361_v1 = vld [vmem:[#allocation71_spill] sm:$0xff]  ;;  %v8365_v2 = vld [vmem:[#allocation33_spill] sm:$0xff]  ;;  %v8500_v35 = vld [vmem:[#allocation128_spill] sm:$0xff] }
 0x262   : > { %v3288_v24 = vmul.f32 %v5700_v14, %v3153_v52  ;;  %2097 = vadd.xlane.f32.xlu0 %v1903_v0  ;;  %v1905_v14 = vmul.f32 %v8296_v57, %v8296_v57  ;;  %8353 = vst [vmem:[#allocation164_spill] sm:$0xff] %v6176_v47  ;;  %v8407_v41 = vld [vmem:[#allocation109_spill] sm:$0xff]  ;;  %v8412_v57 = vld [vmem:[#allocation110_spill] sm:$0xff] }
 0x263   : > { %v3424_v27 = vadd.f32 %v5717_v11, %v3289_v36  ;;  %2099 = vadd.xlane.f32.xlu1 %v1904_v23  ;;  %v6034_v43 = vpop.xlane.xlu0 %1541  ;;  %v8300_v36 = vld [vmem:[#allocation12_spill] sm:$0xff]  ;;  %8340 = vst [vmem:[#allocation29_spill] sm:$0xff] %v6150_v32  ;;  %8349 = vst [vmem:[#allocation162_spill] sm:$0xff] %v6168_v60 }
 0x264   : > { %v3423_v62 = vadd.f32 %v5717_v11, %v3288_v24  ;;  %v6031_v12 = vpop.xlane.xlu1 %1543  ;;  %8294 = vst [vmem:[#allocation143_spill] sm:$0xff] %v6034_v43  ;;  %v8299_v11 = vld [vmem:[#allocation11_spill] sm:$0xff]  ;;  %v1907_v23 = vmul.f32 %v8300_v36, %v8300_v36 }
 0x265   : > { %8293 = vst [vmem:[#allocation142_spill] sm:$0xff] %v6031_v12  ;;  %3552 = vst [vmem:[%s5255_s6 + $0x128] sm:$0xff] %v3424_v27  ;;  %v1908_v52 = vmul.f32 %v8299_v11, %v8299_v11  ;;  %v8303_v27 = vld [vmem:[#allocation13_spill] sm:$0xff]  ;;  %v8322_v43 = vld [vmem:[#allocation31_spill] sm:$0xff] }
 0x266   : > { %3551 = vst [vmem:[%s5255_s6 + $0x120] sm:$0xff] %v3423_v62  ;;  %2101 = vadd.xlane.f32.xlu0 %v1905_v14  ;;  %v1910_v62 = vmul.f32 %v8303_v27, %v8303_v27  ;;  %v6109_v12 = vmul.f32 %v8322_v43, %v8322_v43 }
 0x267   : > { %2103 = vadd.xlane.f32.xlu1 %v1906_v49  ;;  %v6043_v7 = vpop.xlane.xlu0 %1669  ;;  %v8304_v49 = vld [vmem:[#allocation14_spill] sm:$0xff]  ;;  %v8504_v61 = vld [vmem:[#allocation152_spill] sm:$0xff] }
 0x268   : > { %v6041_v10 = vpop.xlane.xlu1 %1671  ;;  %8298 = vst [vmem:[#allocation145_spill] sm:$0xff] %v6043_v7  ;;  %v1909_v14 = vmul.f32 %v8304_v49, %v8304_v49  ;;  %v8321_v7 = vld [vmem:[#allocation28_spill] sm:$0xff] }
 0x269   : > { %8297 = vst [vmem:[#allocation144_spill] sm:$0xff] %v6041_v10  ;;  %v6105_v10 = vmul.f32 %v8321_v7, %v8321_v7 }
 0x26a   : > { %2105 = vadd.xlane.f32.xlu0 %v1907_v23  ;;  %v8308_v23 = vld [vmem:[#allocation16_spill] sm:$0xff] }
 0x26b   : > { %2107 = vadd.xlane.f32.xlu1 %v1908_v52  ;;  %v6051_v0 = vpop.xlane.xlu0 %1545  ;;  %v1912_v52 = vmul.f32 %v8307_v56, %v8307_v56  ;;  %v1911_v20 = vmul.f32 %v8308_v23, %v8308_v23 }
 0x26c   : > { %v6049_v24 = vpop.xlane.xlu1 %1547  ;;  %8302 = vst [vmem:[#allocation147_spill] sm:$0xff] %v6051_v0  ;;  %v6095_v0 = vmul.f32 %v8318_v6, %v8318_v6  ;;  %v8479_v6 = vld [vmem:[#allocation115_spill] sm:$0xff] }
 0x26d   : > { %8301 = vst [vmem:[#allocation146_spill] sm:$0xff] %v6049_v24 }
 0x26e   : > { %2109 = vadd.xlane.f32.xlu0 %v1909_v14  ;;  %v8312_v14 = vld [vmem:[#allocation20_spill] sm:$0xff] }
 0x26f   : > { %2111 = vadd.xlane.f32.xlu1 %v1910_v62  ;;  %v6059_v40 = vpop.xlane.xlu0 %1673  ;;  %v1916_v62 = vmul.f32 %v8311_v44, %v8311_v44  ;;  %v1915_v50 = vmul.f32 %v8312_v14, %v8312_v14  ;;  %v6497_v44 = vmul.f32 0.0078125, %v8467_v21  ;;  %v8477_v21 = vld [vmem:[#allocation113_spill] sm:$0xff] }
 0x270   : > { %v6057_v18 = vpop.xlane.xlu1 %1675  ;;  %8306 = vst [vmem:[#allocation149_spill] sm:$0xff] %v6059_v40  ;;  %v8317_v40 = vld [vmem:[#allocation25_spill] sm:$0xff] }
 0x271   : > { %8305 = vst [vmem:[#allocation148_spill] sm:$0xff] %v6057_v18  ;;  %v6091_v18 = vmul.f32 %v8317_v40, %v8317_v40  ;;  %8468 = vst [vmem:[#allocation99_spill] sm:$0xff] %v6497_v44 }
 0x272   : > { %2113 = vadd.xlane.f32.xlu0 %v1911_v20  ;;  %v8325_v20 = vld [vmem:[#allocation35_spill] sm:$0xff] }
 0x273   : > { %2115 = vadd.xlane.f32.xlu1 %v1912_v52  ;;  %v8320_v52 = vld [vmem:[#allocation27_spill] sm:$0xff]  ;;  %v6115_v19 = vpop.xlane.xlu0 %1549 }
 0x274   : > { %v6097_v42 = vpop.xlane.xlu1 %1551  ;;  %v6101_v24 = vmul.f32 %v8320_v52, %v8320_v52  ;;  %8324 = vst [vmem:[#allocation151_spill] sm:$0xff] %v6115_v19  ;;  %v8333_v19 = vld [vmem:[#allocation44_spill] sm:$0xff]  ;;  %v8486_v52 = vld [vmem:[#allocation123_spill] sm:$0xff] }
 0x275   : > { %8319 = vst [vmem:[#allocation150_spill] sm:$0xff] %v6097_v42  ;;  %v6119_v42 = vmul.f32 %v8325_v20, %v8325_v20  ;;  %v6139_v58 = vmul.f32 %v8333_v19, %v8333_v19  ;;  %v6158_v19 = vmul.f32 %v8343_v48, %v8343_v48  ;;  %v6563_v8 = vmul.f32 0.0078125, %v8486_v52  ;;  %v8496_v52 = vld [vmem:[#allocation127_spill] sm:$0xff]  ;;  %v8508_v20 = vld [vmem:[#allocation130_spill] sm:$0xff] }
 0x276   : > { %2117 = vadd.xlane.f32.xlu0 %v1913_v9 }
 0x277   : > { %8334 = vst [vmem:[#allocation155_spill] sm:$0xff] %v6139_v58  ;;  %2119 = vadd.xlane.f32.xlu1 %v1914_v29  ;;  %8344 = vst [vmem:[#allocation159_spill] sm:$0xff] %v6158_v19  ;;  %v8345_v58 = vld [vmem:[#allocation55_spill] sm:$0xff]  ;;  %v8350_v29 = vld [vmem:[#allocation61_spill] sm:$0xff]  ;;  %v6609_v31 = vmul.f32 %v6563_v8, %v6563_v8 }
 0x278   : > { %v6162_v22 = vmul.f32 %v8345_v58, %v8345_v58  ;;  %v6164_v45 = vpop.xlane.xlu1 %1679  ;;  %v6172_v33 = vmul.f32 %v8350_v29, %v8350_v29  ;;  %v8354_v19 = vld [vmem:[#allocation67_spill] sm:$0xff]  ;;  %v8359_v58 = vld [vmem:[#allocation68_spill] sm:$0xff]  ;;  %8487 = vst [vmem:[#allocation123_spill] sm:$0xff] %v6563_v8  ;;  %v6631_v8 = vmul.f32 0.0078125, %v8508_v20 }
 0x279   : > { %8347 = vst [vmem:[#allocation161_spill] sm:$0xff] %v6164_v45  ;;  %v6180_v48 = vmul.f32 %v8354_v19, %v8354_v19  ;;  %v6185_v45 = vpop.xlane.xlu0 %1677  ;;  %v6189_v60 = vmul.f32 %v8359_v58, %v8359_v58  ;;  %v8363_v29 = vld [vmem:[#allocation72_spill] sm:$0xff]  ;;  %v6200_v19 = vmul.f32 0.0078125, %v8365_v2  ;;  %v8371_v58 = vld [vmem:[#allocation78_spill] sm:$0xff]  ;;  %v8374_v2 = vld [vmem:[#allocation83_spill] sm:$0xff] }
 0x27a   : > { %8346 = vst [vmem:[#allocation160_spill] sm:$0xff] %v6162_v22  ;;  %8351 = vst [vmem:[#allocation163_spill] sm:$0xff] %v6172_v33  ;;  %v8356_v22 = vld [vmem:[#allocation30_spill] sm:$0xff]  ;;  %v6193_v33 = vmul.f32 %v8361_v1, %v8361_v1  ;;  %v6197_v47 = vmul.f32 %v8363_v29, %v8363_v29  ;;  %v8376_v29 = vld [vmem:[#allocation84_spill] sm:$0xff]  ;;  %2121 = vadd.xlane.f32.xlu0 %v1915_v50 }
 0x27b   : > { %8355 = vst [vmem:[#allocation165_spill] sm:$0xff] %v6180_v48  ;;  %v6183_v9 = vmul.f32 0.0078125, %v8356_v22  ;;  %8358 = vst [vmem:[#allocation166_spill] sm:$0xff] %v6185_v45  ;;  %v8367_v48 = vld [vmem:[#allocation34_spill] sm:$0xff]  ;;  %v6207_v45 = vmul.f32 %v8369_v39, %v8369_v39  ;;  %2123 = vadd.xlane.f32.xlu1 %v1916_v62  ;;  %v6225_v39 = vmul.f32 %v8376_v29, %v8376_v29  ;;  %v8387_v50 = vld [vmem:[#allocation93_spill] sm:$0xff] }
 0x27c   : > { %8360 = vst [vmem:[#allocation167_spill] sm:$0xff] %v6189_v60  ;;  %8362 = vst [vmem:[#allocation168_spill] sm:$0xff] %v6193_v33  ;;  %v6203_v22 = vmul.f32 0.0078125, %v8367_v48  ;;  %v6211_v60 = vmul.f32 %v8371_v58, %v8371_v58  ;;  %v6215_v33 = vmul.f32 %v6150_v32, %v6150_v32  ;;  %v6221_v48 = vmul.f32 %v8374_v2, %v8374_v2  ;;  %v8605_v29 = vld [vmem:[#allocation164_spill] sm:$0xff] }
 0x27d   : > { %8357 = vst [vmem:[#allocation30_spill] sm:$0xff] %v6183_v9  ;;  %8364 = vst [vmem:[#allocation169_spill] sm:$0xff] %v6197_v47  ;;  %v6237_v62 = vmul.f32 %v8382_v53, %v8382_v53  ;;  %v8384_v47 = vld [vmem:[#allocation88_spill] sm:$0xff]  ;;  %v6245_v5 = vmul.f32 %v6183_v9, %v6183_v9  ;;  %v8393_v9 = vld [vmem:[#allocation41_spill] sm:$0xff] }
 0x27e   : > { %8366 = vst [vmem:[#allocation33_spill] sm:$0xff] %v6200_v19  ;;  %8368 = vst [vmem:[#allocation34_spill] sm:$0xff] %v6203_v22  ;;  %v6241_v32 = vmul.f32 %v8384_v47, %v8384_v47  ;;  %v6270_v13 = vmul.f32 0.0078125, %v8393_v9  ;;  %2125 = vadd.xlane.f32.xlu0 %v6079_v63  ;;  %v6316_v63 = vmul.f32 %v8407_v41, %v8407_v41  ;;  %v8423_v41 = vld [vmem:[#allocation119_spill] sm:$0xff] }
 0x27f   : > { %8370 = vst [vmem:[#allocation170_spill] sm:$0xff] %v6207_v45  ;;  %8372 = vst [vmem:[#allocation171_spill] sm:$0xff] %v6211_v60  ;;  %v8378_v45 = vld [vmem:[#allocation37_spill] sm:$0xff]  ;;  %v8380_v60 = vld [vmem:[#allocation38_spill] sm:$0xff]  ;;  %2127 = vadd.xlane.f32.xlu1 %v6075_v25 }
 0x280   : > { %8373 = vst [vmem:[#allocation172_spill] sm:$0xff] %v6215_v33  ;;  %8375 = vst [vmem:[#allocation173_spill] sm:$0xff] %v6221_v48  ;;  %v6228_v1 = vmul.f32 0.0078125, %v8378_v45  ;;  %v6231_v58 = vmul.f32 0.0078125, %v8380_v60  ;;  %v6233_v33 = vpop.xlane.xlu1 %1555  ;;  %v6249_v60 = vpop.xlane.xlu0 %1553  ;;  %v8389_v48 = vld [vmem:[#allocation94_spill] sm:$0xff]  ;;  %v6267_v45 = vmul.f32 %v6203_v22, %v6203_v22  ;;  %v8402_v22 = vld [vmem:[#allocation103_spill] sm:$0xff] }
 0x281   : > { %8377 = vst [vmem:[#allocation174_spill] sm:$0xff] %v6225_v39  ;;  %8383 = vst [vmem:[#allocation175_spill] sm:$0xff] %v6237_v62  ;;  %v6253_v39 = vmul.f32 %v8387_v50, %v8387_v50  ;;  %v6257_v62 = vmul.f32 %v8389_v48, %v8389_v48  ;;  %v8395_v50 = vld [vmem:[#allocation42_spill] sm:$0xff]  ;;  %v6301_v28 = vmul.f32 %v8402_v22, %v8402_v22 }
 0x282   : > { %8379 = vst [vmem:[#allocation37_spill] sm:$0xff] %v6228_v1  ;;  %8381 = vst [vmem:[#allocation38_spill] sm:$0xff] %v6231_v58  ;;  %v6275_v48 = vmul.f32 0.0078125, %v8395_v50  ;;  %v6288_v9 = vmul.f32 %v6228_v1, %v6228_v1  ;;  %v6294_v50 = vmul.f32 %v6231_v58, %v6231_v58  ;;  %v6320_v22 = vmul.f32 %v6270_v13, %v6270_v13  ;;  %v8410_v58 = vld [vmem:[#allocation46_spill] sm:$0xff]  ;;  %v8614_v47 = vld [vmem:[#allocation165_spill] sm:$0xff] }
 0x283   : > { %8385 = vst [vmem:[#allocation176_spill] sm:$0xff] %v6241_v32  ;;  %8386 = vst [vmem:[#allocation177_spill] sm:$0xff] %v6245_v5  ;;  %v6261_v32 = vmul.f32 %v6200_v19, %v6200_v19  ;;  %v8398_v5 = vld [vmem:[#allocation100_spill] sm:$0xff]  ;;  %2131 = vadd.xlane.f32.xlu1 %v6083_v55  ;;  %2129 = vadd.xlane.f32.xlu0 %v6087_v59  ;;  %v6388_v59 = vmul.f32 %v5849_v30, %v5849_v30 }
 0x284   : > { %8388 = vst [vmem:[#allocation178_spill] sm:$0xff] %v6253_v39  ;;  %8390 = vst [vmem:[#allocation179_spill] sm:$0xff] %v6257_v62  ;;  %v8397_v62 = vld [vmem:[#allocation98_spill] sm:$0xff]  ;;  %v6284_v19 = vmul.f32 %v8398_v5, %v8398_v5  ;;  %v6297_v25 = vpop.xlane.xlu1 %1683  ;;  %v8405_v39 = vld [vmem:[#allocation104_spill] sm:$0xff] }
 0x285   : > { %8391 = vst [vmem:[#allocation180_spill] sm:$0xff] %v6261_v32  ;;  %8392 = vst [vmem:[#allocation181_spill] sm:$0xff] %v6267_v45  ;;  %v6280_v32 = vmul.f32 %v8397_v62, %v8397_v62  ;;  %v8403_v45 = vld [vmem:[#allocation45_spill] sm:$0xff]  ;;  %v6312_v1 = vmul.f32 %v8405_v39, %v8405_v39  ;;  %v6333_v39 = vmul.f32 %v6275_v48, %v6275_v48  ;;  %v8425_v55 = vld [vmem:[#allocation120_spill] sm:$0xff] }
 0x286   : > { %8394 = vst [vmem:[#allocation41_spill] sm:$0xff] %v6270_v13  ;;  %8396 = vst [vmem:[#allocation42_spill] sm:$0xff] %v6275_v48  ;;  %v8419_v13 = vld [vmem:[#allocation50_spill] sm:$0xff]  ;;  %v6361_v48 = vmul.f32 %v8425_v55, %v8425_v55 }
 0x287   : > { %8399 = vst [vmem:[#allocation182_spill] sm:$0xff] %v6284_v19  ;;  %8400 = vst [vmem:[#allocation183_spill] sm:$0xff] %v6288_v9  ;;  %v6306_v9 = vmul.f32 0.0078125, %v8403_v45  ;;  %v6308_v19 = vpop.xlane.xlu0 %1681  ;;  %v6325_v45 = vmul.f32 0.0078125, %v8410_v58  ;;  %v6343_v58 = vmul.f32 %v8417_v15, %v8417_v15  ;;  %v6346_v11 = vmul.f32 0.0078125, %v8419_v13  ;;  %v8428_v15 = vld [vmem:[#allocation53_spill] sm:$0xff]  ;;  %2135 = vadd.xlane.f32.xlu1 %v6091_v18  ;;  %2133 = vadd.xlane.f32.xlu0 %v6095_v0 }
 0x288   : > { %8401 = vst [vmem:[#allocation184_spill] sm:$0xff] %v6294_v50  ;;  %8406 = vst [vmem:[#allocation185_spill] sm:$0xff] %v6312_v1  ;;  %v6329_v50 = vmul.f32 %v8412_v57, %v8412_v57  ;;  %v6349_v57 = vpop.xlane.xlu1 %1559  ;;  %v6370_v36 = vmul.f32 0.0078125, %v8428_v15  ;;  %v8455_v0 = vld [vmem:[#allocation82_spill] sm:$0xff] }
 0x289   : > { %8404 = vst [vmem:[#allocation45_spill] sm:$0xff] %v6306_v9  ;;  %8408 = vst [vmem:[#allocation186_spill] sm:$0xff] %v6316_v63  ;;  %v8415_v63 = vld [vmem:[#allocation49_spill] sm:$0xff]  ;;  %v6365_v13 = vmul.f32 %v6306_v9, %v6306_v9  ;;  %v8437_v9 = vld [vmem:[#allocation58_spill] sm:$0xff]  ;;  %v6406_v55 = vmul.f32 %v6346_v11, %v6346_v11 }
 0x28a   : > { %8409 = vst [vmem:[#allocation187_spill] sm:$0xff] %v6320_v22  ;;  %8411 = vst [vmem:[#allocation46_spill] sm:$0xff] %v6325_v45  ;;  %v6338_v1 = vmul.f32 0.0078125, %v8415_v63  ;;  %v6357_v63 = vmul.f32 %v8423_v41, %v8423_v41  ;;  %v6379_v41 = vmul.f32 %v6325_v45, %v6325_v45  ;;  %v6397_v27 = vmul.f32 0.0078125, %v8437_v9  ;;  %v8441_v45 = vld [vmem:[#allocation65_spill] sm:$0xff] }
 0x28b   : > { %8413 = vst [vmem:[#allocation188_spill] sm:$0xff] %v6329_v50  ;;  %8414 = vst [vmem:[#allocation189_spill] sm:$0xff] %v6333_v39  ;;  %v8421_v39 = vld [vmem:[#allocation116_spill] sm:$0xff]  ;;  %v6411_v49 = vmul.f32 0.0078125, %v8441_v45  ;;  %v6421_v9 = vmul.f32 %v6370_v36, %v6370_v36  ;;  %v8447_v45 = vld [vmem:[#allocation73_spill] sm:$0xff]  ;;  %2139 = vadd.xlane.f32.xlu1 %v6101_v24  ;;  %2137 = vadd.xlane.f32.xlu0 %v6105_v10 }
 0x28c   : > { %8416 = vst [vmem:[#allocation49_spill] sm:$0xff] %v6338_v1  ;;  %8418 = vst [vmem:[#allocation190_spill] sm:$0xff] %v6343_v58  ;;  %v6353_v22 = vmul.f32 %v8421_v39, %v8421_v39  ;;  %v8430_v39 = vld [vmem:[#allocation54_spill] sm:$0xff]  ;;  %v6375_v58 = vpop.xlane.xlu0 %1557  ;;  %v6392_v15 = vmul.f32 %v6338_v1, %v6338_v1  ;;  %v6417_v18 = vpop.xlane.xlu1 %1687  ;;  %v6447_v16 = vmul.f32 %v6397_v27, %v6397_v27  ;;  %v8465_v24 = vld [vmem:[#allocation97_spill] sm:$0xff] }
 0x28d   : > { %8420 = vst [vmem:[#allocation50_spill] sm:$0xff] %v6346_v11  ;;  %8424 = vst [vmem:[#allocation192_spill] sm:$0xff] %v6357_v63  ;;  %v6430_v11 = vmul.f32 0.0078125, %v8447_v45  ;;  %v6460_v56 = vmul.f32 %v6411_v49, %v6411_v49  ;;  %v8459_v45 = vld [vmem:[#allocation89_spill] sm:$0xff]  ;;  %v8594_v50 = vld [vmem:[#allocation166_spill] sm:$0xff] }
 0x28e   : > { %8422 = vst [vmem:[#allocation191_spill] sm:$0xff] %v6353_v22  ;;  %8426 = vst [vmem:[#allocation193_spill] sm:$0xff] %v6361_v48  ;;  %v6373_v22 = vmul.f32 0.0078125, %v8430_v39  ;;  %v8433_v48 = vld [vmem:[#allocation57_spill] sm:$0xff]  ;;  %v8443_v39 = vld [vmem:[#allocation66_spill] sm:$0xff] }
 0x28f   : > { %8427 = vst [vmem:[#allocation194_spill] sm:$0xff] %v6365_v13  ;;  %8429 = vst [vmem:[#allocation53_spill] sm:$0xff] %v6370_v36  ;;  %v6384_v13 = vmul.f32 0.0078125, %v8433_v48  ;;  %v6402_v48 = vmul.f32 %v5855_v26, %v5855_v26  ;;  %v6414_v1 = vmul.f32 0.0078125, %v8443_v39  ;;  %v8450_v26 = vld [vmem:[#allocation74_spill] sm:$0xff]  ;;  %2143 = vadd.xlane.f32.xlu1 %v6109_v12  ;;  %2141 = vadd.xlane.f32.xlu0 %v6113_v4  ;;  %v8483_v12 = vld [vmem:[#allocation121_spill] sm:$0xff] }
 0x290   : > { %8431 = vst [vmem:[#allocation54_spill] sm:$0xff] %v6373_v22  ;;  %8432 = vst [vmem:[#allocation195_spill] sm:$0xff] %v6379_v41  ;;  %v6427_v30 = vmul.f32 %v6373_v22, %v6373_v22  ;;  %v6432_v39 = vpop.xlane.xlu0 %1685  ;;  %v6443_v36 = vmul.f32 0.0078125, %v8450_v26  ;;  %v6455_v22 = vmul.f32 0.0078125, %v8455_v0  ;;  %v6478_v0 = vmul.f32 %v6430_v11, %v6430_v11 }
 0x291   : > { %8434 = vst [vmem:[#allocation57_spill] sm:$0xff] %v6384_v13  ;;  %8435 = vst [vmem:[#allocation196_spill] sm:$0xff] %v6388_v59  ;;  %v6438_v23 = vmul.f32 %v6384_v13, %v6384_v13  ;;  %v6466_v13 = vmul.f32 %v6414_v1, %v6414_v1  ;;  %v8577_v59 = vld [vmem:[#allocation148_spill] sm:$0xff] }
 0x292   : > { %8436 = vst [vmem:[#allocation197_spill] sm:$0xff] %v6392_v15  ;;  %8438 = vst [vmem:[#allocation58_spill] sm:$0xff] %v6397_v27  ;;  %v6469_v27 = vmul.f32 0.0078125, %v8459_v45  ;;  %v6489_v10 = vmul.f32 %v6443_v36, %v6443_v36 }
 0x293   : > { %8439 = vst [vmem:[#allocation198_spill] sm:$0xff] %v6402_v48  ;;  %8440 = vst [vmem:[#allocation199_spill] sm:$0xff] %v6406_v55  ;;  %2147 = vadd.xlane.f32.xlu1 %v6119_v42  ;;  %2145 = vadd.xlane.f32.xlu0 %v6123_v46  ;;  %v8502_v46 = vld [vmem:[#allocation129_spill] sm:$0xff] }
 0x294   : > { %8442 = vst [vmem:[#allocation65_spill] sm:$0xff] %v6411_v49  ;;  %8444 = vst [vmem:[#allocation66_spill] sm:$0xff] %v6414_v1  ;;  %v8462_v49 = vld [vmem:[#allocation90_spill] sm:$0xff]  ;;  %v6485_v14 = vpop.xlane.xlu0 %1561  ;;  %v6494_v1 = vmul.f32 0.0078125, %v8465_v24  ;;  %v6517_v24 = vmul.f32 %v6469_v27, %v6469_v27 }
 0x295   : > { %8445 = vst [vmem:[#allocation200_spill] sm:$0xff] %v6421_v9  ;;  %8446 = vst [vmem:[#allocation201_spill] sm:$0xff] %v6427_v30  ;;  %v8453_v30 = vld [vmem:[#allocation81_spill] sm:$0xff]  ;;  %v6483_v38 = vmul.f32 0.0078125, %v8462_v49  ;;  %v8474_v49 = vld [vmem:[#allocation107_spill] sm:$0xff] }
 0x296   : > { %8448 = vst [vmem:[#allocation73_spill] sm:$0xff] %v6430_v11  ;;  %8449 = vst [vmem:[#allocation202_spill] sm:$0xff] %v6438_v23  ;;  %v6452_v9 = vmul.f32 0.0078125, %v8453_v30  ;;  %v6472_v30 = vpop.xlane.xlu1 %1563  ;;  %v6507_v11 = vmul.f32 %v6455_v22, %v6455_v22  ;;  %v6543_v4 = vmul.f32 %v6494_v1, %v6494_v1  ;;  %v8561_v23 = vld [vmem:[#allocation144_spill] sm:$0xff] }
 0x297   : > { %8451 = vst [vmem:[#allocation74_spill] sm:$0xff] %v6443_v36  ;;  %8452 = vst [vmem:[#allocation203_spill] sm:$0xff] %v6447_v16  ;;  %v6529_v17 = vmul.f32 %v6483_v38, %v6483_v38  ;;  %v6537_v36 = vmul.f32 0.0078125, %v8479_v6  ;;  %v6573_v6 = vmul.f32 0.0078125, %v5867_v3  ;;  %v6592_v3 = vmul.f32 0.0078125, %v5901_v37  ;;  %2151 = vadd.xlane.f32.xlu1 %v8504_v61  ;;  %v8516_v37 = vld [vmem:[#allocation132_spill] sm:$0xff] }
 0x298   : > { %8454 = vst [vmem:[#allocation81_spill] sm:$0xff] %v6452_v9  ;;  %8456 = vst [vmem:[#allocation82_spill] sm:$0xff] %v6455_v22  ;;  %v6501_v26 = vmul.f32 %v6452_v9, %v6452_v9  ;;  %v6522_v9 = vmul.f32 0.0078125, %v8474_v49  ;;  %v6534_v22 = vmul.f32 0.0078125, %v8477_v21  ;;  %v6539_v45 = vpop.xlane.xlu0 %1689  ;;  %v6558_v21 = vmul.f32 %v6510_v54, %v6510_v54  ;;  %v8518_v61 = vld [vmem:[#allocation133_spill] sm:$0xff] }
 0x299   : > { %8457 = vst [vmem:[#allocation204_spill] sm:$0xff] %v6460_v56  ;;  %8458 = vst [vmem:[#allocation205_spill] sm:$0xff] %v6466_v13  ;;  %v6622_v54 = vmul.f32 %v6573_v6, %v6573_v6  ;;  %v6640_v43 = vmul.f32 %v6592_v3, %v6592_v3  ;;  %v6776_v55 = vmul.f32 0.0078125, %v8561_v23  ;;  %v8563_v13 = vld [vmem:[#allocation145_spill] sm:$0xff]  ;;  %v8571_v23 = vld [vmem:[#allocation159_spill] sm:$0xff] }
 0x29a   : > { %8460 = vst [vmem:[#allocation89_spill] sm:$0xff] %v6469_v27  ;;  %8461 = vst [vmem:[#allocation206_spill] sm:$0xff] %v6478_v0  ;;  %v6525_v40 = vpop.xlane.xlu1 %1691  ;;  %v6549_v27 = vmul.f32 %v6497_v44, %v6497_v44  ;;  %v6568_v49 = vmul.f32 %v6522_v9, %v6522_v9  ;;  %v6576_v44 = vmul.f32 0.0078125, %v5873_v34  ;;  %v6583_v42 = vmul.f32 %v6534_v22, %v6534_v22 }
 0x29b   : > { %8463 = vst [vmem:[#allocation90_spill] sm:$0xff] %v6483_v38  ;;  %8464 = vst [vmem:[#allocation207_spill] sm:$0xff] %v6489_v10  ;;  %v6552_v38 = vmul.f32 0.0078125, %v8483_v12  ;;  %v6589_v12 = vmul.f32 %v6537_v36, %v6537_v36  ;;  %v8558_v10 = vld [vmem:[#allocation143_spill] sm:$0xff] }
 0x29c   : > { %8466 = vst [vmem:[#allocation97_spill] sm:$0xff] %v6494_v1  ;;  %8469 = vst [vmem:[#allocation208_spill] sm:$0xff] %v6501_v26  ;;  %v6594_v34 = vpop.xlane.xlu0 %1565  ;;  %v6614_v1 = vmul.f32 0.0078125, %v8500_v35  ;;  %v6628_v51 = vmul.f32 %v6576_v44, %v6576_v44  ;;  %v8509_v35 = vld [vmem:[#allocation153_spill] sm:$0xff] }
 0x29d   : > { %8470 = vst [vmem:[#allocation209_spill] sm:$0xff] %v6507_v11  ;;  %8473 = vst [vmem:[#allocation210_spill] sm:$0xff] %v6517_v24  ;;  %2149 = vadd.xlane.f32.xlu0 %v8509_v35  ;;  %v8526_v35 = vld [vmem:[#allocation59_spill] sm:$0xff]  ;;  %v8550_v26 = vld [vmem:[#allocation157_spill] sm:$0xff]  ;;  %v7008_v62 = vmul.f32 0.0078125, %v6594_v34 }
 0x29e   : > { %8475 = vst [vmem:[#allocation107_spill] sm:$0xff] %v6522_v9  ;;  %8476 = vst [vmem:[#allocation211_spill] sm:$0xff] %v6529_v17  ;;  %v6579_v7 = vpop.xlane.xlu1 %1567  ;;  %v6600_v9 = vmul.f32 %v6552_v38, %v6552_v38  ;;  %v8541_v17 = vld [vmem:[#allocation63_spill] sm:$0xff] }
 0x29f   : > { %8478 = vst [vmem:[#allocation113_spill] sm:$0xff] %v6534_v22  ;;  %8480 = vst [vmem:[#allocation115_spill] sm:$0xff] %v6537_v36  ;;  %v6605_v22 = vmul.f32 0.0078125, %v8496_v52  ;;  %v6617_v36 = vmul.f32 0.0078125, %v8502_v46  ;;  %v8513_v52 = vld [vmem:[#allocation131_spill] sm:$0xff] }
 0x2a0   : > { %8481 = vst [vmem:[#allocation212_spill] sm:$0xff] %v6543_v4  ;;  %8482 = vst [vmem:[#allocation213_spill] sm:$0xff] %v6549_v27  ;;  %v8542_v24 = vld [vmem:[#allocation139_spill] sm:$0xff] }
 0x2a1   : > { %8484 = vst [vmem:[#allocation121_spill] sm:$0xff] %v6552_v38  ;;  %8485 = vst [vmem:[#allocation214_spill] sm:$0xff] %v6558_v21  ;;  %v6651_v20 = vmul.f32 %v6605_v22, %v6605_v22  ;;  %v6669_v38 = vmul.f32 %v6617_v36, %v6617_v36  ;;  %v6725_v11 = vmul.f32 0.0078125, %v8542_v24 }
 0x2a2   : > { %8488 = vst [vmem:[#allocation215_spill] sm:$0xff] %v6568_v49  ;;  %8489 = vst [vmem:[#allocation216_spill] sm:$0xff] %v6573_v6  ;;  %v6634_v46 = vpop.xlane.xlu1 %1695  ;;  %v6663_v6 = vmul.f32 %v6614_v1, %v6614_v1  ;;  %v8544_v49 = vld [vmem:[#allocation156_spill] sm:$0xff] }
 0x2a3   : > { %8490 = vst [vmem:[#allocation217_spill] sm:$0xff] %v6576_v44  ;;  %8491 = vst [vmem:[#allocation218_spill] sm:$0xff] %v6583_v42  ;;  %v6656_v44 = vmul.f32 0.0078125, %v8516_v37 }
 0x2a4   : > { %8492 = vst [vmem:[#allocation219_spill] sm:$0xff] %v6589_v12  ;;  %8493 = vst [vmem:[#allocation220_spill] sm:$0xff] %v6592_v3  ;;  %v8527_v3 = vld [vmem:[#allocation135_spill] sm:$0xff]  ;;  %v8533_v12 = vld [vmem:[#allocation137_spill] sm:$0xff] }
 0x2a5   : > { %8494 = vst [vmem:[#allocation221_spill] sm:$0xff] %v6600_v9  ;;  %8497 = vst [vmem:[#allocation127_spill] sm:$0xff] %v6605_v22  ;;  %v6679_v22 = vmul.f32 %v6631_v8, %v6631_v8  ;;  %v6699_v42 = vmul.f32 0.0078125, %v8533_v12  ;;  %v8546_v12 = vld [vmem:[#allocation140_spill] sm:$0xff] }
 0x2a6   : > { %8498 = vst [vmem:[#allocation222_spill] sm:$0xff] %v6609_v31  ;;  %8501 = vst [vmem:[#allocation128_spill] sm:$0xff] %v6614_v1  ;;  %v8524_v31 = vld [vmem:[#allocation154_spill] sm:$0xff]  ;;  %v6684_v1 = vmul.f32 0.0078125, %v8527_v3  ;;  %v6705_v3 = vmul.f32 %v6656_v44, %v6656_v44 }
 0x2a7   : > { %8503 = vst [vmem:[#allocation129_spill] sm:$0xff] %v6617_v36  ;;  %8505 = vst [vmem:[#allocation152_spill] sm:$0xff] %v6622_v54  ;;  %v6645_v54 = vmul.f32 0.0078125, %v8513_v52  ;;  %2155 = vadd.xlane.f32.xlu1 %v8524_v31  ;;  %v8529_v52 = vld [vmem:[#allocation155_spill] sm:$0xff]  ;;  %v8531_v36 = vld [vmem:[#allocation136_spill] sm:$0xff] }
 0x2a8   : > { %8507 = vst [vmem:[#allocation223_spill] sm:$0xff] %v6628_v51  ;;  %8511 = vst [vmem:[#allocation130_spill] sm:$0xff] %v6640_v43  ;;  %v6647_v51 = vpop.xlane.xlu0 %1693  ;;  %v6659_v43 = vmul.f32 0.0078125, %v8518_v61  ;;  %2153 = vadd.xlane.f32.xlu0 %v8529_v52  ;;  %v6696_v37 = vmul.f32 0.0078125, %v8531_v36  ;;  %v8538_v61 = vld [vmem:[#allocation138_spill] sm:$0xff]  ;;  %v8548_v36 = vld [vmem:[#allocation141_spill] sm:$0xff]  ;;  %v6751_v52 = vmul.f32 %v6699_v42, %v6699_v42 }
 0x2a9   : > { %8514 = vst [vmem:[#allocation153_spill] sm:$0xff] %v6651_v20  ;;  %8517 = vst [vmem:[#allocation131_spill] sm:$0xff] %v6656_v44  ;;  %v8523_v20 = vld [vmem:[#allocation134_spill] sm:$0xff]  ;;  %v6691_v31 = vmul.f32 %v6645_v54, %v6645_v54  ;;  %v6714_v27 = vmul.f32 0.0078125, %v8538_v61  ;;  %v6730_v44 = vmul.f32 %v6684_v1, %v6684_v1  ;;  %v8545_v61 = vld [vmem:[#allocation64_spill] sm:$0xff] }
 0x2aa   : > { %8519 = vst [vmem:[#allocation132_spill] sm:$0xff] %v6659_v43  ;;  %8520 = vst [vmem:[#allocation133_spill] sm:$0xff] %v6663_v6  ;;  %v6672_v9 = vmul.f32 0.0078125, %v8523_v20  ;;  %v8530_v20 = vld [vmem:[#allocation60_spill] sm:$0xff]  ;;  %v6711_v21 = vmul.f32 %v6659_v43, %v6659_v43  ;;  %v6735_v43 = vmul.f32 0.0078125, %v8546_v12  ;;  %v6745_v24 = vmul.f32 %v6696_v37, %v6696_v37  ;;  %v8554_v12 = vld [vmem:[#allocation142_spill] sm:$0xff] }
 0x2ab   : > { %8522 = vst [vmem:[#allocation224_spill] sm:$0xff] %v6669_v38  ;;  %8528 = vst [vmem:[#allocation134_spill] sm:$0xff] %v6684_v1  ;;  %v6687_v38 = vpop.xlane.xlu1 %1571  ;;  %2159 = vadd.xlane.f32.xlu1 %v8544_v49  ;;  %v6754_v0 = vmul.f32 0.0078125, %v8554_v12  ;;  %v6762_v56 = vmul.f32 %v6714_v27, %v6714_v27  ;;  %v6771_v49 = vmul.f32 %v6725_v11, %v6725_v11  ;;  %v6861_v1 = vmul.f32 0.0078125, %v8594_v50 }
 0x2ac   : > { %8532 = vst [vmem:[#allocation154_spill] sm:$0xff] %v6696_v37  ;;  %8534 = vst [vmem:[#allocation59_spill] sm:$0xff] %v6699_v42  ;;  %v6701_v6 = vpop.xlane.xlu0 %1569  ;;  %v6720_v4 = vmul.f32 %v6672_v9, %v6672_v9  ;;  %2157 = vadd.xlane.f32.xlu0 %v8550_v26  ;;  %v6767_v37 = vmul.f32 0.0078125, %v8558_v10  ;;  %v6779_v42 = vmul.f32 0.0078125, %v8563_v13  ;;  %v8565_v26 = vld [vmem:[#allocation158_spill] sm:$0xff]  ;;  %v6784_v16 = vmul.f32 %v6735_v43, %v6735_v43  ;;  %v8574_v10 = vld [vmem:[#allocation147_spill] sm:$0xff] }
 0x2ad   : > { %8535 = vst [vmem:[#allocation135_spill] sm:$0xff] %v6705_v3  ;;  %8537 = vst [vmem:[#allocation155_spill] sm:$0xff] %v6711_v21  ;;  %v6738_v21 = vmul.f32 0.0078125, %v8548_v36  ;;  %v6807_v63 = vmul.f32 0.0078125, %v8574_v10  ;;  %v8590_v10 = vld [vmem:[#allocation162_spill] sm:$0xff]  ;;  %v6897_v50 = vmul.f32 0.0078125, %v6297_v25  ;;  %v6913_v2 = vmul.f32 %v6861_v1, %v6861_v1 }
 0x2ae   : > { %8539 = vst [vmem:[#allocation60_spill] sm:$0xff] %v6714_v27  ;;  %8543 = vst [vmem:[#allocation136_spill] sm:$0xff] %v6725_v11  ;;  %v6831_v15 = vmul.f32 %v6779_v42, %v6779_v42  ;;  %v8584_v27 = vld [vmem:[#allocation150_spill] sm:$0xff]  ;;  %v8585_v11 = vld [vmem:[#allocation160_spill] sm:$0xff]  ;;  %v6916_v25 = vmul.f32 0.0078125, %v6349_v57 }
 0x2af   : > { %8547 = vst [vmem:[#allocation137_spill] sm:$0xff] %v6735_v43  ;;  %8549 = vst [vmem:[#allocation138_spill] sm:$0xff] %v6738_v21  ;;  %v6741_v3 = vpop.xlane.xlu1 %1699  ;;  %2163 = vadd.xlane.f32.xlu1 %v8565_v26  ;;  %v6790_v41 = vmul.f32 %v6738_v21, %v6738_v21  ;;  %v6818_v21 = vmul.f32 0.0078125, %v8577_v59  ;;  %v8579_v26 = vld [vmem:[#allocation149_spill] sm:$0xff]  ;;  %v6825_v43 = vmul.f32 %v6776_v55, %v6776_v55 }
 0x2b0   : > { %8551 = vst [vmem:[#allocation63_spill] sm:$0xff] %v6745_v24  ;;  %8553 = vst [vmem:[#allocation139_spill] sm:$0xff] %v6751_v52  ;;  %v6756_v36 = vpop.xlane.xlu0 %1697  ;;  %v8569_v52 = vld [vmem:[#allocation146_spill] sm:$0xff]  ;;  %2161 = vadd.xlane.f32.xlu0 %v8571_v23  ;;  %v6821_v12 = vmul.f32 0.0078125, %v8579_v26  ;;  %v6834_v24 = vmul.f32 0.0078125, %v8584_v27  ;;  %v6876_v26 = vmul.f32 0.0078125, %v6233_v33 }
 0x2b1   : > { %8555 = vst [vmem:[#allocation156_spill] sm:$0xff] %v6754_v0  ;;  %8559 = vst [vmem:[#allocation64_spill] sm:$0xff] %v6767_v37  ;;  %v6793_v48 = vmul.f32 0.0078125, %v8569_v52  ;;  %v6813_v52 = vmul.f32 %v6767_v37, %v6767_v37  ;;  %v6887_v27 = vmul.f32 0.0078125, %v6249_v60  ;;  %v8602_v33 = vld [vmem:[#allocation86_spill] sm:$0xff] }
 0x2b2   : > { %8562 = vst [vmem:[#allocation140_spill] sm:$0xff] %v6776_v55  ;;  %8564 = vst [vmem:[#allocation141_spill] sm:$0xff] %v6779_v42  ;;  %v8592_v42 = vld [vmem:[#allocation161_spill] sm:$0xff] }
 0x2b3   : > { %8566 = vst [vmem:[#allocation157_spill] sm:$0xff] %v6784_v16  ;;  %8568 = vst [vmem:[#allocation142_spill] sm:$0xff] %v6790_v41  ;;  %v6796_v13 = vpop.xlane.xlu1 %1575  ;;  %v6802_v16 = vmul.f32 %v6754_v0, %v6754_v0  ;;  %2167 = vadd.xlane.f32.xlu1 %v8585_v11  ;;  %v6841_v37 = vmul.f32 %v6793_v48, %v6793_v48  ;;  %v8588_v0 = vld [vmem:[#allocation151_spill] sm:$0xff]  ;;  %v6853_v11 = vmul.f32 %v6807_v63, %v6807_v63 }
 0x2b4   : > { %8570 = vst [vmem:[#allocation143_spill] sm:$0xff] %v6793_v48  ;;  %8575 = vst [vmem:[#allocation144_spill] sm:$0xff] %v6807_v63  ;;  %v6809_v41 = vpop.xlane.xlu0 %1573  ;;  %v6846_v55 = vmul.f32 0.0078125, %v8588_v0  ;;  %2165 = vadd.xlane.f32.xlu0 %v8590_v10  ;;  %v6858_v59 = vmul.f32 0.0078125, %v8592_v42  ;;  %v6867_v0 = vmul.f32 %v6818_v21, %v6818_v21  ;;  %v6873_v48 = vmul.f32 %v6821_v12, %v6821_v12  ;;  %v8599_v63 = vld [vmem:[#allocation85_spill] sm:$0xff]  ;;  %v8601_v10 = vld [vmem:[#allocation163_spill] sm:$0xff] }
 0x2b5   : > { %8578 = vst [vmem:[#allocation145_spill] sm:$0xff] %v6818_v21  ;;  %8580 = vst [vmem:[#allocation158_spill] sm:$0xff] %v6821_v12  ;;  %v6882_v42 = vmul.f32 %v6834_v24, %v6834_v24  ;;  %v6900_v12 = vmul.f32 0.0078125, %v6308_v19  ;;  %v6936_v57 = vmul.f32 %v6887_v27, %v6887_v27 }
 0x2b6   : > { %8581 = vst [vmem:[#allocation146_spill] sm:$0xff] %v6825_v43  ;;  %8583 = vst [vmem:[#allocation159_spill] sm:$0xff] %v6831_v15  ;;  %v8587_v43 = vld [vmem:[#allocation79_spill] sm:$0xff]  ;;  %v6892_v21 = vmul.f32 %v6846_v55, %v6846_v55  ;;  %v6907_v60 = vmul.f32 %v6858_v59, %v6858_v59 }
 0x2b7   : > { %8589 = vst [vmem:[#allocation147_spill] sm:$0xff] %v6846_v55  ;;  %v6849_v15 = vpop.xlane.xlu1 %1703  ;;  %8593 = vst [vmem:[#allocation148_spill] sm:$0xff] %v6858_v59  ;;  %2171 = vadd.xlane.f32.xlu1 %v8601_v10  ;;  %v6930_v10 = vmul.f32 0.0078125, %v6417_v18  ;;  %v8611_v59 = vld [vmem:[#allocation91_spill] sm:$0xff]  ;;  %v6952_v53 = vmul.f32 %v6900_v12, %v6900_v12  ;;  %v6969_v18 = vmul.f32 0.0078125, %v6485_v14 }
 0x2b8   : > { %8595 = vst [vmem:[#allocation149_spill] sm:$0xff] %v6861_v1  ;;  %v6863_v23 = vpop.xlane.xlu0 %1701  ;;  %8596 = vst [vmem:[#allocation150_spill] sm:$0xff] %v6867_v0  ;;  %2169 = vadd.xlane.f32.xlu0 %v8605_v29  ;;  %v6941_v1 = vmul.f32 0.0078125, %v6432_v39  ;;  %v8619_v29 = vld [vmem:[#allocation167_spill] sm:$0xff] }
 0x2b9   : > { %8597 = vst [vmem:[#allocation160_spill] sm:$0xff] %v6873_v48  ;;  %8598 = vst [vmem:[#allocation79_spill] sm:$0xff] %v6876_v26  ;;  %v6924_v48 = vmul.f32 %v6876_v26, %v6876_v26  ;;  %v6955_v26 = vmul.f32 0.0078125, %v6472_v30  ;;  %v8621_v55 = vld [vmem:[#allocation95_spill] sm:$0xff] }
 0x2ba   : > { %8600 = vst [vmem:[#allocation151_spill] sm:$0xff] %v6887_v27  ;;  %8603 = vst [vmem:[#allocation162_spill] sm:$0xff] %v6897_v50  ;;  %v6981_v27 = vmul.f32 %v6930_v10, %v6930_v10 }
 0x2bb   : > { %8604 = vst [vmem:[#allocation161_spill] sm:$0xff] %v6900_v12  ;;  %v6903_v0 = vpop.xlane.xlu1 %1579  ;;  %8606 = vst [vmem:[#allocation166_spill] sm:$0xff] %v6907_v60  ;;  %v6927_v60 = vmul.f32 0.0078125, %v6375_v58  ;;  %2175 = vadd.xlane.f32.xlu1 %v8614_v47  ;;  %v6946_v58 = vmul.f32 %v6897_v50, %v6897_v50  ;;  %v6984_v12 = vmul.f32 0.0078125, %v6525_v40  ;;  %v6990_v50 = vmul.f32 %v6941_v1, %v6941_v1 }
 0x2bc   : > { %8607 = vst [vmem:[#allocation85_spill] sm:$0xff] %v6913_v2  ;;  %8608 = vst [vmem:[#allocation163_spill] sm:$0xff] %v6916_v25  ;;  %v6918_v19 = vpop.xlane.xlu0 %1577  ;;  %2173 = vadd.xlane.f32.xlu0 %v8619_v29  ;;  %v8623_v29 = vld [vmem:[#allocation96_spill] sm:$0xff]  ;;  %v6993_v47 = vmul.f32 0.0078125, %v6539_v45  ;;  %v7003_v40 = vmul.f32 %v6955_v26, %v6955_v26  ;;  %v8632_v45 = vld [vmem:[#allocation169_spill] sm:$0xff] }
 0x2bd   : > { %8609 = vst [vmem:[#allocation86_spill] sm:$0xff] %v6927_v60  ;;  %8610 = vst [vmem:[#allocation164_spill] sm:$0xff] %v6930_v10  ;;  %v6975_v30 = vmul.f32 %v6927_v60, %v6927_v60  ;;  %v8629_v2 = vld [vmem:[#allocation168_spill] sm:$0xff]  ;;  %v7025_v34 = vmul.f32 %v6984_v12, %v6984_v12 }
 0x2be   : > { %8613 = vst [vmem:[#allocation91_spill] sm:$0xff] %v6941_v1  ;;  %8615 = vst [vmem:[#allocation165_spill] sm:$0xff] %v6946_v58  ;;  %v6964_v58 = vmul.f32 %v6916_v25, %v6916_v25  ;;  %v6996_v25 = vmul.f32 0.0078125, %v6579_v7  ;;  %v7013_v7 = vmul.f32 %v6969_v18, %v6969_v18 }
 0x2bf   : > { %8617 = vst [vmem:[#allocation225_spill] sm:$0xff] %v6952_v53  ;;  %8618 = vst [vmem:[#allocation226_spill] sm:$0xff] %v6955_v26  ;;  %v6958_v39 = vpop.xlane.xlu1 %1707  ;;  %2179 = vadd.xlane.f32.xlu1 %v8629_v2  ;;  %v7016_v2 = vmul.f32 0.0078125, %v6634_v46  ;;  %v7032_v46 = vmul.f32 %v6993_v47, %v6993_v47 }
 0x2c0   : > { %8622 = vst [vmem:[#allocation167_spill] sm:$0xff] %v6969_v18  ;;  %v6971_v53 = vpop.xlane.xlu0 %1705  ;;  %8624 = vst [vmem:[#allocation95_spill] sm:$0xff] %v6981_v27  ;;  %2177 = vadd.xlane.f32.xlu0 %v8632_v45  ;;  %v7019_v27 = vmul.f32 0.0078125, %v6647_v51  ;;  %v7028_v45 = vmul.f32 0.0078125, %v6687_v38  ;;  %v7036_v51 = vmul.f32 %v6996_v25, %v6996_v25  ;;  %v8640_v18 = vld [vmem:[#allocation170_spill] sm:$0xff]  ;;  %v7044_v38 = vmul.f32 %v7008_v62, %v7008_v62 }
 0x2c1   : > { %8625 = vst [vmem:[#allocation96_spill] sm:$0xff] %v6984_v12  ;;  %8626 = vst [vmem:[#allocation227_spill] sm:$0xff] %v6990_v50 }
 0x2c2   : > { %8627 = vst [vmem:[#allocation228_spill] sm:$0xff] %v6993_v47  ;;  %8628 = vst [vmem:[#allocation229_spill] sm:$0xff] %v6996_v25  ;;  %v7049_v47 = vmul.f32 0.0078125, %v6701_v6  ;;  %v7063_v6 = vmul.f32 %v7028_v45, %v7028_v45 }
 0x2c3   : > { %8631 = vst [vmem:[#allocation168_spill] sm:$0xff] %v7008_v62  ;;  %v2044_v50 = vpop.xlane.xlu1 %2043  ;;  %8633 = vst [vmem:[#allocation169_spill] sm:$0xff] %v7016_v2  ;;  %2183 = vadd.xlane.f32.xlu1 %v8640_v18  ;;  %v8649_v62 = vld [vmem:[#allocation174_spill] sm:$0xff] }
 0x2c4   : > { %8634 = vst [vmem:[#allocation230_spill] sm:$0xff] %v7019_v27  ;;  %v2260_v1 = vmul.f32 0.0078125, %v2044_v50  ;;  %v2042_v5 = vpop.xlane.xlu0 %2041  ;;  %8636 = vst [vmem:[#allocation231_spill] sm:$0xff] %v7025_v34  ;;  %v8639_v50 = vld [vmem:[#allocation106_spill] sm:$0xff]  ;;  %v8642_v34 = vld [vmem:[#allocation171_spill] sm:$0xff] }
 0x2c5   : > { %8637 = vst [vmem:[#allocation232_spill] sm:$0xff] %v7028_v45  ;;  %v2259_v14 = vmul.f32 0.0078125, %v2042_v5  ;;  %8638 = vst [vmem:[#allocation233_spill] sm:$0xff] %v7032_v46  ;;  %v8641_v5 = vld [vmem:[#allocation108_spill] sm:$0xff]  ;;  %2181 = vadd.xlane.f32.xlu0 %v8642_v34 }
 0x2c6   : > { %v2516_v26 = vsub.f32 %v2260_v1, %v6679_v22  ;;  %v7055_v1 = vmul.f32 %v7016_v2, %v7016_v2  ;;  %v7059_v22 = vmul.f32 %v7019_v27, %v7019_v27 }
 0x2c7   : > { %v2515_v46 = vsub.f32 %v2259_v14, %v6691_v31  ;;  %v2048_v10 = vpop.xlane.xlu1 %2047  ;;  %v7066_v31 = vmul.f32 0.0078125, %v6741_v3  ;;  %v7080_v3 = vmul.f32 0.0078125, %v6796_v13 }
 0x2c8   : > { %8643 = vst [vmem:[#allocation106_spill] sm:$0xff] %v7055_v1  ;;  %8644 = vst [vmem:[#allocation170_spill] sm:$0xff] %v7059_v22  ;;  %v2644_v18 = vmax.f32 %v2516_v26, 0.0  ;;  %v2262_v60 = vmul.f32 0.0078125, %v2048_v10  ;;  %v2046_v25 = vpop.xlane.xlu0 %2045  ;;  %v7071_v1 = vmul.f32 0.0078125, %v6756_v36  ;;  %v8648_v10 = vld [vmem:[#allocation173_spill] sm:$0xff]  ;;  %v7077_v22 = vmul.f32 %v7049_v47, %v7049_v47 }
 0x2c9   : > { %8645 = vst [vmem:[#allocation108_spill] sm:$0xff] %v7066_v31  ;;  %v2643_v14 = vmax.f32 %v2515_v46, 0.0  ;;  %v2261_v34 = vmul.f32 0.0078125, %v2046_v25  ;;  %2187 = vadd.xlane.f32.xlu1 %v8648_v10  ;;  %2185 = vadd.xlane.f32.xlu0 %v8649_v62  ;;  %v8650_v36 = vld [vmem:[#allocation112_spill] sm:$0xff]  ;;  %v7088_v45 = vmul.f32 %v7066_v31, %v7066_v31  ;;  %v7095_v62 = vmul.f32 0.0078125, %v6809_v41  ;;  %v8654_v41 = vld [vmem:[#allocation117_spill] sm:$0xff] }
 0x2ca   : > { %8647 = vst [vmem:[#allocation171_spill] sm:$0xff] %v7071_v1  ;;  %v2772_v27 = vadd.f32 1e-05, %v2644_v18  ;;  %v2518_v26 = vsub.f32 %v2262_v60, %v6720_v4 }
 0x2cb   : > { %v2771_v46 = vadd.f32 1e-05, %v2643_v14  ;;  %v2517_v25 = vsub.f32 %v2261_v34, %v6730_v44  ;;  %v2052_v2 = vpop.xlane.xlu1 %2051  ;;  %v7092_v44 = vmul.f32 %v7071_v1, %v7071_v1  ;;  %v8651_v34 = vld [vmem:[#allocation175_spill] sm:$0xff]  ;;  %v7111_v1 = vmul.f32 0.0078125, %v6863_v23 }
 0x2cc   : > { %4310 = vrsqrt.f32 %v2772_v27  ;;  %v2646_v4 = vmax.f32 %v2518_v26, 0.0  ;;  %v2264_v60 = vmul.f32 0.0078125, %v2052_v2  ;;  %v2050_v10 = vpop.xlane.xlu0 %2049  ;;  %v7101_v2 = vmul.f32 %v7080_v3, %v7080_v3 }
 0x2cd   : > { %4312 = vrsqrt.f32 %v2771_v46  ;;  %v2645_v13 = vmax.f32 %v2517_v25, 0.0  ;;  %v2263_v12 = vmul.f32 0.0078125, %v2050_v10  ;;  %2191 = vadd.xlane.f32.xlu1 %v8651_v34  ;;  %v7104_v26 = vmul.f32 0.0078125, %v6849_v15  ;;  %v8653_v10 = vld [vmem:[#allocation176_spill] sm:$0xff]  ;;  %8655 = vst [vmem:[#allocation174_spill] sm:$0xff] %v7111_v1 }
 0x2ce   : > { %v2774_v14 = vadd.f32 1e-05, %v2646_v4  ;;  %v2520_v27 = vsub.f32 %v2264_v60, %v6762_v56  ;;  %2189 = vadd.xlane.f32.xlu0 %v8653_v10 }
 0x2cf   : > { %8652 = vst [vmem:[#allocation173_spill] sm:$0xff] %v7104_v26  ;;  %v2773_v46 = vadd.f32 1e-05, %v2645_v13  ;;  %v2519_v25 = vsub.f32 %v2263_v12, %v6771_v49  ;;  %v2056_v18 = vpop.xlane.xlu1 %2055  ;;  %v7115_v13 = vmul.f32 %v7095_v62, %v7095_v62  ;;  %v7118_v49 = vmul.f32 0.0078125, %v6903_v0 }
 0x2d0   : > { %4314 = vrsqrt.f32 %v2774_v14  ;;  %v2648_v56 = vmax.f32 %v2520_v27, 0.0  ;;  %v2266_v60 = vmul.f32 0.0078125, %v2056_v18  ;;  %v2054_v34 = vpop.xlane.xlu0 %2053  ;;  %v8656_v14 = vld [vmem:[#allocation178_spill] sm:$0xff]  ;;  %v7126_v23 = vmul.f32 %v7104_v26, %v7104_v26 }
 0x2d1   : > { %4316 = vrsqrt.f32 %v2773_v46  ;;  %v2647_v31 = vmax.f32 %v2519_v25, 0.0  ;;  %v2265_v15 = vmul.f32 0.0078125, %v2054_v34  ;;  %2195 = vadd.xlane.f32.xlu1 %v8656_v14  ;;  %v8657_v18 = vld [vmem:[#allocation118_spill] sm:$0xff]  ;;  %v8658_v34 = vld [vmem:[#allocation179_spill] sm:$0xff]  ;;  %v7131_v0 = vmul.f32 0.0078125, %v6918_v19 }
 0x2d2   : > { %v2776_v12 = vadd.f32 1e-05, %v2648_v56  ;;  %v2522_v10 = vsub.f32 %v2266_v60, %v6802_v16  ;;  %2193 = vadd.xlane.f32.xlu0 %v8658_v34  ;;  %v7135_v14 = vmul.f32 %v7111_v1, %v7111_v1  ;;  %v8663_v34 = vld [vmem:[#allocation182_spill] sm:$0xff] }
 0x2d3   : > { %v2775_v46 = vadd.f32 1e-05, %v2647_v31  ;;  %v2521_v25 = vsub.f32 %v2265_v15, %v6813_v52  ;;  %v2060_v4 = vpop.xlane.xlu1 %2059  ;;  %v7139_v52 = vmul.f32 %v7118_v49, %v7118_v49  ;;  %v7142_v31 = vmul.f32 0.0078125, %v6958_v39 }
 0x2d4   : > { %4318 = vrsqrt.f32 %v2776_v12  ;;  %v2650_v16 = vmax.f32 %v2522_v10, 0.0  ;;  %v2268_v56 = vmul.f32 0.0078125, %v2060_v4  ;;  %v2058_v60 = vpop.xlane.xlu0 %2057  ;;  %8659 = vst [vmem:[#allocation112_spill] sm:$0xff] %v7135_v14  ;;  %v8661_v4 = vld [vmem:[#allocation122_spill] sm:$0xff]  ;;  %v7149_v10 = vmul.f32 0.0078125, %v6971_v53  ;;  %v8664_v12 = vld [vmem:[#allocation124_spill] sm:$0xff] }
 0x2d5   : > { %4320 = vrsqrt.f32 %v2775_v46  ;;  %v2649_v27 = vmax.f32 %v2521_v25, 0.0  ;;  %v2267_v26 = vmul.f32 0.0078125, %v2058_v60  ;;  %8660 = vst [vmem:[#allocation175_spill] sm:$0xff] %v7142_v31  ;;  %2199 = vadd.xlane.f32.xlu1 %v6280_v32  ;;  %v7155_v39 = vmul.f32 %v7131_v0, %v7131_v0 }
 0x2d6   : > { %v2778_v19 = vadd.f32 1e-05, %v2650_v16  ;;  %v2524_v15 = vsub.f32 %v2268_v56, %v6841_v37  ;;  %8662 = vst [vmem:[#allocation176_spill] sm:$0xff] %v7149_v10  ;;  %2197 = vadd.xlane.f32.xlu0 %v8663_v34 }
 0x2d7   : > { %v2777_v46 = vadd.f32 1e-05, %v2649_v27  ;;  %v2523_v25 = vsub.f32 %v2267_v26, %v6853_v11  ;;  %v2064_v60 = vpop.xlane.xlu1 %2063  ;;  %v7161_v11 = vmul.f32 %v7142_v31, %v7142_v31  ;;  %v8665_v26 = vsub.f32 %v8526_v35, %v6631_v8  ;;  %v8667_v31 = vld [vmem:[#allocation185_spill] sm:$0xff] }
 0x2d8   : > { %4322 = vrsqrt.f32 %v2778_v19  ;;  %v2652_v37 = vmax.f32 %v2524_v15, 0.0  ;;  %v2270_v16 = vmul.f32 0.0078125, %v2064_v60  ;;  %v2062_v32 = vpop.xlane.xlu0 %2061  ;;  %v7170_v60 = vmul.f32 %v7149_v10, %v7149_v10  ;;  %v7180_v35 = vld [vmem:[%s7861_s3] ss:$0 sm:$0xff] }
 0x2d9   : > { %v4311_v56 = vpop.eup %4310  ;;  %4324 = vrsqrt.f32 %v2777_v46  ;;  %v2651_v53 = vmax.f32 %v2523_v25, 0.0  ;;  %v2269_v27 = vmul.f32 0.0078125, %v2062_v32  ;;  %2203 = vadd.xlane.f32.xlu1 %v6301_v28  ;;  %v8666_v46 = vsub.f32 %v8530_v20, %v6645_v54 }
 0x2da   : > { %v4313_v14 = vpop.eup %4312  ;;  %v3156_v34 = vmul.f32 %v4311_v56, %v8665_v26  ;;  %v2780_v19 = vadd.f32 1e-05, %v2652_v37  ;;  %v2526_v15 = vsub.f32 %v2270_v16, %v6882_v42  ;;  %2201 = vadd.xlane.f32.xlu0 %v8667_v31  ;;  %v7187_v31 = vld [vmem:[%s7862_s4] ss:$0 sm:$0xff] }
 0x2db   : > { %v3155_v25 = vmul.f32 %v4313_v14, %v8666_v46  ;;  %v2779_v32 = vadd.f32 1e-05, %v2651_v53  ;;  %v2525_v1 = vsub.f32 %v2269_v27, %v6892_v21  ;;  %v2068_v8 = vpop.xlane.xlu1 %2067  ;;  %v8668_v27 = vsub.f32 %v8541_v17, %v6672_v9  ;;  %v8670_v46 = vld [vmem:[#allocation134_spill] sm:$0xff] }
 0x2dc   : > { %v3291_v28 = vmul.f32 %v7180_v35, %v3156_v34  ;;  %4326 = vrsqrt.f32 %v2780_v19  ;;  %v2654_v42 = vmax.f32 %v2526_v15, 0.0  ;;  %v2272_v37 = vmul.f32 0.0078125, %v2068_v8  ;;  %v2066_v16 = vpop.xlane.xlu0 %2065  ;;  %v8669_v15 = vld [vmem:[#allocation186_spill] sm:$0xff] }
 0x2dd   : > { %v4315_v56 = vpop.eup %4314  ;;  %v3290_v54 = vmul.f32 %v7180_v35, %v3155_v25  ;;  %4328 = vrsqrt.f32 %v2779_v32  ;;  %v2653_v21 = vmax.f32 %v2525_v1, 0.0  ;;  %v2271_v20 = vmul.f32 0.0078125, %v2066_v16  ;;  %2207 = vadd.xlane.f32.xlu1 %v8669_v15  ;;  %v8677_v15 = vld [vmem:[#allocation70_spill] sm:$0xff] }
 0x2de   : > { %v4317_v14 = vpop.eup %4316  ;;  %v3426_v53 = vadd.f32 %v7187_v31, %v3291_v28  ;;  %v3158_v26 = vmul.f32 %v4315_v56, %v8668_v27  ;;  %v2782_v34 = vadd.f32 1e-05, %v2654_v42  ;;  %v2528_v19 = vsub.f32 %v2272_v37, %v6924_v48  ;;  %v8672_v28 = vld [vmem:[#allocation188_spill] sm:$0xff] }
 0x2df   : > { %v3425_v1 = vadd.f32 %v7187_v31, %v3290_v54  ;;  %v8671_v25 = vsub.f32 %v8545_v61, %v8670_v46  ;;  %v2781_v8 = vadd.f32 1e-05, %v2653_v21  ;;  %v2527_v16 = vsub.f32 %v2271_v20, %v6936_v57  ;;  %2205 = vadd.xlane.f32.xlu0 %v8672_v28  ;;  %v2072_v10 = vpop.xlane.xlu1 %2071  ;;  %v8673_v20 = vld [vmem:[#allocation69_spill] sm:$0xff] }
 0x2e0   : > { %3554 = vst [vmem:[%s5255_s6 + $0x138] sm:$0xff] %v3426_v53  ;;  %v3293_v9 = vmul.f32 %v7180_v35, %v3158_v26  ;;  %4330 = vrsqrt.f32 %v2782_v34  ;;  %v2656_v17 = vmax.f32 %v2528_v19, 0.0  ;;  %v2274_v48 = vmul.f32 0.0078125, %v2072_v10  ;;  %v2070_v42 = vpop.xlane.xlu0 %2069  ;;  %v8676_v34 = vld [vmem:[#allocation190_spill] sm:$0xff] }
 0x2e1   : > { %v3157_v32 = vmul.f32 %v4317_v14, %v8671_v25  ;;  %v4319_v37 = vpop.eup %4318  ;;  %3553 = vst [vmem:[%s5255_s6 + $0x130] sm:$0xff] %v3425_v1  ;;  %4332 = vrsqrt.f32 %v2781_v8  ;;  %v2655_v61 = vmax.f32 %v2527_v16, 0.0  ;;  %v2273_v54 = vmul.f32 0.0078125, %v2070_v42  ;;  %v8674_v14 = vld [vmem:[#allocation60_spill] sm:$0xff]  ;;  %2211 = vadd.xlane.f32.xlu1 %v8676_v34  ;;  %v8680_v16 = vld [vmem:[#allocation191_spill] sm:$0xff] }
 0x2e2   : > { %v4321_v21 = vpop.eup %4320  ;;  %v3428_v57 = vadd.f32 %v7187_v31, %v3293_v9  ;;  %v8675_v53 = vsub.f32 %v8673_v20, %v8674_v14  ;;  %v2784_v26 = vadd.f32 1e-05, %v2656_v17  ;;  %v2530_v10 = vsub.f32 %v2274_v48, %v6964_v58  ;;  %v8678_v1 = vld [vmem:[#allocation136_spill] sm:$0xff] }
 0x2e3   : > { %v3292_v56 = vmul.f32 %v7180_v35, %v3157_v32  ;;  %v8679_v46 = vsub.f32 %v8677_v15, %v8678_v1  ;;  %v2783_v32 = vadd.f32 1e-05, %v2655_v61  ;;  %v2529_v8 = vsub.f32 %v2273_v54, %v6975_v30  ;;  %2209 = vadd.xlane.f32.xlu0 %v8680_v16  ;;  %v2076_v28 = vpop.xlane.xlu1 %2075  ;;  %v8681_v54 = vld [vmem:[#allocation75_spill] sm:$0xff]  ;;  %v8682_v20 = vld [vmem:[#allocation156_spill] sm:$0xff] }
 0x2e4   : > { %v3160_v27 = vmul.f32 %v4319_v37, %v8675_v53  ;;  %3556 = vst [vmem:[%s5255_s6 + $0x148] sm:$0xff] %v3428_v57  ;;  %4334 = vrsqrt.f32 %v2784_v26  ;;  %v2658_v17 = vmax.f32 %v2530_v10, 0.0  ;;  %v2276_v58 = vmul.f32 0.0078125, %v2076_v28  ;;  %v2074_v48 = vpop.xlane.xlu0 %2073  ;;  %v8684_v26 = vld [vmem:[#allocation192_spill] sm:$0xff] }
 0x2e5   : > { %v3427_v19 = vadd.f32 %v7187_v31, %v3292_v56  ;;  %v3159_v25 = vmul.f32 %v4321_v21, %v8679_v46  ;;  %v4323_v42 = vpop.eup %4322  ;;  %4336 = vrsqrt.f32 %v2783_v32  ;;  %v2657_v56 = vmax.f32 %v2529_v8, 0.0  ;;  %2215 = vadd.xlane.f32.xlu1 %v8684_v26  ;;  %v8685_v34 = vld [vmem:[#allocation76_spill] sm:$0xff]  ;;  %v8688_v32 = vld [vmem:[#allocation193_spill] sm:$0xff] }
 0x2e6   : > { %v3295_v9 = vmul.f32 %v7180_v35, %v3160_v27  ;;  %v2275_v61 = vmul.f32 0.0078125, %v2074_v48  ;;  %v4325_v21 = vpop.eup %4324  ;;  %v8683_v57 = vsub.f32 %v8681_v54, %v8682_v20  ;;  %v2786_v53 = vadd.f32 1e-05, %v2658_v17  ;;  %v8691_v20 = vld [vmem:[#allocation196_spill] sm:$0xff] }
 0x2e7   : > { %3555 = vst [vmem:[%s5255_s6 + $0x140] sm:$0xff] %v3427_v19  ;;  %v3294_v37 = vmul.f32 %v7180_v35, %v3159_v25  ;;  %v2532_v27 = vsub.f32 %v2276_v58, %v7003_v40  ;;  %v8686_v19 = vld [vmem:[#allocation64_spill] sm:$0xff]  ;;  %v2785_v46 = vadd.f32 1e-05, %v2657_v56  ;;  %2213 = vadd.xlane.f32.xlu0 %v8688_v32  ;;  %v2080_v8 = vpop.xlane.xlu1 %2079  ;;  %v8689_v56 = vld [vmem:[#allocation143_spill] sm:$0xff] }
 0x2e8   : > { %v3430_v30 = vadd.f32 %v7187_v31, %v3295_v9  ;;  %v3162_v14 = vmul.f32 %v4323_v42, %v8683_v57  ;;  %v8687_v15 = vsub.f32 %v8685_v34, %v8686_v19  ;;  %v2531_v25 = vsub.f32 %v2275_v61, %v7013_v7  ;;  %v2078_v9 = vpop.xlane.xlu0 %2077  ;;  %v8695_v19 = vld [vmem:[#allocation198_spill] sm:$0xff] }
 0x2e9   : > { %v3429_v10 = vadd.f32 %v7187_v31, %v3294_v37  ;;  %4338 = vrsqrt.f32 %v2786_v53  ;;  %v2660_v28 = vmax.f32 %v2532_v27, 0.0  ;;  %v2278_v40 = vmul.f32 0.0078125, %v2080_v8  ;;  %v4327_v17 = vpop.eup %4326  ;;  %2219 = vadd.xlane.f32.xlu1 %v8691_v20  ;;  %v8693_v53 = vld [vmem:[#allocation144_spill] sm:$0xff] }
 0x2ea   : > { %v3161_v1 = vmul.f32 %v4325_v21, %v8687_v15  ;;  %3558 = vst [vmem:[%s5255_s6 + $0x158] sm:$0xff] %v3430_v30  ;;  %v3297_v16 = vmul.f32 %v7180_v35, %v3162_v14  ;;  %4340 = vrsqrt.f32 %v2785_v46  ;;  %v2659_v48 = vmax.f32 %v2531_v25, 0.0  ;;  %v4329_v37 = vpop.eup %4328  ;;  %v8692_v14 = vld [vmem:[#allocation80_spill] sm:$0xff] }
 0x2eb   : > { %3557 = vst [vmem:[%s5255_s6 + $0x150] sm:$0xff] %v3429_v10  ;;  %v2277_v42 = vmul.f32 0.0078125, %v2078_v9  ;;  %v8690_v61 = vsub.f32 %v8587_v43, %v8689_v56  ;;  %v2788_v30 = vadd.f32 1e-05, %v2660_v28  ;;  %v2534_v54 = vsub.f32 %v2278_v40, %v7036_v51  ;;  %2217 = vadd.xlane.f32.xlu0 %v8695_v19  ;;  %v2084_v15 = vpop.xlane.xlu1 %2083 }
 0x2ec   : > { %v3296_v58 = vmul.f32 %v7180_v35, %v3161_v1  ;;  %v3432_v7 = vadd.f32 %v7187_v31, %v3297_v16  ;;  %v8694_v27 = vsub.f32 %v8692_v14, %v8693_v53  ;;  %v2787_v10 = vadd.f32 1e-05, %v2659_v48  ;;  %v2082_v46 = vpop.xlane.xlu0 %2081 }
 0x2ed   : > { %v3164_v21 = vmul.f32 %v4327_v17, %v8690_v61  ;;  %v2533_v34 = vsub.f32 %v2277_v42, %v7044_v38  ;;  %4342 = vrsqrt.f32 %v2788_v30  ;;  %v2662_v1 = vmax.f32 %v2534_v54, 0.0  ;;  %v4331_v25 = vpop.eup %4330  ;;  %v8697_v42 = vld [vmem:[#allocation147_spill] sm:$0xff] }
 0x2ee   : > { %v3431_v57 = vadd.f32 %v7187_v31, %v3296_v58  ;;  %v3163_v26 = vmul.f32 %v4329_v37, %v8694_v27  ;;  %3560 = vst [vmem:[%s5255_s6 + $0x168] sm:$0xff] %v3432_v7  ;;  %v2280_v51 = vmul.f32 0.0078125, %v2084_v15  ;;  %4344 = vrsqrt.f32 %v2787_v10  ;;  %v4333_v28 = vpop.eup %4332  ;;  %v8701_v15 = vld [vmem:[#allocation92_spill] sm:$0xff] }
 0x2ef   : > { %v3299_v43 = vmul.f32 %v7180_v35, %v3164_v21  ;;  %v2661_v8 = vmax.f32 %v2533_v34, 0.0  ;;  %v2279_v16 = vmul.f32 0.0078125, %v2082_v46  ;;  %v8696_v40 = vsub.f32 %v8599_v63, %v6834_v24  ;;  %v2088_v21 = vpop.xlane.xlu1 %2087 }
 0x2f0   : > { %3559 = vst [vmem:[%s5255_s6 + $0x160] sm:$0xff] %v3431_v57  ;;  %v3298_v32 = vmul.f32 %v7180_v35, %v3163_v26  ;;  %v2790_v17 = vadd.f32 1e-05, %v2662_v1  ;;  %v2536_v58 = vsub.f32 %v2280_v51, %v7063_v6  ;;  %v8698_v37 = vsub.f32 %v8602_v33, %v8697_v42  ;;  %v2086_v54 = vpop.xlane.xlu0 %2085 }
 0x2f1   : > { %v3434_v38 = vadd.f32 %v7187_v31, %v3299_v43  ;;  %v3166_v9 = vmul.f32 %v4331_v25, %v8696_v40  ;;  %v2789_v56 = vadd.f32 1e-05, %v2661_v8  ;;  %v2535_v61 = vsub.f32 %v2279_v16, %v7077_v22  ;;  %v4335_v20 = vpop.eup %4334  ;;  %v8699_v22 = vld [vmem:[#allocation79_spill] sm:$0xff] }
 0x2f2   : > { %v3433_v48 = vadd.f32 %v7187_v31, %v3298_v32  ;;  %v3165_v7 = vmul.f32 %v4333_v28, %v8698_v37  ;;  %4346 = vrsqrt.f32 %v2790_v17  ;;  %v2664_v63 = vmax.f32 %v2536_v58, 0.0  ;;  %v4337_v14 = vpop.eup %4336  ;;  %v8702_v43 = vld [vmem:[#allocation151_spill] sm:$0xff] }
 0x2f3   : > { %3562 = vst [vmem:[%s5255_s6 + $0x178] sm:$0xff] %v3434_v38  ;;  %v3301_v30 = vmul.f32 %v7180_v35, %v3166_v9  ;;  %v2282_v24 = vmul.f32 0.0078125, %v2088_v21  ;;  %4348 = vrsqrt.f32 %v2789_v56  ;;  %v2663_v57 = vmax.f32 %v2535_v61, 0.0  ;;  %v2092_v32 = vpop.xlane.xlu1 %2091  ;;  %v8706_v61 = vld [vmem:[#allocation86_spill] sm:$0xff] }
 0x2f4   : > { %3561 = vst [vmem:[%s5255_s6 + $0x170] sm:$0xff] %v3433_v48  ;;  %v3300_v6 = vmul.f32 %v7180_v35, %v3165_v7  ;;  %v2281_v33 = vmul.f32 0.0078125, %v2086_v54  ;;  %v8700_v27 = vsub.f32 %v8611_v59, %v8699_v22  ;;  %v2792_v10 = vadd.f32 1e-05, %v2664_v63  ;;  %v2090_v28 = vpop.xlane.xlu0 %2089 }
 0x2f5   : > { %v3436_v53 = vadd.f32 %v7187_v31, %v3301_v30  ;;  %v2538_v34 = vsub.f32 %v2282_v24, %v7101_v2  ;;  %v8703_v1 = vsub.f32 %v8701_v15, %v8702_v43  ;;  %v2791_v46 = vadd.f32 1e-05, %v2663_v57 }
 0x2f6   : > { %v3168_v26 = vmul.f32 %v4335_v20, %v8700_v27  ;;  %v3435_v19 = vadd.f32 %v7187_v31, %v3300_v6  ;;  %v2537_v25 = vsub.f32 %v2281_v33, %v7115_v13  ;;  %4350 = vrsqrt.f32 %v2792_v10  ;;  %v4339_v38 = vpop.eup %4338  ;;  %v8704_v13 = vld [vmem:[#allocation163_spill] sm:$0xff]  ;;  %v8709_v27 = vld [vmem:[#allocation226_spill] sm:$0xff] }
 0x2f7   : > { %v3167_v51 = vmul.f32 %v4337_v14, %v8703_v1  ;;  %3564 = vst [vmem:[%s5255_s6 + $0x188] sm:$0xff] %v3436_v53  ;;  %v2666_v59 = vmax.f32 %v2538_v34, 0.0  ;;  %v2284_v16 = vmul.f32 0.0078125, %v2092_v32  ;;  %4352 = vrsqrt.f32 %v2791_v46  ;;  %v4341_v17 = vpop.eup %4340  ;;  %v2096_v54 = vpop.xlane.xlu1 %2095  ;;  %v8712_v1 = vld [vmem:[#allocation102_spill] sm:$0xff] }
 0x2f8   : > { %v3303_v8 = vmul.f32 %v7180_v35, %v3168_v26  ;;  %3563 = vst [vmem:[%s5255_s6 + $0x180] sm:$0xff] %v3435_v19  ;;  %v2665_v40 = vmax.f32 %v2537_v25, 0.0  ;;  %v2283_v9 = vmul.f32 0.0078125, %v2090_v28  ;;  %v8705_v48 = vsub.f32 %v8621_v55, %v8704_v13  ;;  %v2094_v57 = vpop.xlane.xlu0 %2093  ;;  %v8711_v19 = vld [vmem:[#allocation172_spill] sm:$0xff] }
 0x2f9   : > { %v3302_v2 = vmul.f32 %v7180_v35, %v3167_v51  ;;  %v2794_v37 = vadd.f32 1e-05, %v2666_v59  ;;  %v2540_v7 = vsub.f32 %v2284_v16, %v7139_v52  ;;  %v8707_v21 = vsub.f32 %v8623_v29, %v8706_v61  ;;  %v8713_v51 = vld [vmem:[#allocation167_spill] sm:$0xff] }
 0x2fa   : > { %v3438_v58 = vadd.f32 %v7187_v31, %v3303_v8  ;;  %v3170_v42 = vmul.f32 %v4339_v38, %v8705_v48  ;;  %v2793_v63 = vadd.f32 1e-05, %v2665_v40  ;;  %v2539_v24 = vsub.f32 %v2283_v9, %v7155_v39  ;;  %v4343_v33 = vpop.eup %4342  ;;  %v8708_v39 = vld [vmem:[#allocation101_spill] sm:$0xff] }
 0x2fb   : > { %v3437_v56 = vadd.f32 %v7187_v31, %v3302_v2  ;;  %v3169_v30 = vmul.f32 %v4341_v17, %v8707_v21  ;;  %4354 = vrsqrt.f32 %v2794_v37  ;;  %v2668_v55 = vmax.f32 %v2540_v7, 0.0  ;;  %v4345_v53 = vpop.eup %4344  ;;  %v8715_v8 = vld [vmem:[#allocation177_spill] sm:$0xff]  ;;  %v2100_v16 = vpop.xlane.xlu1 %2099  ;;  %v8718_v21 = vld [vmem:[#allocation180_spill] sm:$0xff] }
 0x2fc   : > { %3566 = vst [vmem:[%s5255_s6 + $0x198] sm:$0xff] %v3438_v58  ;;  %v3305_v20 = vmul.f32 %v7180_v35, %v3170_v42  ;;  %v2286_v6 = vmul.f32 0.0078125, %v2096_v54  ;;  %4356 = vrsqrt.f32 %v2793_v63  ;;  %v2667_v14 = vmax.f32 %v2539_v24, 0.0  ;;  %v2098_v40 = vpop.xlane.xlu0 %2097  ;;  %v8716_v37 = vld [vmem:[#allocation229_spill] sm:$0xff]  ;;  %v8719_v24 = vld [vmem:[#allocation168_spill] sm:$0xff] }
 0x2fd   : > { %3565 = vst [vmem:[%s5255_s6 + $0x190] sm:$0xff] %v3437_v56  ;;  %v3304_v52 = vmul.f32 %v7180_v35, %v3169_v30  ;;  %v2285_v29 = vmul.f32 0.0078125, %v2094_v57  ;;  %v8710_v26 = vsub.f32 %v8708_v39, %v8709_v27  ;;  %v2796_v34 = vadd.f32 1e-05, %v2668_v55 }
 0x2fe   : > { %v3440_v22 = vadd.f32 %v7187_v31, %v3305_v20  ;;  %v2542_v15 = vsub.f32 %v2286_v6, %v8711_v19  ;;  %v8714_v46 = vsub.f32 %v8712_v1, %v8713_v51  ;;  %v2795_v32 = vadd.f32 1e-05, %v2667_v14  ;;  %v8721_v6 = vld [vmem:[#allocation181_spill] sm:$0xff]  ;;  %v8725_v1 = vld [vmem:[#allocation183_spill] sm:$0xff] }
 0x2ff   : > { %v3172_v10 = vmul.f32 %v4343_v33, %v8710_v26  ;;  %v3439_v43 = vadd.f32 %v7187_v31, %v3304_v52  ;;  %v2541_v59 = vsub.f32 %v2285_v29, %v8715_v8  ;;  %4358 = vrsqrt.f32 %v2796_v34  ;;  %v4347_v9 = vpop.eup %4346  ;;  %v2104_v33 = vpop.xlane.xlu1 %2103  ;;  %v8723_v34 = vld [vmem:[#allocation232_spill] sm:$0xff] }
 0x300   : > { %v3171_v25 = vmul.f32 %v4345_v53, %v8714_v46  ;;  %3568 = vst [vmem:[%s5255_s6 + $0x1a8] sm:$0xff] %v3440_v22  ;;  %v2670_v38 = vmax.f32 %v2542_v15, 0.0  ;;  %v2288_v2 = vmul.f32 0.0078125, %v2100_v16  ;;  %4360 = vrsqrt.f32 %v2795_v32  ;;  %v4349_v48 = vpop.eup %4348  ;;  %v2102_v29 = vpop.xlane.xlu0 %2101 }
 0x301   : > { %v3307_v28 = vmul.f32 %v7180_v35, %v3172_v10  ;;  %3567 = vst [vmem:[%s5255_s6 + $0x1a0] sm:$0xff] %v3439_v43  ;;  %v2669_v58 = vmax.f32 %v2541_v59, 0.0  ;;  %v2287_v13 = vmul.f32 0.0078125, %v2098_v40  ;;  %v8717_v7 = vsub.f32 %v8639_v50, %v8716_v37  ;;  %v8722_v10 = vld [vmem:[#allocation111_spill] sm:$0xff]  ;;  %v8727_v59 = vld [vmem:[#allocation184_spill] sm:$0xff] }
 0x302   : > { %v3306_v17 = vmul.f32 %v7180_v35, %v3171_v25  ;;  %v2798_v61 = vadd.f32 1e-05, %v2670_v38  ;;  %v2544_v30 = vsub.f32 %v2288_v2, %v8718_v21  ;;  %v8720_v54 = vsub.f32 %v8641_v5, %v8719_v24 }
 0x303   : > { %v3442_v42 = vadd.f32 %v7187_v31, %v3307_v28  ;;  %v3174_v56 = vmul.f32 %v4347_v9, %v8717_v7  ;;  %v2797_v55 = vadd.f32 1e-05, %v2669_v58  ;;  %v2543_v57 = vsub.f32 %v2287_v13, %v8721_v6  ;;  %v4351_v53 = vpop.eup %4350  ;;  %v2108_v28 = vpop.xlane.xlu1 %2107 }
 0x304   : > { %v3441_v63 = vadd.f32 %v7187_v31, %v3306_v17  ;;  %v3173_v20 = vmul.f32 %v4349_v48, %v8720_v54  ;;  %4362 = vrsqrt.f32 %v2798_v61  ;;  %v2672_v50 = vmax.f32 %v2544_v30, 0.0  ;;  %v4353_v27 = vpop.eup %4352  ;;  %v2106_v9 = vpop.xlane.xlu0 %2105  ;;  %v8731_v54 = vld [vmem:[#allocation189_spill] sm:$0xff] }
 0x305   : > { %3570 = vst [vmem:[%s5255_s6 + $0x1b8] sm:$0xff] %v3442_v42  ;;  %v3309_v52 = vmul.f32 %v7180_v35, %v3174_v56  ;;  %v2290_v14 = vmul.f32 0.0078125, %v2104_v33  ;;  %4364 = vrsqrt.f32 %v2797_v55  ;;  %v2671_v39 = vmax.f32 %v2543_v57, 0.0  ;;  %v8729_v56 = vld [vmem:[#allocation187_spill] sm:$0xff] }
 0x306   : > { %3569 = vst [vmem:[%s5255_s6 + $0x1b0] sm:$0xff] %v3441_v63  ;;  %v3308_v22 = vmul.f32 %v7180_v35, %v3173_v20  ;;  %v2289_v5 = vmul.f32 0.0078125, %v2102_v29  ;;  %v8724_v19 = vsub.f32 %v8722_v10, %v8723_v34  ;;  %v2800_v43 = vadd.f32 1e-05, %v2672_v50 }
 0x307   : > { %v3444_v26 = vadd.f32 %v7187_v31, %v3309_v52  ;;  %v2546_v51 = vsub.f32 %v2290_v14, %v8725_v1  ;;  %v8726_v25 = vsub.f32 %v8650_v36, %v7049_v47  ;;  %v2799_v8 = vadd.f32 1e-05, %v2671_v39  ;;  %v2112_v55 = vpop.xlane.xlu1 %2111  ;;  %v8733_v39 = vld [vmem:[#allocation194_spill] sm:$0xff] }
 0x308   : > { %v3176_v15 = vmul.f32 %v4351_v53, %v8724_v19  ;;  %v3443_v46 = vadd.f32 %v7187_v31, %v3308_v22  ;;  %v2545_v16 = vsub.f32 %v2289_v5, %v8727_v59  ;;  %4366 = vrsqrt.f32 %v2800_v43  ;;  %v4355_v17 = vpop.eup %4354  ;;  %v2110_v57 = vpop.xlane.xlu0 %2109  ;;  %v8735_v19 = vld [vmem:[#allocation195_spill] sm:$0xff]  ;;  %v8736_v59 = vld [vmem:[#allocation5_spill] sm:$0xff] }
 0x309   : > { %v3175_v32 = vmul.f32 %v4353_v27, %v8726_v25  ;;  %3572 = vst [vmem:[%s5255_s6 + $0x1c8] sm:$0xff] %v3444_v26  ;;  %v2674_v2 = vmax.f32 %v2546_v51, 0.0  ;;  %v2292_v40 = vmul.f32 0.0078125, %v2108_v28  ;;  %4368 = vrsqrt.f32 %v2799_v8  ;;  %v4357_v36 = vpop.eup %4356 }
 0x30a   : > { %v3311_v38 = vmul.f32 %v7180_v35, %v3176_v15  ;;  %3571 = vst [vmem:[%s5255_s6 + $0x1c0] sm:$0xff] %v3443_v46  ;;  %v2673_v13 = vmax.f32 %v2545_v16, 0.0  ;;  %v2291_v47 = vmul.f32 0.0078125, %v2106_v9  ;;  %v8728_v42 = vsub.f32 %v8654_v41, %v7080_v3  ;;  %v8737_v16 = vld [vmem:[#allocation29_spill] sm:$0xff] }
 0x30b   : > { %v3310_v58 = vmul.f32 %v7180_v35, %v3175_v32  ;;  %v2802_v7 = vadd.f32 1e-05, %v2674_v2  ;;  %v2548_v61 = vsub.f32 %v2292_v40, %v8729_v56  ;;  %v8730_v30 = vsub.f32 %v8657_v18, %v7095_v62  ;;  %v2116_v43 = vpop.xlane.xlu1 %2115  ;;  %v8739_v40 = vld [vmem:[#allocation197_spill] sm:$0xff] }
 0x30c   : > { %v3446_v48 = vadd.f32 %v7187_v31, %v3311_v38  ;;  %v3178_v37 = vmul.f32 %v4355_v17, %v8728_v42  ;;  %v2801_v24 = vadd.f32 1e-05, %v2673_v13  ;;  %v2547_v20 = vsub.f32 %v2291_v47, %v8731_v54  ;;  %v4359_v33 = vpop.eup %4358  ;;  %v2114_v51 = vpop.xlane.xlu0 %2113  ;;  %v8741_v13 = vld [vmem:[#allocation30_spill] sm:$0xff]  ;;  %v8743_v42 = vld [vmem:[#allocation199_spill] sm:$0xff] }
 0x30d   : > { %v3445_v21 = vadd.f32 %v7187_v31, %v3310_v58  ;;  %v3177_v63 = vmul.f32 %v4357_v36, %v8730_v30  ;;  %4370 = vrsqrt.f32 %v2802_v7  ;;  %v2676_v3 = vmax.f32 %v2548_v61, 0.0  ;;  %v4361_v18 = vpop.eup %4360  ;;  %v8740_v58 = vld [vmem:[#allocation6_spill] sm:$0xff] }
 0x30e   : > { %3574 = vst [vmem:[%s5255_s6 + $0x1d8] sm:$0xff] %v3446_v48  ;;  %v3313_v6 = vmul.f32 %v7180_v35, %v3178_v37  ;;  %v2294_v41 = vmul.f32 0.0078125, %v2112_v55  ;;  %4372 = vrsqrt.f32 %v2801_v24  ;;  %v2675_v50 = vmax.f32 %v2547_v20, 0.0 }
 0x30f   : > { %3573 = vst [vmem:[%s5255_s6 + $0x1d0] sm:$0xff] %v3445_v21  ;;  %v3312_v52 = vmul.f32 %v7180_v35, %v3177_v63  ;;  %v2293_v62 = vmul.f32 0.0078125, %v2110_v57  ;;  %v8732_v29 = vsub.f32 %v8661_v4, %v7118_v49  ;;  %v2804_v22 = vadd.f32 1e-05, %v2676_v3  ;;  %v2120_v7 = vpop.xlane.xlu1 %2119  ;;  %v8744_v3 = vld [vmem:[#allocation7_spill] sm:$0xff] }
 0x310   : > { %v3448_v14 = vadd.f32 %v7187_v31, %v3313_v6  ;;  %v2550_v5 = vsub.f32 %v2294_v41, %v8733_v39  ;;  %v8734_v26 = vsub.f32 %v8664_v12, %v7131_v0  ;;  %v2803_v34 = vadd.f32 1e-05, %v2675_v50  ;;  %v2118_v30 = vpop.xlane.xlu0 %2117  ;;  %v8745_v41 = vld [vmem:[#allocation33_spill] sm:$0xff]  ;;  %v8747_v50 = vld [vmem:[#allocation200_spill] sm:$0xff] }
 0x311   : > { %v3180_v53 = vmul.f32 %v4359_v33, %v8732_v29  ;;  %v3447_v27 = vadd.f32 %v7187_v31, %v3312_v52  ;;  %v2549_v15 = vsub.f32 %v2293_v62, %v8735_v19  ;;  %4374 = vrsqrt.f32 %v2804_v22  ;;  %v4363_v46 = vpop.eup %4362  ;;  %v8749_v29 = vld [vmem:[#allocation34_spill] sm:$0xff] }
 0x312   : > { %v3179_v10 = vmul.f32 %v4361_v18, %v8734_v26  ;;  %3576 = vst [vmem:[%s5255_s6 + $0x1e8] sm:$0xff] %v3448_v14  ;;  %v2678_v49 = vmax.f32 %v2550_v5, 0.0  ;;  %v2296_v4 = vmul.f32 0.0078125, %v2116_v43  ;;  %4376 = vrsqrt.f32 %v2803_v34  ;;  %v4365_v12 = vpop.eup %4364  ;;  %v8748_v14 = vld [vmem:[#allocation8_spill] sm:$0xff]  ;;  %v8751_v5 = vld [vmem:[#allocation201_spill] sm:$0xff] }
 0x313   : > { %v3315_v1 = vmul.f32 %v7180_v35, %v3180_v53  ;;  %3575 = vst [vmem:[%s5255_s6 + $0x1e0] sm:$0xff] %v3447_v27  ;;  %v2677_v32 = vmax.f32 %v2549_v15, 0.0  ;;  %v2295_v0 = vmul.f32 0.0078125, %v2114_v51  ;;  %v8738_v28 = vsub.f32 %v8736_v59, %v8737_v16  ;;  %v2124_v26 = vpop.xlane.xlu1 %2123  ;;  %v8755_v59 = vld [vmem:[#allocation202_spill] sm:$0xff] }
 0x314   : > { %v3314_v25 = vmul.f32 %v7180_v35, %v3179_v10  ;;  %v2806_v2 = vadd.f32 1e-05, %v2678_v49  ;;  %v2552_v9 = vsub.f32 %v2296_v4, %v8739_v40  ;;  %v8742_v47 = vsub.f32 %v8740_v58, %v8741_v13  ;;  %v2122_v15 = vpop.xlane.xlu0 %2121  ;;  %v8759_v58 = vld [vmem:[#allocation203_spill] sm:$0xff] }
 0x315   : > { %v3450_v8 = vadd.f32 %v7187_v31, %v3315_v1  ;;  %v3182_v38 = vmul.f32 %v4363_v46, %v8738_v28  ;;  %v2805_v48 = vadd.f32 1e-05, %v2677_v32  ;;  %v2551_v37 = vsub.f32 %v2295_v0, %v8743_v42  ;;  %v4367_v63 = vpop.eup %4366  ;;  %v8753_v32 = vld [vmem:[#allocation37_spill] sm:$0xff] }
 0x316   : > { %v3449_v17 = vadd.f32 %v7187_v31, %v3314_v25  ;;  %v3181_v36 = vmul.f32 %v4365_v12, %v8742_v47  ;;  %4378 = vrsqrt.f32 %v2806_v2  ;;  %v2680_v61 = vmax.f32 %v2552_v9, 0.0  ;;  %v4369_v55 = vpop.eup %4368  ;;  %v8752_v25 = vld [vmem:[#allocation9_spill] sm:$0xff]  ;;  %v8757_v2 = vld [vmem:[#allocation38_spill] sm:$0xff] }
 0x317   : > { %3578 = vst [vmem:[%s5255_s6 + $0x1f8] sm:$0xff] %v3450_v8  ;;  %v3317_v56 = vmul.f32 %v7180_v35, %v3182_v38  ;;  %v2298_v21 = vmul.f32 0.0078125, %v2120_v7  ;;  %4380 = vrsqrt.f32 %v2805_v48  ;;  %v2679_v54 = vmax.f32 %v2551_v37, 0.0  ;;  %v8756_v38 = vld [vmem:[#allocation10_spill] sm:$0xff]  ;;  %v2128_v47 = vpop.xlane.xlu1 %2127 }
 0x318   : > { %3577 = vst [vmem:[%s5255_s6 + $0x1f0] sm:$0xff] %v3449_v17  ;;  %v3316_v24 = vmul.f32 %v7180_v35, %v3181_v36  ;;  %v2297_v20 = vmul.f32 0.0078125, %v2118_v30  ;;  %v8746_v57 = vsub.f32 %v8744_v3, %v8745_v41  ;;  %v2808_v52 = vadd.f32 1e-05, %v2680_v61  ;;  %v2126_v37 = vpop.xlane.xlu0 %2125  ;;  %v8763_v3 = vld [vmem:[#allocation204_spill] sm:$0xff] }
 0x319   : > { %v3452_v6 = vadd.f32 %v7187_v31, %v3317_v56  ;;  %v2554_v62 = vsub.f32 %v2298_v21, %v8747_v50  ;;  %v8750_v53 = vsub.f32 %v8748_v14, %v8749_v29  ;;  %v2807_v39 = vadd.f32 1e-05, %v2679_v54  ;;  %v8761_v54 = vld [vmem:[#allocation41_spill] sm:$0xff] }
 0x31a   : > { %v3184_v33 = vmul.f32 %v4367_v63, %v8746_v57  ;;  %v3451_v18 = vadd.f32 %v7187_v31, %v3316_v24  ;;  %v2553_v27 = vsub.f32 %v2297_v20, %v8751_v5  ;;  %4382 = vrsqrt.f32 %v2808_v52  ;;  %v4371_v43 = vpop.eup %4370  ;;  %v8760_v24 = vld [vmem:[#allocation11_spill] sm:$0xff]  ;;  %v8765_v52 = vld [vmem:[#allocation42_spill] sm:$0xff]  ;;  %v8767_v14 = vld [vmem:[#allocation205_spill] sm:$0xff] }
 0x31b   : > { %v3183_v22 = vmul.f32 %v4369_v55, %v8750_v53  ;;  %3580 = vst [vmem:[%s5255_s6 + $0x208] sm:$0xff] %v3452_v6  ;;  %v2682_v34 = vmax.f32 %v2554_v62, 0.0  ;;  %v2300_v19 = vmul.f32 0.0078125, %v2124_v26  ;;  %4384 = vrsqrt.f32 %v2807_v39  ;;  %v4373_v51 = vpop.eup %4372  ;;  %v2132_v53 = vpop.xlane.xlu1 %2131 }
 0x31c   : > { %v3319_v10 = vmul.f32 %v7180_v35, %v3184_v33  ;;  %3579 = vst [vmem:[%s5255_s6 + $0x200] sm:$0xff] %v3451_v18  ;;  %v2681_v49 = vmax.f32 %v2553_v27, 0.0  ;;  %v2299_v4 = vmul.f32 0.0078125, %v2122_v15  ;;  %v8754_v0 = vsub.f32 %v8752_v25, %v8753_v32  ;;  %v8764_v33 = vld [vmem:[#allocation12_spill] sm:$0xff]  ;;  %v2130_v27 = vpop.xlane.xlu0 %2129  ;;  %v8771_v25 = vld [vmem:[#allocation206_spill] sm:$0xff] }
 0x31d   : > { %v3318_v1 = vmul.f32 %v7180_v35, %v3183_v22  ;;  %v2810_v8 = vadd.f32 1e-05, %v2682_v34  ;;  %v2556_v16 = vsub.f32 %v2300_v19, %v8755_v59  ;;  %v8758_v40 = vsub.f32 %v8756_v38, %v8757_v2  ;;  %v8775_v38 = vld [vmem:[#allocation207_spill] sm:$0xff] }
 0x31e   : > { %v3454_v46 = vadd.f32 %v7187_v31, %v3319_v10  ;;  %v3186_v12 = vmul.f32 %v4371_v43, %v8754_v0  ;;  %v2809_v17 = vadd.f32 1e-05, %v2681_v49  ;;  %v2555_v13 = vsub.f32 %v2299_v4, %v8759_v58  ;;  %v4375_v7 = vpop.eup %4374  ;;  %v8769_v49 = vld [vmem:[#allocation45_spill] sm:$0xff] }
 0x31f   : > { %v3453_v28 = vadd.f32 %v7187_v31, %v3318_v1  ;;  %v3185_v9 = vmul.f32 %v4373_v51, %v8758_v40  ;;  %4386 = vrsqrt.f32 %v2810_v8  ;;  %v2684_v48 = vmax.f32 %v2556_v16, 0.0  ;;  %v4377_v30 = vpop.eup %4376  ;;  %v8768_v1 = vld [vmem:[#allocation13_spill] sm:$0xff]  ;;  %v8773_v8 = vld [vmem:[#allocation46_spill] sm:$0xff]  ;;  %v2136_v40 = vpop.xlane.xlu1 %2135 }
 0x320   : > { %3582 = vst [vmem:[%s5255_s6 + $0x218] sm:$0xff] %v3454_v46  ;;  %v3321_v36 = vmul.f32 %v7180_v35, %v3186_v12  ;;  %v2302_v42 = vmul.f32 0.0078125, %v2128_v47  ;;  %4388 = vrsqrt.f32 %v2809_v17  ;;  %v2683_v61 = vmax.f32 %v2555_v13, 0.0  ;;  %v8772_v12 = vld [vmem:[#allocation14_spill] sm:$0xff]  ;;  %v2134_v13 = vpop.xlane.xlu0 %2133 }
 0x321   : > { %3581 = vst [vmem:[%s5255_s6 + $0x210] sm:$0xff] %v3453_v28  ;;  %v3320_v56 = vmul.f32 %v7180_v35, %v3185_v9  ;;  %v2301_v21 = vmul.f32 0.0078125, %v2126_v37  ;;  %v8762_v20 = vsub.f32 %v8760_v24, %v8761_v54  ;;  %v2812_v6 = vadd.f32 1e-05, %v2684_v48  ;;  %v8779_v24 = vld [vmem:[#allocation208_spill] sm:$0xff] }
 0x322   : > { %v3456_v63 = vadd.f32 %v7187_v31, %v3321_v36  ;;  %v2558_v41 = vsub.f32 %v2302_v42, %v8763_v3  ;;  %v8766_v50 = vsub.f32 %v8764_v33, %v8765_v52  ;;  %v2811_v18 = vadd.f32 1e-05, %v2683_v61  ;;  %v8777_v61 = vld [vmem:[#allocation49_spill] sm:$0xff] }
 0x323   : > { %v3188_v55 = vmul.f32 %v4375_v7, %v8762_v20  ;;  %v3455_v57 = vadd.f32 %v7187_v31, %v3320_v56  ;;  %v2557_v29 = vsub.f32 %v2301_v21, %v8767_v14  ;;  %4390 = vrsqrt.f32 %v2812_v6  ;;  %v4379_v26 = vpop.eup %4378  ;;  %v8776_v56 = vld [vmem:[#allocation15_spill] sm:$0xff]  ;;  %v8781_v6 = vld [vmem:[#allocation50_spill] sm:$0xff]  ;;  %v8783_v33 = vld [vmem:[#allocation209_spill] sm:$0xff] }
 0x324   : > { %v3187_v62 = vmul.f32 %v4377_v30, %v8766_v50  ;;  %3584 = vst [vmem:[%s5255_s6 + $0x228] sm:$0xff] %v3456_v63  ;;  %v2686_v39 = vmax.f32 %v2558_v41, 0.0  ;;  %v2304_v5 = vmul.f32 0.0078125, %v2132_v53  ;;  %4392 = vrsqrt.f32 %v2811_v18  ;;  %v4381_v15 = vpop.eup %4380  ;;  %v2140_v50 = vpop.xlane.xlu1 %2139 }
 0x325   : > { %v3323_v22 = vmul.f32 %v7180_v35, %v3188_v55  ;;  %3583 = vst [vmem:[%s5255_s6 + $0x220] sm:$0xff] %v3455_v57  ;;  %v2685_v34 = vmax.f32 %v2557_v29, 0.0  ;;  %v2303_v19 = vmul.f32 0.0078125, %v2130_v27  ;;  %v8770_v4 = vsub.f32 %v8768_v1, %v8769_v49  ;;  %v8780_v55 = vld [vmem:[#allocation16_spill] sm:$0xff]  ;;  %v2138_v29 = vpop.xlane.xlu0 %2137  ;;  %v8787_v1 = vld [vmem:[#allocation210_spill] sm:$0xff] }
 0x326   : > { %v3322_v10 = vmul.f32 %v7180_v35, %v3187_v62  ;;  %v2814_v46 = vadd.f32 1e-05, %v2686_v39  ;;  %v2560_v32 = vsub.f32 %v2304_v5, %v8771_v25  ;;  %v8774_v59 = vsub.f32 %v8772_v12, %v8773_v8  ;;  %v8791_v12 = vld [vmem:[#allocation211_spill] sm:$0xff] }
 0x327   : > { %v3458_v43 = vadd.f32 %v7187_v31, %v3323_v22  ;;  %v3190_v51 = vmul.f32 %v4379_v26, %v8770_v4  ;;  %v2813_v28 = vadd.f32 1e-05, %v2685_v34  ;;  %v2559_v2 = vsub.f32 %v2303_v19, %v8775_v38  ;;  %v4383_v47 = vpop.eup %4382  ;;  %v8785_v34 = vld [vmem:[#allocation53_spill] sm:$0xff] }
 0x328   : > { %v3457_v0 = vadd.f32 %v7187_v31, %v3322_v10  ;;  %v3189_v16 = vmul.f32 %v4381_v15, %v8774_v59  ;;  %4394 = vrsqrt.f32 %v2814_v46  ;;  %v2688_v17 = vmax.f32 %v2560_v32, 0.0  ;;  %v4385_v37 = vpop.eup %4384  ;;  %v8784_v10 = vld [vmem:[#allocation17_spill] sm:$0xff]  ;;  %v8789_v46 = vld [vmem:[#allocation54_spill] sm:$0xff]  ;;  %v2144_v59 = vpop.xlane.xlu1 %2143 }
 0x329   : > { %3586 = vst [vmem:[%s5255_s6 + $0x238] sm:$0xff] %v3458_v43  ;;  %v3325_v9 = vmul.f32 %v7180_v35, %v3190_v51  ;;  %v2306_v58 = vmul.f32 0.0078125, %v2136_v40  ;;  %4396 = vrsqrt.f32 %v2813_v28  ;;  %v2687_v48 = vmax.f32 %v2559_v2, 0.0  ;;  %v8788_v51 = vld [vmem:[#allocation18_spill] sm:$0xff]  ;;  %v2142_v2 = vpop.xlane.xlu0 %2141 }
 0x32a   : > { %3585 = vst [vmem:[%s5255_s6 + $0x230] sm:$0xff] %v3457_v0  ;;  %v3324_v36 = vmul.f32 %v7180_v35, %v3189_v16  ;;  %v2305_v42 = vmul.f32 0.0078125, %v2134_v13  ;;  %v8778_v21 = vsub.f32 %v8776_v56, %v8777_v61  ;;  %v2816_v63 = vadd.f32 1e-05, %v2688_v17  ;;  %v8795_v56 = vld [vmem:[#allocation212_spill] sm:$0xff] }
 0x32b   : > { %v3460_v7 = vadd.f32 %v7187_v31, %v3325_v9  ;;  %v2562_v54 = vsub.f32 %v2306_v58, %v8779_v24  ;;  %v8782_v3 = vsub.f32 %v8780_v55, %v8781_v6  ;;  %v2815_v57 = vadd.f32 1e-05, %v2687_v48  ;;  %v8793_v48 = vld [vmem:[#allocation57_spill] sm:$0xff] }
 0x32c   : > { %v3192_v30 = vmul.f32 %v4383_v47, %v8778_v21  ;;  %v3459_v20 = vadd.f32 %v7187_v31, %v3324_v36  ;;  %v2561_v52 = vsub.f32 %v2305_v42, %v8783_v33  ;;  %4398 = vrsqrt.f32 %v2816_v63  ;;  %v4387_v53 = vpop.eup %4386  ;;  %v8792_v36 = vld [vmem:[#allocation19_spill] sm:$0xff]  ;;  %v8797_v63 = vld [vmem:[#allocation58_spill] sm:$0xff]  ;;  %v8799_v55 = vld [vmem:[#allocation213_spill] sm:$0xff] }
 0x32d   : > { %v3191_v41 = vmul.f32 %v4385_v37, %v8782_v3  ;;  %3588 = vst [vmem:[%s5255_s6 + $0x248] sm:$0xff] %v3460_v7  ;;  %v2690_v18 = vmax.f32 %v2562_v54, 0.0  ;;  %v2308_v14 = vmul.f32 0.0078125, %v2140_v50  ;;  %4400 = vrsqrt.f32 %v2815_v57  ;;  %v4389_v27 = vpop.eup %4388  ;;  %v2148_v3 = vpop.xlane.xlu1 %2147 }
 0x32e   : > { %v3327_v62 = vmul.f32 %v7180_v35, %v3192_v30  ;;  %3587 = vst [vmem:[%s5255_s6 + $0x240] sm:$0xff] %v3459_v20  ;;  %v2689_v39 = vmax.f32 %v2561_v52, 0.0  ;;  %v2307_v5 = vmul.f32 0.0078125, %v2138_v29  ;;  %v8786_v19 = vsub.f32 %v8784_v10, %v8785_v34  ;;  %v8796_v30 = vld [vmem:[#allocation20_spill] sm:$0xff]  ;;  %v2146_v52 = vpop.xlane.xlu0 %2145  ;;  %v8803_v10 = vld [vmem:[#allocation214_spill] sm:$0xff] }
 0x32f   : > { %v3326_v22 = vmul.f32 %v7180_v35, %v3191_v41  ;;  %v2818_v43 = vadd.f32 1e-05, %v2690_v18  ;;  %v2564_v49 = vsub.f32 %v2308_v14, %v8787_v1  ;;  %v8790_v25 = vsub.f32 %v8788_v51, %v8789_v46  ;;  %v8807_v51 = vld [vmem:[#allocation215_spill] sm:$0xff] }
 0x330   : > { %v3462_v26 = vadd.f32 %v7187_v31, %v3327_v62  ;;  %v3194_v15 = vmul.f32 %v4387_v53, %v8786_v19  ;;  %v2817_v0 = vadd.f32 1e-05, %v2689_v39  ;;  %v2563_v8 = vsub.f32 %v2307_v5, %v8791_v12  ;;  %v4391_v40 = vpop.eup %4390  ;;  %v8801_v39 = vld [vmem:[#allocation65_spill] sm:$0xff] }
 0x331   : > { %v3461_v4 = vadd.f32 %v7187_v31, %v3326_v22  ;;  %v3193_v32 = vmul.f32 %v4389_v27, %v8790_v25  ;;  %4402 = vrsqrt.f32 %v2818_v43  ;;  %v2692_v28 = vmax.f32 %v2564_v49, 0.0  ;;  %v4393_v13 = vpop.eup %4392  ;;  %v8800_v22 = vld [vmem:[#allocation21_spill] sm:$0xff]  ;;  %v8805_v43 = vld [vmem:[#allocation66_spill] sm:$0xff]  ;;  %v2152_v25 = vpop.xlane.xlu1 %2151 }
 0x332   : > { %3590 = vst [vmem:[%s5255_s6 + $0x258] sm:$0xff] %v3462_v26  ;;  %v3329_v16 = vmul.f32 %v7180_v35, %v3194_v15  ;;  %v2310_v38 = vmul.f32 0.0078125, %v2144_v59  ;;  %4404 = vrsqrt.f32 %v2817_v0  ;;  %v2691_v17 = vmax.f32 %v2563_v8, 0.0  ;;  %v8804_v15 = vld [vmem:[#allocation22_spill] sm:$0xff]  ;;  %v2150_v8 = vpop.xlane.xlu0 %2149 }
 0x333   : > { %3589 = vst [vmem:[%s5255_s6 + $0x250] sm:$0xff] %v3461_v4  ;;  %v3328_v9 = vmul.f32 %v7180_v35, %v3193_v32  ;;  %v2309_v58 = vmul.f32 0.0078125, %v2142_v2  ;;  %v8794_v42 = vsub.f32 %v8792_v36, %v8793_v48  ;;  %v2820_v7 = vadd.f32 1e-05, %v2692_v28  ;;  %v8811_v36 = vld [vmem:[#allocation218_spill] sm:$0xff] }
 0x334   : > { %v3464_v47 = vadd.f32 %v7187_v31, %v3329_v16  ;;  %v2566_v61 = vsub.f32 %v2310_v38, %v8795_v56  ;;  %v8798_v24 = vsub.f32 %v8796_v30, %v8797_v63  ;;  %v2819_v20 = vadd.f32 1e-05, %v2691_v17  ;;  %v8809_v17 = vld [vmem:[#allocation73_spill] sm:$0xff]  ;;  %v8815_v30 = vld [vmem:[#allocation219_spill] sm:$0xff] }
 0x335   : > { %v3196_v37 = vmul.f32 %v4391_v40, %v8794_v42  ;;  %v3463_v21 = vadd.f32 %v7187_v31, %v3328_v9  ;;  %v2565_v6 = vsub.f32 %v2309_v58, %v8799_v55  ;;  %4406 = vrsqrt.f32 %v2820_v7  ;;  %v4395_v50 = vpop.eup %4394  ;;  %v8808_v9 = vld [vmem:[#allocation23_spill] sm:$0xff]  ;;  %v8813_v7 = vld [vmem:[#allocation74_spill] sm:$0xff] }
 0x336   : > { %v3195_v54 = vmul.f32 %v4393_v13, %v8798_v24  ;;  %3592 = vst [vmem:[%s5255_s6 + $0x268] sm:$0xff] %v3464_v47  ;;  %v2694_v57 = vmax.f32 %v2566_v61, 0.0  ;;  %v2312_v33 = vmul.f32 0.0078125, %v2148_v3  ;;  %4408 = vrsqrt.f32 %v2819_v20  ;;  %v4397_v29 = vpop.eup %4396  ;;  %v2156_v24 = vpop.xlane.xlu1 %2155 }
 0x337   : > { %v3331_v41 = vmul.f32 %v7180_v35, %v3196_v37  ;;  %3591 = vst [vmem:[%s5255_s6 + $0x260] sm:$0xff] %v3463_v21  ;;  %v2693_v18 = vmax.f32 %v2565_v6, 0.0  ;;  %v2311_v14 = vmul.f32 0.0078125, %v2146_v52  ;;  %v8802_v5 = vsub.f32 %v8800_v22, %v8801_v39  ;;  %v8812_v37 = vld [vmem:[#allocation24_spill] sm:$0xff]  ;;  %v2154_v6 = vpop.xlane.xlu0 %2153  ;;  %v8819_v22 = vld [vmem:[#allocation221_spill] sm:$0xff] }
 0x338   : > { %v3330_v62 = vmul.f32 %v7180_v35, %v3195_v54  ;;  %v2822_v26 = vadd.f32 1e-05, %v2694_v57  ;;  %v2568_v34 = vsub.f32 %v2312_v33, %v8803_v10  ;;  %v8806_v1 = vsub.f32 %v8804_v15, %v8805_v43 }
 0x339   : > { %v3466_v53 = vadd.f32 %v7187_v31, %v3331_v41  ;;  %v3198_v27 = vmul.f32 %v4395_v50, %v8802_v5  ;;  %v2821_v4 = vadd.f32 1e-05, %v2693_v18  ;;  %v2567_v46 = vsub.f32 %v2311_v14, %v8807_v51  ;;  %v4399_v59 = vpop.eup %4398  ;;  %v8817_v18 = vld [vmem:[#allocation81_spill] sm:$0xff] }
 0x33a   : > { %v3465_v19 = vadd.f32 %v7187_v31, %v3330_v62  ;;  %v3197_v49 = vmul.f32 %v4397_v29, %v8806_v1  ;;  %4410 = vrsqrt.f32 %v2822_v26  ;;  %v2696_v0 = vmax.f32 %v2568_v34, 0.0  ;;  %v4401_v2 = vpop.eup %4400  ;;  %v8816_v62 = vld [vmem:[#allocation25_spill] sm:$0xff]  ;;  %v8821_v26 = vld [vmem:[#allocation82_spill] sm:$0xff]  ;;  %v2160_v43 = vpop.xlane.xlu1 %2159 }
 0x33b   : > { %3594 = vst [vmem:[%s5255_s6 + $0x278] sm:$0xff] %v3466_v53  ;;  %v3333_v32 = vmul.f32 %v7180_v35, %v3198_v27  ;;  %v2314_v12 = vmul.f32 0.0078125, %v2152_v25  ;;  %4412 = vrsqrt.f32 %v2821_v4  ;;  %v2695_v28 = vmax.f32 %v2567_v46, 0.0  ;;  %v8820_v27 = vld [vmem:[#allocation26_spill] sm:$0xff]  ;;  %v7519_v1 = vld [vmem:[%s7861_s3] ss:$0 sm:$0xff] }
 0x33c   : > { %3593 = vst [vmem:[%s5255_s6 + $0x270] sm:$0xff] %v3465_v19  ;;  %v3332_v16 = vmul.f32 %v7180_v35, %v3197_v49  ;;  %v2313_v38 = vmul.f32 0.0078125, %v2150_v8  ;;  %v8810_v58 = vsub.f32 %v8808_v9, %v8809_v17  ;;  %v2824_v47 = vadd.f32 1e-05, %v2696_v0  ;;  %v8823_v19 = vld [vmem:[#allocation222_spill] sm:$0xff]  ;;  %v8827_v9 = vld [vmem:[#allocation152_spill] sm:$0xff] }
 0x33d   : > { %v3468_v40 = vadd.f32 %v7187_v31, %v3333_v32  ;;  %v2570_v48 = vsub.f32 %v2314_v12, %v8811_v36  ;;  %v8814_v56 = vsub.f32 %v8812_v37, %v8813_v7  ;;  %v2823_v21 = vadd.f32 1e-05, %v2695_v28  ;;  %v7527_v8 = vld [vmem:[%s7862_s4] ss:$0 sm:$0xff]  ;;  %v8831_v37 = vld [vmem:[#allocation223_spill] sm:$0xff] }
 0x33e   : > { %v3200_v13 = vmul.f32 %v4399_v59, %v8810_v58  ;;  %v3467_v42 = vadd.f32 %v7187_v31, %v3332_v16  ;;  %v2569_v63 = vsub.f32 %v2313_v38, %v8815_v30  ;;  %4414 = vrsqrt.f32 %v2824_v47  ;;  %v4403_v3 = vpop.eup %4402  ;;  %v8824_v16 = vld [vmem:[#allocation27_spill] sm:$0xff]  ;;  %v8825_v28 = vld [vmem:[#allocation89_spill] sm:$0xff]  ;;  %v8829_v47 = vld [vmem:[#allocation90_spill] sm:$0xff] }
 0x33f   : > { %v3199_v61 = vmul.f32 %v4401_v2, %v8814_v56  ;;  %3596 = vst [vmem:[%s5255_s6 + $0x288] sm:$0xff] %v3468_v40  ;;  %v2698_v20 = vmax.f32 %v2570_v48, 0.0  ;;  %v2316_v55 = vmul.f32 0.0078125, %v2156_v24  ;;  %4416 = vrsqrt.f32 %v2823_v21  ;;  %v4405_v52 = vpop.eup %4404  ;;  %v2164_v56 = vpop.xlane.xlu1 %2163 }
 0x340   : > { %v3335_v54 = vmul.f32 %v7180_v35, %v3200_v13  ;;  %3595 = vst [vmem:[%s5255_s6 + $0x280] sm:$0xff] %v3467_v42  ;;  %v2697_v57 = vmax.f32 %v2569_v63, 0.0  ;;  %v2315_v33 = vmul.f32 0.0078125, %v2154_v6  ;;  %v8818_v14 = vsub.f32 %v8816_v62, %v8817_v18  ;;  %v8828_v13 = vld [vmem:[#allocation28_spill] sm:$0xff]  ;;  %v8835_v62 = vld [vmem:[#allocation130_spill] sm:$0xff] }
 0x341   : > { %v3334_v41 = vmul.f32 %v7180_v35, %v3199_v61  ;;  %v2826_v53 = vadd.f32 1e-05, %v2698_v20  ;;  %v2572_v39 = vsub.f32 %v2316_v55, %v8819_v22  ;;  %v8822_v10 = vsub.f32 %v8820_v27, %v8821_v26  ;;  %v8839_v27 = vld [vmem:[#allocation153_spill] sm:$0xff] }
 0x342   : > { %v3470_v50 = vadd.f32 %v7187_v31, %v3335_v54  ;;  %v3202_v29 = vmul.f32 %v4403_v3, %v8818_v14  ;;  %v2825_v34 = vadd.f32 1e-05, %v2697_v57  ;;  %v2571_v15 = vsub.f32 %v2315_v33, %v8823_v19  ;;  %v4407_v46 = vpop.eup %4406  ;;  %v8833_v57 = vld [vmem:[#allocation97_spill] sm:$0xff] }
 0x343   : > { %v3469_v5 = vadd.f32 %v7187_v31, %v3334_v41  ;;  %v3201_v35 = vmul.f32 %v4405_v52, %v8822_v10  ;;  %4418 = vrsqrt.f32 %v2826_v53  ;;  %v2700_v4 = vmax.f32 %v2572_v39, 0.0  ;;  %v2158_v31 = vpop.xlane.xlu0 %2157  ;;  %v4409_v12 = vpop.eup %4408  ;;  %v8832_v41 = vld [vmem:[#allocation31_spill] sm:$0xff] }
 0x344   : > { %3598 = vst [vmem:[%s5255_s6 + $0x298] sm:$0xff] %v3470_v50  ;;  %v3337_v49 = vmul.f32 %v7519_v1, %v3202_v29  ;;  %v2318_v51 = vmul.f32 0.0078125, %v2160_v43  ;;  %4420 = vrsqrt.f32 %v2825_v34  ;;  %v2699_v32 = vmax.f32 %v2571_v15, 0.0  ;;  %v8836_v29 = vld [vmem:[#allocation32_spill] sm:$0xff]  ;;  %v8837_v53 = vld [vmem:[#allocation99_spill] sm:$0xff]  ;;  %v2168_v10 = vpop.xlane.xlu1 %2167 }
 0x345   : > { %3597 = vst [vmem:[%s5255_s6 + $0x290] sm:$0xff] %v3469_v5  ;;  %v3336_v25 = vmul.f32 %v7519_v1, %v3201_v35  ;;  %v2317_v0 = vmul.f32 0.0078125, %v2158_v31  ;;  %v8826_v38 = vsub.f32 %v8824_v16, %v8825_v28  ;;  %v2828_v40 = vadd.f32 1e-05, %v2700_v4  ;;  %v8843_v16 = vld [vmem:[#allocation133_spill] sm:$0xff] }
 0x346   : > { %v3472_v59 = vadd.f32 %v7527_v8, %v3337_v49  ;;  %v2574_v17 = vsub.f32 %v2318_v51, %v8827_v9  ;;  %v8830_v36 = vsub.f32 %v8828_v13, %v8829_v47  ;;  %v2827_v42 = vadd.f32 1e-05, %v2699_v32  ;;  %v8841_v32 = vld [vmem:[#allocation105_spill] sm:$0xff]  ;;  %v8847_v13 = vld [vmem:[#allocation224_spill] sm:$0xff] }
 0x347   : > { %v3204_v2 = vmul.f32 %v4407_v46, %v8826_v38  ;;  %v3471_v58 = vadd.f32 %v7527_v8, %v3336_v25  ;;  %v2573_v7 = vsub.f32 %v2317_v0, %v8831_v37  ;;  %4422 = vrsqrt.f32 %v2828_v40  ;;  %v2162_v63 = vpop.xlane.xlu0 %2161  ;;  %v4411_v24 = vpop.eup %4410  ;;  %v8840_v25 = vld [vmem:[#allocation35_spill] sm:$0xff] }
 0x348   : > { %v3203_v48 = vmul.f32 %v4409_v12, %v8830_v36  ;;  %3600 = vst [vmem:[%s5255_s6 + $0x2a8] sm:$0xff] %v3472_v59  ;;  %v2702_v21 = vmax.f32 %v2574_v17, 0.0  ;;  %v2320_v30 = vmul.f32 0.0078125, %v2164_v56  ;;  %4424 = vrsqrt.f32 %v2827_v42  ;;  %v4413_v6 = vpop.eup %4412  ;;  %v8845_v40 = vld [vmem:[#allocation107_spill] sm:$0xff]  ;;  %v2172_v36 = vpop.xlane.xlu1 %2171 }
 0x349   : > { %v3339_v61 = vmul.f32 %v7519_v1, %v3204_v2  ;;  %3599 = vst [vmem:[%s5255_s6 + $0x2a0] sm:$0xff] %v3471_v58  ;;  %v2701_v20 = vmax.f32 %v2573_v7, 0.0  ;;  %v2319_v55 = vmul.f32 0.0078125, %v2162_v63  ;;  %v8834_v33 = vsub.f32 %v8832_v41, %v8833_v57  ;;  %v8844_v2 = vld [vmem:[#allocation36_spill] sm:$0xff]  ;;  %v8851_v41 = vld [vmem:[#allocation135_spill] sm:$0xff] }
 0x34a   : > { %v3338_v54 = vmul.f32 %v7519_v1, %v3203_v48  ;;  %v2830_v50 = vadd.f32 1e-05, %v2702_v21  ;;  %v2576_v18 = vsub.f32 %v2320_v30, %v8835_v62  ;;  %v8838_v22 = vsub.f32 %v8836_v29, %v8837_v53  ;;  %v8855_v29 = vld [vmem:[#allocation155_spill] sm:$0xff] }
 0x34b   : > { %v3474_v3 = vadd.f32 %v7527_v8, %v3339_v61  ;;  %v3206_v52 = vmul.f32 %v4411_v24, %v8834_v33  ;;  %v2829_v5 = vadd.f32 1e-05, %v2701_v20  ;;  %v2575_v26 = vsub.f32 %v2319_v55, %v8839_v27  ;;  %v2166_v15 = vpop.xlane.xlu0 %2165  ;;  %v4415_v43 = vpop.eup %4414  ;;  %v8849_v20 = vld [vmem:[#allocation113_spill] sm:$0xff] }
 0x34c   : > { %v3473_v14 = vadd.f32 %v7527_v8, %v3338_v54  ;;  %v3205_v39 = vmul.f32 %v4413_v6, %v8838_v22  ;;  %4426 = vrsqrt.f32 %v2830_v50  ;;  %v2704_v34 = vmax.f32 %v2576_v18, 0.0  ;;  %v4417_v31 = vpop.eup %4416  ;;  %v8848_v54 = vld [vmem:[#allocation39_spill] sm:$0xff]  ;;  %v2176_v22 = vpop.xlane.xlu1 %2175 }
 0x34d   : > { %3602 = vst [vmem:[%s5255_s6 + $0x2b8] sm:$0xff] %v3474_v3  ;;  %v3341_v35 = vmul.f32 %v7519_v1, %v3206_v52  ;;  %v2322_v19 = vmul.f32 0.0078125, %v2168_v10  ;;  %4428 = vrsqrt.f32 %v2829_v5  ;;  %v2703_v4 = vmax.f32 %v2575_v26, 0.0  ;;  %v8852_v52 = vld [vmem:[#allocation40_spill] sm:$0xff]  ;;  %v8853_v50 = vld [vmem:[#allocation115_spill] sm:$0xff] }
 0x34e   : > { %3601 = vst [vmem:[%s5255_s6 + $0x2b0] sm:$0xff] %v3473_v14  ;;  %v3340_v49 = vmul.f32 %v7519_v1, %v3205_v39  ;;  %v2321_v51 = vmul.f32 0.0078125, %v2166_v15  ;;  %v8842_v0 = vsub.f32 %v8840_v25, %v8841_v32  ;;  %v2832_v59 = vadd.f32 1e-05, %v2704_v34  ;;  %v8859_v25 = vld [vmem:[#allocation63_spill] sm:$0xff] }
 0x34f   : > { %v3476_v46 = vadd.f32 %v7527_v8, %v3341_v35  ;;  %v2578_v28 = vsub.f32 %v2322_v19, %v8843_v16  ;;  %v8846_v9 = vsub.f32 %v8844_v2, %v8845_v40  ;;  %v2831_v58 = vadd.f32 1e-05, %v2703_v4  ;;  %v2170_v7 = vpop.xlane.xlu0 %2169  ;;  %v8857_v4 = vld [vmem:[#allocation121_spill] sm:$0xff]  ;;  %v8863_v2 = vld [vmem:[#allocation139_spill] sm:$0xff] }
 0x350   : > { %v3208_v12 = vmul.f32 %v4415_v43, %v8842_v0  ;;  %v3475_v38 = vadd.f32 %v7527_v8, %v3340_v49  ;;  %v2577_v47 = vsub.f32 %v2321_v51, %v8847_v13  ;;  %4430 = vrsqrt.f32 %v2832_v59  ;;  %v4419_v56 = vpop.eup %4418  ;;  %v8856_v49 = vld [vmem:[#allocation43_spill] sm:$0xff] }
 0x351   : > { %v3207_v17 = vmul.f32 %v4417_v31, %v8846_v9  ;;  %3604 = vst [vmem:[%s5255_s6 + $0x2c8] sm:$0xff] %v3476_v46  ;;  %v2706_v42 = vmax.f32 %v2578_v28, 0.0  ;;  %v2324_v37 = vmul.f32 0.0078125, %v2172_v36  ;;  %4432 = vrsqrt.f32 %v2831_v58  ;;  %v4421_v63 = vpop.eup %4420  ;;  %v8861_v59 = vld [vmem:[#allocation123_spill] sm:$0xff]  ;;  %v2180_v9 = vpop.xlane.xlu1 %2179 }
 0x352   : > { %v3343_v48 = vmul.f32 %v7519_v1, %v3208_v12  ;;  %3603 = vst [vmem:[%s5255_s6 + $0x2c0] sm:$0xff] %v3475_v38  ;;  %v2705_v21 = vmax.f32 %v2577_v47, 0.0  ;;  %v2323_v30 = vmul.f32 0.0078125, %v2170_v7  ;;  %v8850_v55 = vsub.f32 %v8848_v54, %v8849_v20  ;;  %v8860_v12 = vld [vmem:[#allocation44_spill] sm:$0xff]  ;;  %v8867_v54 = vld [vmem:[#allocation157_spill] sm:$0xff] }
 0x353   : > { %v3342_v61 = vmul.f32 %v7519_v1, %v3207_v17  ;;  %v2834_v3 = vadd.f32 1e-05, %v2706_v42  ;;  %v2580_v57 = vsub.f32 %v2324_v37, %v8851_v41  ;;  %v8854_v62 = vsub.f32 %v8852_v52, %v8853_v50  ;;  %v2174_v26 = vpop.xlane.xlu0 %2173  ;;  %v8871_v52 = vld [vmem:[#allocation142_spill] sm:$0xff] }
 0x354   : > { %v3478_v24 = vadd.f32 %v7527_v8, %v3343_v48  ;;  %v3210_v6 = vmul.f32 %v4419_v56, %v8850_v55  ;;  %v2833_v14 = vadd.f32 1e-05, %v2705_v21  ;;  %v2579_v53 = vsub.f32 %v2323_v30, %v8855_v29  ;;  %v4423_v10 = vpop.eup %4422  ;;  %v8865_v21 = vld [vmem:[#allocation216_spill] sm:$0xff] }
 0x355   : > { %v3477_v33 = vadd.f32 %v7527_v8, %v3342_v61  ;;  %v3209_v18 = vmul.f32 %v4421_v63, %v8854_v62  ;;  %4434 = vrsqrt.f32 %v2834_v3  ;;  %v2708_v5 = vmax.f32 %v2580_v57, 0.0  ;;  %v4425_v15 = vpop.eup %4424  ;;  %v8864_v61 = vld [vmem:[#allocation47_spill] sm:$0xff]  ;;  %v8869_v3 = vld [vmem:[#allocation217_spill] sm:$0xff]  ;;  %v2184_v62 = vpop.xlane.xlu1 %2183 }
 0x356   : > { %3606 = vst [vmem:[%s5255_s6 + $0x2d8] sm:$0xff] %v3478_v24  ;;  %v3345_v39 = vmul.f32 %v7519_v1, %v3210_v6  ;;  %v2326_v27 = vmul.f32 0.0078125, %v2176_v22  ;;  %4436 = vrsqrt.f32 %v2833_v14  ;;  %v2707_v34 = vmax.f32 %v2579_v53, 0.0  ;;  %v8868_v6 = vld [vmem:[#allocation48_spill] sm:$0xff] }
 0x357   : > { %3605 = vst [vmem:[%s5255_s6 + $0x2d0] sm:$0xff] %v3477_v33  ;;  %v3344_v35 = vmul.f32 %v7519_v1, %v3209_v18  ;;  %v2325_v19 = vmul.f32 0.0078125, %v2174_v26  ;;  %v8858_v51 = vsub.f32 %v8856_v49, %v8857_v4  ;;  %v2836_v46 = vadd.f32 1e-05, %v2708_v5  ;;  %v2178_v47 = vpop.xlane.xlu0 %2177  ;;  %v8875_v49 = vld [vmem:[#allocation146_spill] sm:$0xff] }
 0x358   : > { %v3480_v43 = vadd.f32 %v7527_v8, %v3345_v39  ;;  %v2582_v32 = vsub.f32 %v2326_v27, %v8859_v25  ;;  %v8862_v16 = vsub.f32 %v8860_v12, %v8861_v59  ;;  %v2835_v38 = vadd.f32 1e-05, %v2707_v34  ;;  %v8873_v34 = vld [vmem:[#allocation220_spill] sm:$0xff]  ;;  %v8879_v12 = vld [vmem:[#allocation159_spill] sm:$0xff] }
 0x359   : > { %v3212_v31 = vmul.f32 %v4423_v10, %v8858_v51  ;;  %v3479_v0 = vadd.f32 %v7527_v8, %v3344_v35  ;;  %v2581_v40 = vsub.f32 %v2325_v19, %v8863_v2  ;;  %4438 = vrsqrt.f32 %v2836_v46  ;;  %v4427_v36 = vpop.eup %4426  ;;  %v8872_v35 = vld [vmem:[#allocation51_spill] sm:$0xff] }
 0x35a   : > { %v3211_v28 = vmul.f32 %v4425_v15, %v8862_v16  ;;  %3608 = vst [vmem:[%s5255_s6 + $0x2e8] sm:$0xff] %v3480_v43  ;;  %v2710_v58 = vmax.f32 %v2582_v32, 0.0  ;;  %v2328_v13 = vmul.f32 0.0078125, %v2180_v9  ;;  %4440 = vrsqrt.f32 %v2835_v38  ;;  %v4429_v7 = vpop.eup %4428  ;;  %v8877_v46 = vld [vmem:[#allocation127_spill] sm:$0xff]  ;;  %v2188_v16 = vpop.xlane.xlu1 %2187 }
 0x35b   : > { %v3347_v17 = vmul.f32 %v7519_v1, %v3212_v31  ;;  %3607 = vst [vmem:[%s5255_s6 + $0x2e0] sm:$0xff] %v3479_v0  ;;  %v2709_v42 = vmax.f32 %v2581_v40, 0.0  ;;  %v2327_v37 = vmul.f32 0.0078125, %v2178_v47  ;;  %v8866_v30 = vsub.f32 %v8864_v61, %v8865_v21  ;;  %v2182_v53 = vpop.xlane.xlu0 %2181  ;;  %v8876_v31 = vld [vmem:[#allocation52_spill] sm:$0xff]  ;;  %v8883_v61 = vld [vmem:[#allocation150_spill] sm:$0xff] }
 0x35c   : > { %v3346_v48 = vmul.f32 %v7519_v1, %v3211_v28  ;;  %v2838_v24 = vadd.f32 1e-05, %v2710_v58  ;;  %v2584_v20 = vsub.f32 %v2328_v13, %v8867_v54  ;;  %v8870_v41 = vsub.f32 %v8868_v6, %v8869_v3  ;;  %v8887_v6 = vld [vmem:[#allocation160_spill] sm:$0xff] }
 0x35d   : > { %v3482_v56 = vadd.f32 %v7527_v8, %v3347_v17  ;;  %v3214_v63 = vmul.f32 %v4427_v36, %v8866_v30  ;;  %v2837_v33 = vadd.f32 1e-05, %v2709_v42  ;;  %v2583_v50 = vsub.f32 %v2327_v37, %v8871_v52  ;;  %v4431_v22 = vpop.eup %4430  ;;  %v8881_v42 = vld [vmem:[#allocation128_spill] sm:$0xff] }
 0x35e   : > { %v3481_v55 = vadd.f32 %v7527_v8, %v3346_v48  ;;  %v3213_v57 = vmul.f32 %v4429_v7, %v8870_v41  ;;  %4442 = vrsqrt.f32 %v2838_v24  ;;  %v2712_v14 = vmax.f32 %v2584_v20, 0.0  ;;  %v4433_v26 = vpop.eup %4432  ;;  %v8880_v48 = vld [vmem:[#allocation55_spill] sm:$0xff]  ;;  %v8885_v24 = vld [vmem:[#allocation129_spill] sm:$0xff]  ;;  %v2192_v41 = vpop.xlane.xlu1 %2191 }
 0x35f   : > { %3610 = vst [vmem:[%s5255_s6 + $0x2f8] sm:$0xff] %v3482_v56  ;;  %v3349_v18 = vmul.f32 %v7519_v1, %v3214_v63  ;;  %v2330_v29 = vmul.f32 0.0078125, %v2184_v62  ;;  %4444 = vrsqrt.f32 %v2837_v33  ;;  %v2711_v5 = vmax.f32 %v2583_v50, 0.0  ;;  %v2186_v40 = vpop.xlane.xlu0 %2185  ;;  %v8884_v63 = vld [vmem:[#allocation56_spill] sm:$0xff] }
 0x360   : > { %3609 = vst [vmem:[%s5255_s6 + $0x2f0] sm:$0xff] %v3481_v55  ;;  %v3348_v39 = vmul.f32 %v7519_v1, %v3213_v57  ;;  %v2329_v27 = vmul.f32 0.0078125, %v2182_v53  ;;  %v8874_v19 = vsub.f32 %v8872_v35, %v8873_v34  ;;  %v2840_v43 = vadd.f32 1e-05, %v2712_v14  ;;  %v8891_v35 = vld [vmem:[#allocation166_spill] sm:$0xff] }
 0x361   : > { %v3484_v10 = vadd.f32 %v7527_v8, %v3349_v18  ;;  %v2586_v4 = vsub.f32 %v2330_v29, %v8875_v49  ;;  %v8878_v25 = vsub.f32 %v8876_v31, %v8877_v46  ;;  %v2839_v0 = vadd.f32 1e-05, %v2711_v5  ;;  %v8889_v5 = vld [vmem:[#allocation131_spill] sm:$0xff]  ;;  %v8895_v31 = vld [vmem:[#allocation85_spill] sm:$0xff] }
 0x362   : > { %v3216_v15 = vmul.f32 %v4431_v22, %v8874_v19  ;;  %v3483_v51 = vadd.f32 %v7527_v8, %v3348_v39  ;;  %v2585_v59 = vsub.f32 %v2329_v27, %v8879_v12  ;;  %4446 = vrsqrt.f32 %v2840_v43  ;;  %v4435_v9 = vpop.eup %4434  ;;  %v8888_v39 = vld [vmem:[#allocation61_spill] sm:$0xff]  ;;  %v8893_v43 = vld [vmem:[#allocation132_spill] sm:$0xff] }
 0x363   : > { %v3215_v32 = vmul.f32 %v4433_v26, %v8878_v25  ;;  %3612 = vst [vmem:[%s5255_s6 + $0x308] sm:$0xff] %v3484_v10  ;;  %v2714_v38 = vmax.f32 %v2586_v4, 0.0  ;;  %v2332_v2 = vmul.f32 0.0078125, %v2188_v16  ;;  %4448 = vrsqrt.f32 %v2839_v0  ;;  %v4437_v47 = vpop.eup %4436  ;;  %v2190_v50 = vpop.xlane.xlu0 %2189 }
 0x364   : > { %v3351_v28 = vmul.f32 %v7519_v1, %v3216_v15  ;;  %3611 = vst [vmem:[%s5255_s6 + $0x300] sm:$0xff] %v3483_v51  ;;  %v2713_v58 = vmax.f32 %v2585_v59, 0.0  ;;  %v2331_v13 = vmul.f32 0.0078125, %v2186_v40  ;;  %v8882_v37 = vsub.f32 %v8880_v48, %v8881_v42  ;;  %v8892_v15 = vld [vmem:[#allocation62_spill] sm:$0xff]  ;;  %v2196_v25 = vpop.xlane.xlu1 %2195  ;;  %v8899_v48 = vld [vmem:[#allocation165_spill] sm:$0xff] }
 0x365   : > { %v3350_v17 = vmul.f32 %v7519_v1, %v3215_v32  ;;  %v2842_v56 = vadd.f32 1e-05, %v2714_v38  ;;  %v2588_v21 = vsub.f32 %v2332_v2, %v8883_v61  ;;  %v8886_v54 = vsub.f32 %v8884_v63, %v8885_v24  ;;  %v8903_v63 = vld [vmem:[#allocation225_spill] sm:$0xff] }
 0x366   : > { %v3486_v36 = vadd.f32 %v7527_v8, %v3351_v28  ;;  %v3218_v7 = vmul.f32 %v4435_v9, %v8882_v37  ;;  %v2841_v55 = vadd.f32 1e-05, %v2713_v58  ;;  %v2587_v3 = vsub.f32 %v2331_v13, %v8887_v6  ;;  %v4439_v62 = vpop.eup %4438  ;;  %v8897_v58 = vld [vmem:[#allocation154_spill] sm:$0xff] }
 0x367   : > { %v3485_v30 = vadd.f32 %v7527_v8, %v3350_v17  ;;  %v3217_v20 = vmul.f32 %v4437_v47, %v8886_v54  ;;  %4450 = vrsqrt.f32 %v2842_v56  ;;  %v2716_v33 = vmax.f32 %v2588_v21, 0.0  ;;  %v4441_v53 = vpop.eup %4440  ;;  %v2194_v59 = vpop.xlane.xlu0 %2193  ;;  %v8896_v17 = vld [vmem:[#allocation67_spill] sm:$0xff] }
 0x368   : > { %3614 = vst [vmem:[%s5255_s6 + $0x318] sm:$0xff] %v3486_v36  ;;  %v3353_v57 = vmul.f32 %v7519_v1, %v3218_v7  ;;  %v2334_v52 = vmul.f32 0.0078125, %v2192_v41  ;;  %4452 = vrsqrt.f32 %v2841_v55  ;;  %v2715_v14 = vmax.f32 %v2587_v3, 0.0  ;;  %v8900_v7 = vld [vmem:[#allocation68_spill] sm:$0xff]  ;;  %v8901_v56 = vld [vmem:[#allocation59_spill] sm:$0xff]  ;;  %v2200_v54 = vpop.xlane.xlu1 %2199 }
 0x369   : > { %3613 = vst [vmem:[%s5255_s6 + $0x310] sm:$0xff] %v3485_v30  ;;  %v3352_v18 = vmul.f32 %v7519_v1, %v3217_v20  ;;  %v2333_v29 = vmul.f32 0.0078125, %v2190_v50  ;;  %v8890_v27 = vsub.f32 %v8888_v39, %v8889_v5  ;;  %v2844_v10 = vadd.f32 1e-05, %v2716_v33  ;;  %v8907_v39 = vld [vmem:[#allocation95_spill] sm:$0xff] }
 0x36a   : > { %v3488_v22 = vadd.f32 %v7527_v8, %v3353_v57  ;;  %v2590_v34 = vsub.f32 %v2334_v52, %v8891_v35  ;;  %v8894_v49 = vsub.f32 %v8892_v15, %v8893_v43  ;;  %v2843_v51 = vadd.f32 1e-05, %v2715_v14  ;;  %v8905_v14 = vld [vmem:[#allocation137_spill] sm:$0xff]  ;;  %v8911_v15 = vld [vmem:[#allocation227_spill] sm:$0xff] }
 0x36b   : > { %v3220_v26 = vmul.f32 %v4439_v62, %v8890_v27  ;;  %v3487_v19 = vadd.f32 %v7527_v8, %v3352_v18  ;;  %v2589_v46 = vsub.f32 %v2333_v29, %v8895_v31  ;;  %4454 = vrsqrt.f32 %v2844_v10  ;;  %v4443_v16 = vpop.eup %4442  ;;  %v2198_v3 = vpop.xlane.xlu0 %2197  ;;  %v8904_v18 = vld [vmem:[#allocation71_spill] sm:$0xff]  ;;  %v8909_v10 = vld [vmem:[#allocation138_spill] sm:$0xff] }
 0x36c   : > { %v3219_v4 = vmul.f32 %v4441_v53, %v8894_v49  ;;  %3616 = vst [vmem:[%s5255_s6 + $0x328] sm:$0xff] %v3488_v22  ;;  %v2718_v0 = vmax.f32 %v2590_v34, 0.0  ;;  %v2336_v12 = vmul.f32 0.0078125, %v2196_v25  ;;  %4456 = vrsqrt.f32 %v2843_v51  ;;  %v4445_v40 = vpop.eup %4444  ;;  %v2204_v49 = vpop.xlane.xlu1 %2203 }
 0x36d   : > { %v3355_v32 = vmul.f32 %v7519_v1, %v3220_v26  ;;  %3615 = vst [vmem:[%s5255_s6 + $0x320] sm:$0xff] %v3487_v19  ;;  %v2717_v38 = vmax.f32 %v2589_v46, 0.0  ;;  %v2335_v2 = vmul.f32 0.0078125, %v2194_v59  ;;  %v8898_v13 = vsub.f32 %v8896_v17, %v8897_v58  ;;  %v8908_v26 = vld [vmem:[#allocation72_spill] sm:$0xff]  ;;  %v8915_v17 = vld [vmem:[#allocation231_spill] sm:$0xff] }
 0x36e   : > { %v3354_v28 = vmul.f32 %v7519_v1, %v3219_v4  ;;  %v2846_v36 = vadd.f32 1e-05, %v2718_v0  ;;  %v2592_v42 = vsub.f32 %v2336_v12, %v8899_v48  ;;  %v8902_v61 = vsub.f32 %v8900_v7, %v8901_v56  ;;  %v8919_v7 = vld [vmem:[#allocation233_spill] sm:$0xff] }
 0x36f   : > { %v3490_v9 = vadd.f32 %v7527_v8, %v3355_v32  ;;  %v3222_v47 = vmul.f32 %v4443_v16, %v8898_v13  ;;  %v2845_v30 = vadd.f32 1e-05, %v2717_v38  ;;  %v2591_v24 = vsub.f32 %v2335_v2, %v8903_v63  ;;  %v4447_v41 = vpop.eup %4446  ;;  %v2202_v46 = vpop.xlane.xlu0 %2201  ;;  %v8913_v38 = vld [vmem:[#allocation140_spill] sm:$0xff] }
 0x370   : > { %v3489_v37 = vadd.f32 %v7527_v8, %v3354_v28  ;;  %v3221_v21 = vmul.f32 %v4445_v40, %v8902_v61  ;;  %4458 = vrsqrt.f32 %v2846_v36  ;;  %v2720_v55 = vmax.f32 %v2592_v42, 0.0  ;;  %v4449_v50 = vpop.eup %4448  ;;  %v8912_v28 = vld [vmem:[#allocation77_spill] sm:$0xff]  ;;  %v2208_v61 = vpop.xlane.xlu1 %2207 }
 0x371   : > { %3618 = vst [vmem:[%s5255_s6 + $0x338] sm:$0xff] %v3490_v9  ;;  %v3357_v20 = vmul.f32 %v7519_v1, %v3222_v47  ;;  %v2338_v6 = vmul.f32 0.0078125, %v2200_v54  ;;  %4460 = vrsqrt.f32 %v2845_v30  ;;  %v2719_v33 = vmax.f32 %v2591_v24, 0.0  ;;  %v8916_v47 = vld [vmem:[#allocation78_spill] sm:$0xff]  ;;  %v8917_v36 = vld [vmem:[#allocation141_spill] sm:$0xff] }
 0x372   : > { %3617 = vst [vmem:[%s5255_s6 + $0x330] sm:$0xff] %v3489_v37  ;;  %v3356_v57 = vmul.f32 %v7519_v1, %v3221_v21  ;;  %v2337_v52 = vmul.f32 0.0078125, %v2198_v3  ;;  %v8906_v29 = vsub.f32 %v8904_v18, %v8905_v14  ;;  %v2848_v22 = vadd.f32 1e-05, %v2720_v55  ;;  %v8923_v18 = vld [vmem:[#allocation106_spill] sm:$0xff] }
 0x373   : > { %v3492_v62 = vadd.f32 %v7527_v8, %v3357_v20  ;;  %v2594_v5 = vsub.f32 %v2338_v6, %v8907_v39  ;;  %v8910_v35 = vsub.f32 %v8908_v26, %v8909_v10  ;;  %v2847_v19 = vadd.f32 1e-05, %v2719_v33  ;;  %v2206_v24 = vpop.xlane.xlu0 %2205  ;;  %v8921_v33 = vld [vmem:[#allocation145_spill] sm:$0xff]  ;;  %v8927_v26 = vld [vmem:[#allocation170_spill] sm:$0xff] }
 0x374   : > { %v3224_v53 = vmul.f32 %v4447_v41, %v8906_v29  ;;  %v3491_v27 = vadd.f32 %v7527_v8, %v3356_v57  ;;  %v2593_v43 = vsub.f32 %v2337_v52, %v8911_v15  ;;  %4462 = vrsqrt.f32 %v2848_v22  ;;  %v4451_v25 = vpop.eup %4450  ;;  %v8920_v57 = vld [vmem:[#allocation83_spill] sm:$0xff]  ;;  %v8925_v22 = vld [vmem:[#allocation158_spill] sm:$0xff] }
 0x375   : > { %v3223_v34 = vmul.f32 %v4449_v50, %v8910_v35  ;;  %3620 = vst [vmem:[%s5255_s6 + $0x348] sm:$0xff] %v3492_v62  ;;  %v2722_v51 = vmax.f32 %v2594_v5, 0.0  ;;  %v2340_v31 = vmul.f32 0.0078125, %v2204_v49  ;;  %4464 = vrsqrt.f32 %v2847_v19  ;;  %v4453_v59 = vpop.eup %4452  ;;  %v2212_v35 = vpop.xlane.xlu1 %2211 }
 0x376   : > { %v3359_v4 = vmul.f32 %v7519_v1, %v3224_v53  ;;  %3619 = vst [vmem:[%s5255_s6 + $0x340] sm:$0xff] %v3491_v27  ;;  %v2721_v0 = vmax.f32 %v2593_v43, 0.0  ;;  %v2339_v12 = vmul.f32 0.0078125, %v2202_v46  ;;  %v8914_v2 = vsub.f32 %v8912_v28, %v8913_v38  ;;  %v8924_v53 = vld [vmem:[#allocation84_spill] sm:$0xff] }
 0x377   : > { %v3358_v32 = vmul.f32 %v7519_v1, %v3223_v34  ;;  %v2850_v9 = vadd.f32 1e-05, %v2722_v51  ;;  %v2596_v58 = vsub.f32 %v2340_v31, %v8915_v17  ;;  %v8918_v48 = vsub.f32 %v8916_v47, %v8917_v36  ;;  %v2210_v43 = vpop.xlane.xlu0 %2209 }
 0x378   : > { %v3494_v16 = vadd.f32 %v7527_v8, %v3359_v4  ;;  %v3226_v40 = vmul.f32 %v4451_v25, %v8914_v2  ;;  %v2849_v37 = vadd.f32 1e-05, %v2721_v0  ;;  %v2595_v56 = vsub.f32 %v2339_v12, %v8919_v7  ;;  %v4455_v54 = vpop.eup %4454  ;;  %v8929_v0 = vld [vmem:[#allocation148_spill] sm:$0xff] }
 0x379   : > { %v3493_v13 = vadd.f32 %v7527_v8, %v3358_v32  ;;  %v3225_v42 = vmul.f32 %v4453_v59, %v8918_v48  ;;  %4466 = vrsqrt.f32 %v2850_v9  ;;  %v2724_v30 = vmax.f32 %v2596_v58, 0.0  ;;  %v4457_v3 = vpop.eup %4456  ;;  %v8928_v32 = vld [vmem:[#allocation87_spill] sm:$0xff]  ;;  %v8931_v2 = vld [vmem:[#allocation88_spill] sm:$0xff]  ;;  %v2216_v47 = vpop.xlane.xlu1 %2215 }
 0x37a   : > { %3622 = vst [vmem:[%s5255_s6 + $0x358] sm:$0xff] %v3494_v16  ;;  %v3361_v21 = vmul.f32 %v7519_v1, %v3226_v40  ;;  %v2342_v63 = vmul.f32 0.0078125, %v2208_v61  ;;  %4468 = vrsqrt.f32 %v2849_v37  ;;  %v2723_v55 = vmax.f32 %v2595_v56, 0.0  ;;  %v8932_v40 = vld [vmem:[#allocation149_spill] sm:$0xff] }
 0x37b   : > { %3621 = vst [vmem:[%s5255_s6 + $0x350] sm:$0xff] %v3493_v13  ;;  %v3360_v20 = vmul.f32 %v7519_v1, %v3225_v42  ;;  %v2341_v6 = vmul.f32 0.0078125, %v2206_v24  ;;  %v8922_v52 = vsub.f32 %v8920_v57, %v8921_v33  ;;  %v2852_v62 = vadd.f32 1e-05, %v2724_v30  ;;  %v2214_v37 = vpop.xlane.xlu0 %2213 }
 0x37c   : > { %v3496_v41 = vadd.f32 %v7527_v8, %v3361_v21  ;;  %v2598_v14 = vsub.f32 %v2342_v63, %v8923_v18  ;;  %v8926_v39 = vsub.f32 %v8924_v53, %v8925_v22  ;;  %v2851_v27 = vadd.f32 1e-05, %v2723_v55  ;;  %v8935_v63 = vld [vmem:[#allocation162_spill] sm:$0xff] }
 0x37d   : > { %v3228_v50 = vmul.f32 %v4455_v54, %v8922_v52  ;;  %v3495_v29 = vadd.f32 %v7527_v8, %v3360_v20  ;;  %v2597_v10 = vsub.f32 %v2341_v6, %v8927_v26  ;;  %4470 = vrsqrt.f32 %v2852_v62  ;;  %v4459_v49 = vpop.eup %4458  ;;  %v2220_v18 = vpop.xlane.xlu1 %2219 }
 0x37e   : > { %v3227_v5 = vmul.f32 %v4457_v3, %v8926_v39  ;;  %3624 = vst [vmem:[%s5255_s6 + $0x368] sm:$0xff] %v3496_v41  ;;  %v2726_v19 = vmax.f32 %v2598_v14, 0.0  ;;  %v2344_v15 = vmul.f32 0.0078125, %v2212_v35  ;;  %4472 = vrsqrt.f32 %v2851_v27  ;;  %v4461_v46 = vpop.eup %4460  ;;  %v8937_v3 = vld [vmem:[#allocation94_spill] sm:$0xff]  ;;  %v8938_v41 = vld [vmem:[#allocation161_spill] sm:$0xff] }
 0x37f   : > { %v3363_v34 = vmul.f32 %v7519_v1, %v3228_v50  ;;  %3623 = vst [vmem:[%s5255_s6 + $0x360] sm:$0xff] %v3495_v29  ;;  %v2725_v51 = vmax.f32 %v2597_v10, 0.0  ;;  %v2343_v31 = vmul.f32 0.0078125, %v2210_v43  ;;  %v8930_v12 = vsub.f32 %v8928_v32, %v8929_v0  ;;  %v8940_v50 = vld [vmem:[#allocation112_spill] sm:$0xff]  ;;  %v2218_v22 = vpop.xlane.xlu0 %2217  ;;  %v8941_v35 = vld [vmem:[#allocation98_spill] sm:$0xff] }
 0x380   : > { %v3362_v4 = vmul.f32 %v7519_v1, %v3227_v5  ;;  %v2854_v16 = vadd.f32 1e-05, %v2726_v19  ;;  %v2600_v28 = vsub.f32 %v2344_v15, %v7088_v45  ;;  %v8933_v9 = vsub.f32 %v8931_v2, %v8932_v40  ;;  %v8950_v40 = vld [vmem:[#allocation104_spill] sm:$0xff] }
 0x381   : > { %v3498_v25 = vadd.f32 %v7527_v8, %v3363_v34  ;;  %v3230_v59 = vmul.f32 %v4459_v49, %v8930_v12  ;;  %v2853_v58 = vadd.f32 1e-05, %v2725_v51  ;;  %v2599_v13 = vsub.f32 %v2343_v31, %v7092_v44  ;;  %v4463_v7 = vpop.eup %4462  ;;  %v8934_v44 = vld [vmem:[#allocation93_spill] sm:$0xff]  ;;  %v8942_v34 = vld [vmem:[#allocation164_spill] sm:$0xff]  ;;  %v8945_v31 = vld [vmem:[#allocation91_spill] sm:$0xff] }
 0x382   : > { %v3497_v38 = vadd.f32 %v7527_v8, %v3362_v4  ;;  %v3229_v17 = vmul.f32 %v4461_v46, %v8933_v9  ;;  %4474 = vrsqrt.f32 %v2854_v16  ;;  %v2728_v48 = vmax.f32 %v2600_v28, 0.0  ;;  %v4465_v21 = vpop.eup %4464  ;;  %v8944_v51 = vld [vmem:[#allocation100_spill] sm:$0xff] }
 0x383   : > { %3626 = vst [vmem:[%s5255_s6 + $0x378] sm:$0xff] %v3498_v25  ;;  %v3365_v36 = vmul.f32 %v7519_v1, %v3230_v59  ;;  %v2346_v42 = vmul.f32 0.0078125, %v2216_v47  ;;  %4476 = vrsqrt.f32 %v2853_v58  ;;  %v2727_v56 = vmax.f32 %v2599_v13, 0.0  ;;  %v8947_v12 = vld [vmem:[#allocation96_spill] sm:$0xff]  ;;  %v8948_v59 = vld [vmem:[#allocation103_spill] sm:$0xff] }
 0x384   : > { %3625 = vst [vmem:[%s5255_s6 + $0x370] sm:$0xff] %v3497_v38  ;;  %v3364_v45 = vmul.f32 %v7519_v1, %v3229_v17  ;;  %v2345_v61 = vmul.f32 0.0078125, %v2214_v37  ;;  %v8936_v24 = vsub.f32 %v8934_v44, %v8935_v63  ;;  %v2856_v20 = vadd.f32 1e-05, %v2728_v48  ;;  %v8954_v44 = vld [vmem:[#allocation110_spill] sm:$0xff] }
 0x385   : > { %v3500_v30 = vadd.f32 %v7527_v8, %v3365_v36  ;;  %v2602_v55 = vsub.f32 %v2346_v42, %v7126_v23  ;;  %v8939_v57 = vsub.f32 %v8937_v3, %v8938_v41  ;;  %v2855_v52 = vadd.f32 1e-05, %v2727_v56  ;;  %v8955_v41 = vld [vmem:[#allocation108_spill] sm:$0xff] }
 0x386   : > { %v3232_v54 = vmul.f32 %v4463_v7, %v8936_v24  ;;  %v3499_v6 = vadd.f32 %v7527_v8, %v3364_v45  ;;  %v2601_v62 = vsub.f32 %v2345_v61, %v8940_v50  ;;  %4478 = vrsqrt.f32 %v2856_v20  ;;  %v4467_v39 = vpop.eup %4466  ;;  %v8951_v7 = vld [vmem:[#allocation169_spill] sm:$0xff] }
 0x387   : > { %v3231_v33 = vmul.f32 %v4465_v21, %v8939_v57  ;;  %3628 = vst [vmem:[%s5255_s6 + $0x388] sm:$0xff] %v3500_v30  ;;  %v2730_v29 = vmax.f32 %v2602_v55, 0.0  ;;  %v2348_v53 = vmul.f32 0.0078125, %v2220_v18  ;;  %4480 = vrsqrt.f32 %v2855_v52  ;;  %v4469_v26 = vpop.eup %4468  ;;  %v8952_v45 = vld [vmem:[#allocation109_spill] sm:$0xff]  ;;  %v8953_v30 = vld [vmem:[#allocation230_spill] sm:$0xff]  ;;  %v8958_v18 = vld [vmem:[#allocation116_spill] sm:$0xff] }
 0x388   : > { %v3367_v14 = vmul.f32 %v7519_v1, %v3232_v54  ;;  %3627 = vst [vmem:[%s5255_s6 + $0x380] sm:$0xff] %v3499_v6  ;;  %v2729_v5 = vmax.f32 %v2601_v62, 0.0  ;;  %v2347_v27 = vmul.f32 0.0078125, %v2218_v22  ;;  %v8943_v19 = vsub.f32 %v8941_v35, %v8942_v34  ;;  %v8956_v57 = vld [vmem:[#allocation114_spill] sm:$0xff]  ;;  %v8957_v62 = vld [vmem:[#allocation171_spill] sm:$0xff] }
 0x389   : > { %v3366_v23 = vmul.f32 %v7519_v1, %v3231_v33  ;;  %v2858_v43 = vadd.f32 1e-05, %v2730_v29  ;;  %v2604_v49 = vsub.f32 %v2348_v53, %v7161_v11  ;;  %v8946_v46 = vsub.f32 %v8944_v51, %v8945_v31  ;;  %v8949_v11 = vld [vmem:[#allocation228_spill] sm:$0xff] }
 0x38a   : > { %v3502_v10 = vadd.f32 %v7527_v8, %v3367_v14  ;;  %v3234_v15 = vmul.f32 %v4467_v39, %v8943_v19  ;;  %v2857_v32 = vadd.f32 1e-05, %v2729_v5  ;;  %v2603_v0 = vsub.f32 %v2347_v27, %v7170_v60  ;;  %v4471_v2 = vpop.eup %4470  ;;  %v8959_v27 = vld [vmem:[#allocation173_spill] sm:$0xff]  ;;  %v8961_v19 = vld [vmem:[#allocation174_spill] sm:$0xff] }
 0x38b   : > { %v3501_v4 = vadd.f32 %v7527_v8, %v3366_v23  ;;  %v3233_v25 = vmul.f32 %v4469_v26, %v8946_v46  ;;  %v3108_v16 = vsub.f32 %v8948_v59, %v8947_v12  ;;  %4482 = vrsqrt.f32 %v2858_v43  ;;  %v4473_v60 = vpop.eup %4472  ;;  %v8960_v26 = vld [vmem:[#allocation119_spill] sm:$0xff] }
 0x38c   : > { %3630 = vst [vmem:[%s5255_s6 + $0x398] sm:$0xff] %v3502_v10  ;;  %v3369_v28 = vmul.f32 %v7519_v1, %v3234_v15  ;;  %v2732_v38 = vmax.f32 %v2604_v49, 0.0  ;;  %v3107_v9 = vsub.f32 %v8950_v40, %v8949_v11  ;;  %4484 = vrsqrt.f32 %v2857_v32  ;;  %v8962_v15 = vld [vmem:[#allocation120_spill] sm:$0xff]  ;;  %v8963_v32 = vld [vmem:[#allocation175_spill] sm:$0xff] }
 0x38d   : > { %3629 = vst [vmem:[%s5255_s6 + $0x390] sm:$0xff] %v3501_v4  ;;  %v3368_v17 = vmul.f32 %v7519_v1, %v3233_v25  ;;  %v2731_v58 = vmax.f32 %v2603_v0, 0.0  ;;  %v3236_v47 = vmul.f32 %v4471_v2, %v3108_v16  ;;  %v3110_v56 = vsub.f32 %v8952_v45, %v8951_v7  ;;  %v8964_v0 = vld [vmem:[#allocation125_spill] sm:$0xff] }
 0x38e   : > { %v3504_v13 = vadd.f32 %v7527_v8, %v3369_v28  ;;  %v2860_v36 = vadd.f32 1e-05, %v2732_v38  ;;  %v3235_v42 = vmul.f32 %v4473_v60, %v3107_v9  ;;  %v3109_v63 = vsub.f32 %v8954_v44, %v8953_v30  ;;  %v8965_v28 = vld [vmem:[#allocation176_spill] sm:$0xff]  ;;  %v8966_v38 = vld [vmem:[#allocation126_spill] sm:$0xff] }
 0x38f   : > { %v3503_v48 = vadd.f32 %v7527_v8, %v3368_v17  ;;  %v2859_v37 = vadd.f32 1e-05, %v2731_v58  ;;  %v3371_v61 = vmul.f32 %v7519_v1, %v3236_v47  ;;  %v4475_v21 = vpop.eup %4474  ;;  %v3112_v33 = vsub.f32 %v8956_v57, %v8955_v41 }
 0x390   : > { %3632 = vst [vmem:[%s5255_s6 + $0x3a8] sm:$0xff] %v3504_v13  ;;  %4486 = vrsqrt.f32 %v2860_v36  ;;  %v3370_v24 = vmul.f32 %v7519_v1, %v3235_v42  ;;  %v4477_v54 = vpop.eup %4476  ;;  %v3238_v55 = vmul.f32 %v4475_v21, %v3110_v56  ;;  %v3111_v14 = vsub.f32 %v8958_v18, %v8957_v62 }
 0x391   : > { %3631 = vst [vmem:[%s5255_s6 + $0x3a0] sm:$0xff] %v3503_v48  ;;  %4488 = vrsqrt.f32 %v2859_v37  ;;  %v3506_v20 = vadd.f32 %v7527_v8, %v3371_v61  ;;  %v3237_v3 = vmul.f32 %v4477_v54, %v3109_v63  ;;  %v3114_v10 = vsub.f32 %v8960_v26, %v8959_v27 }
 0x392   : > { %v3505_v6 = vadd.f32 %v7527_v8, %v3370_v24  ;;  %v3373_v52 = vmul.f32 %v7519_v1, %v3238_v55  ;;  %v3113_v43 = vsub.f32 %v8962_v15, %v8961_v19  ;;  %v3116_v12 = vsub.f32 %v8964_v0, %v8963_v32 }
 0x393   : > { %3634 = vst [vmem:[%s5255_s6 + $0x3b8] sm:$0xff] %v3506_v20  ;;  %v4479_v50 = vpop.eup %4478  ;;  %v3372_v29 = vmul.f32 %v7519_v1, %v3237_v3  ;;  %v3115_v2 = vsub.f32 %v8966_v38, %v8965_v28 }
 0x394   : > { %3633 = vst [vmem:[%s5255_s6 + $0x3b0] sm:$0xff] %v3505_v6  ;;  %v4481_v53 = vpop.eup %4480  ;;  %v3508_v22 = vadd.f32 %v7527_v8, %v3373_v52  ;;  %v3240_v39 = vmul.f32 %v4479_v50, %v3112_v33 }
 0x395   : > { %v3507_v23 = vadd.f32 %v7527_v8, %v3372_v29  ;;  %v3239_v5 = vmul.f32 %v4481_v53, %v3111_v14 }
 0x396   : > { %3636 = vst [vmem:[%s5255_s6 + $0x3c8] sm:$0xff] %v3508_v22  ;;  %v3375_v35 = vmul.f32 %v7519_v1, %v3240_v39 }
 0x397   : > { %3635 = vst [vmem:[%s5255_s6 + $0x3c0] sm:$0xff] %v3507_v23  ;;  %v3374_v49 = vmul.f32 %v7519_v1, %v3239_v5 }
 0x398   : > { %v4483_v34 = vpop.eup %4482  ;;  %v3510_v51 = vadd.f32 %v7527_v8, %v3375_v35 }
 0x399   : > { %v4485_v4 = vpop.eup %4484  ;;  %v3242_v31 = vmul.f32 %v4483_v34, %v3114_v10  ;;  %v3509_v46 = vadd.f32 %v7527_v8, %v3374_v49 }
 0x39a   : > { %v3241_v25 = vmul.f32 %v4485_v4, %v3113_v43  ;;  %3638 = vst [vmem:[%s5255_s6 + $0x3d8] sm:$0xff] %v3510_v51 }
 0x39b   : > { %v3377_v59 = vmul.f32 %v7519_v1, %v3242_v31  ;;  %3637 = vst [vmem:[%s5255_s6 + $0x3d0] sm:$0xff] %v3509_v46 }
 0x39c   : > { %v3376_v11 = vmul.f32 %v7519_v1, %v3241_v25 }
 0x39d   : > { %v4487_v16 = vpop.eup %4486  ;;  %v3512_v9 = vadd.f32 %v7527_v8, %v3377_v59 }
 0x39e   : > { %v4489_v40 = vpop.eup %4488  ;;  %v3244_v17 = vmul.f32 %v4487_v16, %v3116_v12  ;;  %v3511_v58 = vadd.f32 %v7527_v8, %v3376_v11 }
 0x39f   : > { %v3243_v60 = vmul.f32 %v4489_v40, %v3115_v2  ;;  %3640 = vst [vmem:[%s5255_s6 + $0x3e8] sm:$0xff] %v3512_v9 }
 0x3a0   : > { %v3379_v13 = vmul.f32 %v7519_v1, %v3244_v17  ;;  %3639 = vst [vmem:[%s5255_s6 + $0x3e0] sm:$0xff] %v3511_v58 }
 0x3a1   : > { %v3378_v47 = vmul.f32 %v7519_v1, %v3243_v60 }
 0x3a2   : > { %v3514_v36 = vadd.f32 %v7527_v8, %v3379_v13 }
 0x3a3   : > { %v3513_v48 = vadd.f32 %v7527_v8, %v3378_v47 }
 0x3a4   : > { %3642 = vst [vmem:[%s5255_s6 + $0x3f8] sm:$0xff] %v3514_v36 }
 0x3a5   : > { %3641 = vst [vmem:[%s5255_s6 + $0x3f0] sm:$0xff] %v3513_v48 }
 0x3a6   : > { %4510 = shalt.err (!%p4507_p3)
}
 0x3a7   : > { %s4511_s16 = scalar_lea.hbm %s7809_s11, 16384  ;;  %s4515_s23 = scalar_lea.hbm %s7863_s5, 65536 }
 0x3a8   : > { %p4512_p4 = scmp.ne.s32.totalorder %s7809_s11, %s4511_s16  ;;  %p4516_p9 = scmp.lt.s32.totalorder %s7809_s11, %s7863_s5 }
 0x3a9   : > { %p4517_p10 = scmp.lt.s32.totalorder %s4515_s23, %s4511_s16 }
 0x3aa   : > { %p4513_p7 = pnand %p4512_p4, %p4630_p5 }
 0x3ab   : > { %p4518_p11 = por %p4517_p10, %p4516_p9 }
 0x3ac   : > { %p4514_p8 = pneg %p4513_p7 }
 0x3ae   : > { %p4519_p12 = pnand %p4518_p11, %p4514_p8 }
 0x3b0   : > { %4522 = shalt.err (!%p4519_p12)
}
 0x3b1   : > { %s4560_s30 = smov 128   ;;  %s4561_s7 = smov 8  }
 0x3b2   : > { %4193 = dma.vmem_to_hbm [thread:$0]  (%p4630_p5), %s7811_s8, 16384, %s7809_s11, %s7818_s22, %s4560_s30, %s4560_s30, %s4561_s7  }
 0x3b3 PF: > { %p4199_p13 = scmp.ge.s32.totalorder %s4557_s21, 2  ;;  %s3672_s9 = sand.u32 1, %s4545_s18  }
 0x3b4   : > { %s3673_s10 = scalar_lea.sflag [#allocation3], %s3672_s9 }
 0x3b5   : > { %p4196_p0 = pnand %p4199_p13, %p4634_p6 }
 0x3b7   : > { %p4197_p1 = pneg %p4196_p0 }
 0x3b9   : > { %4540 = dma.done.wait (%p4197_p1), %s3673_s10, 16384  }
 0x3ba   : > { %4542 = vsyncadd (%p4197_p1), %s3673_s10, 4294950912  ;;  %p15_p2 = scmp.ge.s32.totalorder %s4617_s24, 6   ;;  %s8967_s18 = smov %s4549_s19 }
 0x3bb   : > { %s8968_s19 = smov %s4553_s20  ;;  %s8969_s20 = smov %s4628_s27 }
 0x3bc   : > { %s8970_s21 = smov %s4617_s24  ;;  %17 = sbr.rel (!%p15_p2) target bundleno = 3 (0x3), region = 75 }
 0x3c1   :  { %3678 = vsyncpa [#allocation3], 1 }
 0x3c2   :  { %3680 = vsyncpa [#allocation3 + $0x1], 1 }

</bundles_post_ra>
